<compile_context>
chip_gen: v6e
topology: v6e:2x2x1
jax: 0.10.0
libtpu: 0.0.40
codegen_flags: <defaults>
</compile_context>

<pallas_src>
import functools

import jax
import jax.numpy as jnp
from jax.experimental import pallas as pl
from jax.experimental.pallas import tpu as pltpu


def _spatial_attention_kernel(x_ref, w_ref, b_ref, o_ref, pad_ref, *, C, K):
    """Fused: channel-max/mean -> concat -> KxK conv (pad K//2) -> sigmoid."""
    B = x_ref.shape[0]
    H = x_ref.shape[2]
    W = x_ref.shape[3]
    P = K // 2

    # ---- channel max & mean (explicit unrolled reduction; C is small) -------
    x0 = x_ref[:, 0, :, :]
    m = x0
    s = x0
    for c in range(1, C):
        xc = x_ref[:, c, :, :]
        m = jnp.maximum(m, xc)
        s = s + xc
    a = s * (1.0 / C)

    # ---- zero-padded [max, avg] maps built once in a VMEM scratch ------------
    pad_ref[...] = jnp.zeros_like(pad_ref)
    pad_ref[0, :, P:P + H, P:P + W] = m
    pad_ref[1, :, P:P + H, P:P + W] = a

    # Single bulk load; every conv tap below is a static slice of this value
    # (in-register), not a separate unaligned VMEM load.
    padded = pad_ref[...]                      # (2, B, H+2P, W+2P) f32

    # ---- KxK conv over the 2-channel map as shifted-window FMAs -------------
    # Scalar weights come from SMEM; accumulation stays in f32 registers.
    acc = jnp.zeros((B, H, W), jnp.float32) + b_ref[0]
    for ci in range(2):
        plane = padded[ci]                     # (B, H+2P, W+2P)
        for di in range(K):
            for dj in range(K):
                wscal = w_ref[ci * K * K + di * K + dj]
                acc = acc + wscal * plane[:, di:di + H, dj:dj + W]

    # ---- sigmoid (exp runs on the EUP slot) and store ------------------------
    o_ref[:, 0, :, :] = 1.0 / (1.0 + jnp.exp(-acc))


def spatial_attention(x, weight, bias, *, kernel_size=7):
    """x: (B, C, H, W); weight: (1, 2, K, K); bias: (1,). Returns (B, 1, H, W)."""
    B, C, H, W = x.shape
    K = kernel_size
    P = K // 2
    w_flat = weight.reshape(2 * K * K).astype(jnp.float32)   # SMEM scalar table
    b = bias.reshape(1).astype(jnp.float32)
    kernel = functools.partial(_spatial_attention_kernel, C=C, K=K)
    return pl.pallas_call(
        kernel,
        out_shape=jax.ShapeDtypeStruct((B, 1, H, W), jnp.float32),
        in_specs=[
            pl.BlockSpec(memory_space=pltpu.MemorySpace.VMEM),   # feature map
            pl.BlockSpec(memory_space=pltpu.MemorySpace.SMEM),   # conv weights
            pl.BlockSpec(memory_space=pltpu.MemorySpace.SMEM),   # conv bias
        ],
        out_specs=pl.BlockSpec(memory_space=pltpu.MemorySpace.VMEM),
        scratch_shapes=[
            pltpu.VMEM((2, B, H + 2 * P, W + 2 * P), jnp.float32),  # padded maps
        ],
    )(x.astype(jnp.float32), w_flat, b)


def spatial_attention_ref(x, weight, bias, *, kernel_size=7):
    """Pure-JAX reference (matches the PyTorch module semantics)."""
    m = jnp.max(x, axis=1, keepdims=True)
    a = jnp.mean(x, axis=1, keepdims=True)
    r = jnp.concatenate([m, a], axis=1)
    out = jax.lax.conv_general_dilated(
        r, weight, window_strides=(1, 1),
        padding=[(kernel_size // 2, kernel_size // 2)] * 2,
        dimension_numbers=("NCHW", "OIHW", "NCHW"),
        precision=jax.lax.Precision.HIGHEST)
    out = out + bias.reshape(1, 1, 1, 1)
    return jax.nn.sigmoid(out)


if __name__ == "__main__":
    key = jax.random.PRNGKey(0)
    kx, kw, kb = jax.random.split(key, 3)

    B, C, H, W = 2, 4, 16, 16
    K = 7
    x = jax.random.normal(kx, (B, C, H, W), jnp.float32)

    # nn.Conv2d-style init: U(-1/sqrt(fan_in), 1/sqrt(fan_in)), fan_in = 2*K*K.
    fan_in = 2 * K * K
    bound = 1.0 / (fan_in ** 0.5)
    weight = jax.random.uniform(kw, (1, 2, K, K), jnp.float32, -bound, bound)
    bias = jax.random.uniform(kb, (1,), jnp.float32, -bound, bound)

    out = spatial_attention(x, weight, bias, kernel_size=K)
    out = jax.block_until_ready(out)

    ref = spatial_attention_ref(x, weight, bias, kernel_size=K)
    assert out.shape == (B, 1, H, W), out.shape
    assert bool(jnp.all(jnp.isfinite(out)))
    assert bool(jnp.allclose(out, ref, rtol=1e-4, atol=1e-4)), \
        float(jnp.max(jnp.abs(out - ref)))
    print("KERNEL_OK")
</pallas_src>

<mosaic_0001>
module attributes {stable_mosaic.version = 11 : i64} {
  func.func @_spatial_attention_kernel(%arg0: memref<2x4x16x16xf32, #tpu.memory_space<vmem>>, %arg1: memref<98xf32, #tpu.memory_space<smem>>, %arg2: memref<1xf32, #tpu.memory_space<smem>>, %arg3: memref<2x1x16x16xf32, #tpu.memory_space<vmem>>, %arg4: memref<2x2x22x22xf32, #tpu.memory_space<vmem>>) attributes {dimension_semantics = [], scalar_prefetch = 0 : i64, scratch_operands = 1 : i64, tpu.core_type = #tpu.core_type<tc>} {
    %c0 = arith.constant 0 : index
    %c0_0 = arith.constant 0 : index
    %c0_1 = arith.constant 0 : index
    %c0_2 = arith.constant 0 : index
    %0 = vector.load %arg0[%c0, %c0_0, %c0_1, %c0_2] : memref<2x4x16x16xf32, #tpu.memory_space<vmem>>, vector<2x1x16x16xf32>
    %1 = vector.shape_cast %0 : vector<2x1x16x16xf32> to vector<2x16x16xf32>
    %c0_3 = arith.constant 0 : index
    %c1 = arith.constant 1 : index
    %c0_4 = arith.constant 0 : index
    %c0_5 = arith.constant 0 : index
    %2 = vector.load %arg0[%c0_3, %c1, %c0_4, %c0_5] : memref<2x4x16x16xf32, #tpu.memory_space<vmem>>, vector<2x1x16x16xf32>
    %3 = vector.shape_cast %2 : vector<2x1x16x16xf32> to vector<2x16x16xf32>
    %4 = arith.maximumf %1, %3 : vector<2x16x16xf32>
    %5 = arith.addf %1, %3 : vector<2x16x16xf32>
    %c0_6 = arith.constant 0 : index
    %c2 = arith.constant 2 : index
    %c0_7 = arith.constant 0 : index
    %c0_8 = arith.constant 0 : index
    %6 = vector.load %arg0[%c0_6, %c2, %c0_7, %c0_8] : memref<2x4x16x16xf32, #tpu.memory_space<vmem>>, vector<2x1x16x16xf32>
    %7 = vector.shape_cast %6 : vector<2x1x16x16xf32> to vector<2x16x16xf32>
    %8 = arith.maximumf %4, %7 : vector<2x16x16xf32>
    %9 = arith.addf %5, %7 : vector<2x16x16xf32>
    %c0_9 = arith.constant 0 : index
    %c3 = arith.constant 3 : index
    %c0_10 = arith.constant 0 : index
    %c0_11 = arith.constant 0 : index
    %10 = vector.load %arg0[%c0_9, %c3, %c0_10, %c0_11] : memref<2x4x16x16xf32, #tpu.memory_space<vmem>>, vector<2x1x16x16xf32>
    %11 = vector.shape_cast %10 : vector<2x1x16x16xf32> to vector<2x16x16xf32>
    %12 = arith.maximumf %8, %11 : vector<2x16x16xf32>
    %13 = arith.addf %9, %11 : vector<2x16x16xf32>
    %cst = arith.constant 2.500000e-01 : f32
    %14 = vector.broadcast %cst : f32 to vector<2x16x16xf32>
    %15 = arith.mulf %13, %14 : vector<2x16x16xf32>
    %cst_12 = arith.constant 0.000000e+00 : f32
    %16 = vector.broadcast %cst_12 : f32 to vector<2x2x22x22xf32>
    %c0_13 = arith.constant 0 : index
    %c0_14 = arith.constant 0 : index
    %c0_15 = arith.constant 0 : index
    %c0_16 = arith.constant 0 : index
    %17 = vector.load %arg4[%c0_13, %c0_14, %c0_15, %c0_16] : memref<2x2x22x22xf32, #tpu.memory_space<vmem>>, vector<2x2x22x22xf32>
    tpu.vector_store %arg4[%c0_13, %c0_14, %c0_15, %c0_16], %16 {strides = array<i32>} : memref<2x2x22x22xf32, #tpu.memory_space<vmem>>, vector<2x2x22x22xf32>,
    %c0_17 = arith.constant 0 : index
    %c0_18 = arith.constant 0 : index
    %c3_19 = arith.constant 3 : index
    %c3_20 = arith.constant 3 : index
    %18 = vector.load %arg4[%c0_17, %c0_18, %c3_19, %c3_20] : memref<2x2x22x22xf32, #tpu.memory_space<vmem>>, vector<1x2x16x16xf32>
    %19 = vector.shape_cast %18 : vector<1x2x16x16xf32> to vector<2x16x16xf32>
    %20 = vector.shape_cast %12 : vector<2x16x16xf32> to vector<1x2x16x16xf32>
    tpu.vector_store %arg4[%c0_17, %c0_18, %c3_19, %c3_20], %20 {strides = array<i32>} : memref<2x2x22x22xf32, #tpu.memory_space<vmem>>, vector<1x2x16x16xf32>,
    %c1_21 = arith.constant 1 : index
    %c0_22 = arith.constant 0 : index
    %c3_23 = arith.constant 3 : index
    %c3_24 = arith.constant 3 : index
    %21 = vector.load %arg4[%c1_21, %c0_22, %c3_23, %c3_24] : memref<2x2x22x22xf32, #tpu.memory_space<vmem>>, vector<1x2x16x16xf32>
    %22 = vector.shape_cast %21 : vector<1x2x16x16xf32> to vector<2x16x16xf32>
    %23 = vector.shape_cast %15 : vector<2x16x16xf32> to vector<1x2x16x16xf32>
    tpu.vector_store %arg4[%c1_21, %c0_22, %c3_23, %c3_24], %23 {strides = array<i32>} : memref<2x2x22x22xf32, #tpu.memory_space<vmem>>, vector<1x2x16x16xf32>,
    %c0_25 = arith.constant 0 : index
    %c0_26 = arith.constant 0 : index
    %c0_27 = arith.constant 0 : index
    %c0_28 = arith.constant 0 : index
    %24 = vector.load %arg4[%c0_25, %c0_26, %c0_27, %c0_28] : memref<2x2x22x22xf32, #tpu.memory_space<vmem>>, vector<2x2x22x22xf32>
    %cst_29 = arith.constant 0.000000e+00 : f32
    %25 = vector.broadcast %cst_29 : f32 to vector<2x16x16xf32>
    %c0_30 = arith.constant 0 : index
    %26 = memref.load %arg2[%c0_30] : memref<1xf32, #tpu.memory_space<smem>>
    %27 = vector.broadcast %26 : f32 to vector<2x16x16xf32>
    %28 = arith.addf %25, %27 : vector<2x16x16xf32>
    %29 = vector.extract_strided_slice %24 {offsets = [0, 0, 0, 0], sizes = [1, 2, 22, 22], strides = [1, 1, 1, 1]} : vector<2x2x22x22xf32> to vector<1x2x22x22xf32>
    %30 = vector.shape_cast %29 : vector<1x2x22x22xf32> to vector<2x22x22xf32>
    %c0_31 = arith.constant 0 : index
    %31 = memref.load %arg1[%c0_31] : memref<98xf32, #tpu.memory_space<smem>>
    %32 = vector.extract_strided_slice %30 {offsets = [0, 0, 0], sizes = [2, 16, 16], strides = [1, 1, 1]} : vector<2x22x22xf32> to vector<2x16x16xf32>
    %33 = vector.broadcast %31 : f32 to vector<2x16x16xf32>
    %34 = arith.mulf %33, %32 : vector<2x16x16xf32>
    %35 = arith.addf %28, %34 : vector<2x16x16xf32>
    %c1_32 = arith.constant 1 : index
    %36 = memref.load %arg1[%c1_32] : memref<98xf32, #tpu.memory_space<smem>>
    %37 = vector.extract_strided_slice %30 {offsets = [0, 0, 1], sizes = [2, 16, 16], strides = [1, 1, 1]} : vector<2x22x22xf32> to vector<2x16x16xf32>
    %38 = vector.broadcast %36 : f32 to vector<2x16x16xf32>
    %39 = arith.mulf %38, %37 : vector<2x16x16xf32>
    %40 = arith.addf %35, %39 : vector<2x16x16xf32>
    %c2_33 = arith.constant 2 : index
    %41 = memref.load %arg1[%c2_33] : memref<98xf32, #tpu.memory_space<smem>>
    %42 = vector.extract_strided_slice %30 {offsets = [0, 0, 2], sizes = [2, 16, 16], strides = [1, 1, 1]} : vector<2x22x22xf32> to vector<2x16x16xf32>
    %43 = vector.broadcast %41 : f32 to vector<2x16x16xf32>
    %44 = arith.mulf %43, %42 : vector<2x16x16xf32>
    %45 = arith.addf %40, %44 : vector<2x16x16xf32>
    %c3_34 = arith.constant 3 : index
    %46 = memref.load %arg1[%c3_34] : memref<98xf32, #tpu.memory_space<smem>>
    %47 = vector.extract_strided_slice %30 {offsets = [0, 0, 3], sizes = [2, 16, 16], strides = [1, 1, 1]} : vector<2x22x22xf32> to vector<2x16x16xf32>
    %48 = vector.broadcast %46 : f32 to vector<2x16x16xf32>
    %49 = arith.mulf %48, %47 : vector<2x16x16xf32>
    %50 = arith.addf %45, %49 : vector<2x16x16xf32>
    %c4 = arith.constant 4 : index
    %51 = memref.load %arg1[%c4] : memref<98xf32, #tpu.memory_space<smem>>
    %52 = vector.extract_strided_slice %30 {offsets = [0, 0, 4], sizes = [2, 16, 16], strides = [1, 1, 1]} : vector<2x22x22xf32> to vector<2x16x16xf32>
    %53 = vector.broadcast %51 : f32 to vector<2x16x16xf32>
    %54 = arith.mulf %53, %52 : vector<2x16x16xf32>
    %55 = arith.addf %50, %54 : vector<2x16x16xf32>
    %c5 = arith.constant 5 : index
    %56 = memref.load %arg1[%c5] : memref<98xf32, #tpu.memory_space<smem>>
    %57 = vector.extract_strided_slice %30 {offsets = [0, 0, 5], sizes = [2, 16, 16], strides = [1, 1, 1]} : vector<2x22x22xf32> to vector<2x16x16xf32>
    %58 = vector.broadcast %56 : f32 to vector<2x16x16xf32>
    %59 = arith.mulf %58, %57 : vector<2x16x16xf32>
    %60 = arith.addf %55, %59 : vector<2x16x16xf32>
    %c6 = arith.constant 6 : index
    %61 = memref.load %arg1[%c6] : memref<98xf32, #tpu.memory_space<smem>>
    %62 = vector.extract_strided_slice %30 {offsets = [0, 0, 6], sizes = [2, 16, 16], strides = [1, 1, 1]} : vector<2x22x22xf32> to vector<2x16x16xf32>
    %63 = vector.broadcast %61 : f32 to vector<2x16x16xf32>
    %64 = arith.mulf %63, %62 : vector<2x16x16xf32>
    %65 = arith.addf %60, %64 : vector<2x16x16xf32>
    %c7 = arith.constant 7 : index
    %66 = memref.load %arg1[%c7] : memref<98xf32, #tpu.memory_space<smem>>
    %67 = vector.extract_strided_slice %30 {offsets = [0, 1, 0], sizes = [2, 16, 16], strides = [1, 1, 1]} : vector<2x22x22xf32> to vector<2x16x16xf32>
    %68 = vector.broadcast %66 : f32 to vector<2x16x16xf32>
    %69 = arith.mulf %68, %67 : vector<2x16x16xf32>
    %70 = arith.addf %65, %69 : vector<2x16x16xf32>
    %c8 = arith.constant 8 : index
    %71 = memref.load %arg1[%c8] : memref<98xf32, #tpu.memory_space<smem>>
    %72 = vector.extract_strided_slice %30 {offsets = [0, 1, 1], sizes = [2, 16, 16], strides = [1, 1, 1]} : vector<2x22x22xf32> to vector<2x16x16xf32>
    %73 = vector.broadcast %71 : f32 to vector<2x16x16xf32>
    %74 = arith.mulf %73, %72 : vector<2x16x16xf32>
    %75 = arith.addf %70, %74 : vector<2x16x16xf32>
    %c9 = arith.constant 9 : index
    %76 = memref.load %arg1[%c9] : memref<98xf32, #tpu.memory_space<smem>>
    %77 = vector.extract_strided_slice %30 {offsets = [0, 1, 2], sizes = [2, 16, 16], strides = [1, 1, 1]} : vector<2x22x22xf32> to vector<2x16x16xf32>
    %78 = vector.broadcast %76 : f32 to vector<2x16x16xf32>
    %79 = arith.mulf %78, %77 : vector<2x16x16xf32>
    %80 = arith.addf %75, %79 : vector<2x16x16xf32>
    %c10 = arith.constant 10 : index
    %81 = memref.load %arg1[%c10] : memref<98xf32, #tpu.memory_space<smem>>
    %82 = vector.extract_strided_slice %30 {offsets = [0, 1, 3], sizes = [2, 16, 16], strides = [1, 1, 1]} : vector<2x22x22xf32> to vector<2x16x16xf32>
    %83 = vector.broadcast %81 : f32 to vector<2x16x16xf32>
    %84 = arith.mulf %83, %82 : vector<2x16x16xf32>
    %85 = arith.addf %80, %84 : vector<2x16x16xf32>
    %c11 = arith.constant 11 : index
    %86 = memref.load %arg1[%c11] : memref<98xf32, #tpu.memory_space<smem>>
    %87 = vector.extract_strided_slice %30 {offsets = [0, 1, 4], sizes = [2, 16, 16], strides = [1, 1, 1]} : vector<2x22x22xf32> to vector<2x16x16xf32>
    %88 = vector.broadcast %86 : f32 to vector<2x16x16xf32>
    %89 = arith.mulf %88, %87 : vector<2x16x16xf32>
    %90 = arith.addf %85, %89 : vector<2x16x16xf32>
    %c12 = arith.constant 12 : index
    %91 = memref.load %arg1[%c12] : memref<98xf32, #tpu.memory_space<smem>>
    %92 = vector.extract_strided_slice %30 {offsets = [0, 1, 5], sizes = [2, 16, 16], strides = [1, 1, 1]} : vector<2x22x22xf32> to vector<2x16x16xf32>
    %93 = vector.broadcast %91 : f32 to vector<2x16x16xf32>
    %94 = arith.mulf %93, %92 : vector<2x16x16xf32>
    %95 = arith.addf %90, %94 : vector<2x16x16xf32>
    %c13 = arith.constant 13 : index
    %96 = memref.load %arg1[%c13] : memref<98xf32, #tpu.memory_space<smem>>
    %97 = vector.extract_strided_slice %30 {offsets = [0, 1, 6], sizes = [2, 16, 16], strides = [1, 1, 1]} : vector<2x22x22xf32> to vector<2x16x16xf32>
    %98 = vector.broadcast %96 : f32 to vector<2x16x16xf32>
    %99 = arith.mulf %98, %97 : vector<2x16x16xf32>
    %100 = arith.addf %95, %99 : vector<2x16x16xf32>
    %c14 = arith.constant 14 : index
    %101 = memref.load %arg1[%c14] : memref<98xf32, #tpu.memory_space<smem>>
    %102 = vector.extract_strided_slice %30 {offsets = [0, 2, 0], sizes = [2, 16, 16], strides = [1, 1, 1]} : vector<2x22x22xf32> to vector<2x16x16xf32>
    %103 = vector.broadcast %101 : f32 to vector<2x16x16xf32>
    %104 = arith.mulf %103, %102 : vector<2x16x16xf32>
    %105 = arith.addf %100, %104 : vector<2x16x16xf32>
    %c15 = arith.constant 15 : index
    %106 = memref.load %arg1[%c15] : memref<98xf32, #tpu.memory_space<smem>>
    %107 = vector.extract_strided_slice %30 {offsets = [0, 2, 1], sizes = [2, 16, 16], strides = [1, 1, 1]} : vector<2x22x22xf32> to vector<2x16x16xf32>
    %108 = vector.broadcast %106 : f32 to vector<2x16x16xf32>
    %109 = arith.mulf %108, %107 : vector<2x16x16xf32>
    %110 = arith.addf %105, %109 : vector<2x16x16xf32>
    %c16 = arith.constant 16 : index
    %111 = memref.load %arg1[%c16] : memref<98xf32, #tpu.memory_space<smem>>
    %112 = vector.extract_strided_slice %30 {offsets = [0, 2, 2], sizes = [2, 16, 16], strides = [1, 1, 1]} : vector<2x22x22xf32> to vector<2x16x16xf32>
    %113 = vector.broadcast %111 : f32 to vector<2x16x16xf32>
    %114 = arith.mulf %113, %112 : vector<2x16x16xf32>
    %115 = arith.addf %110, %114 : vector<2x16x16xf32>
    %c17 = arith.constant 17 : index
    %116 = memref.load %arg1[%c17] : memref<98xf32, #tpu.memory_space<smem>>
    %117 = vector.extract_strided_slice %30 {offsets = [0, 2, 3], sizes = [2, 16, 16], strides = [1, 1, 1]} : vector<2x22x22xf32> to vector<2x16x16xf32>
    %118 = vector.broadcast %116 : f32 to vector<2x16x16xf32>
    %119 = arith.mulf %118, %117 : vector<2x16x16xf32>
    %120 = arith.addf %115, %119 : vector<2x16x16xf32>
    %c18 = arith.constant 18 : index
    %121 = memref.load %arg1[%c18] : memref<98xf32, #tpu.memory_space<smem>>
    %122 = vector.extract_strided_slice %30 {offsets = [0, 2, 4], sizes = [2, 16, 16], strides = [1, 1, 1]} : vector<2x22x22xf32> to vector<2x16x16xf32>
    %123 = vector.broadcast %121 : f32 to vector<2x16x16xf32>
    %124 = arith.mulf %123, %122 : vector<2x16x16xf32>
    %125 = arith.addf %120, %124 : vector<2x16x16xf32>
    %c19 = arith.constant 19 : index
    %126 = memref.load %arg1[%c19] : memref<98xf32, #tpu.memory_space<smem>>
    %127 = vector.extract_strided_slice %30 {offsets = [0, 2, 5], sizes = [2, 16, 16], strides = [1, 1, 1]} : vector<2x22x22xf32> to vector<2x16x16xf32>
    %128 = vector.broadcast %126 : f32 to vector<2x16x16xf32>
    %129 = arith.mulf %128, %127 : vector<2x16x16xf32>
    %130 = arith.addf %125, %129 : vector<2x16x16xf32>
    %c20 = arith.constant 20 : index
    %131 = memref.load %arg1[%c20] : memref<98xf32, #tpu.memory_space<smem>>
    %132 = vector.extract_strided_slice %30 {offsets = [0, 2, 6], sizes = [2, 16, 16], strides = [1, 1, 1]} : vector<2x22x22xf32> to vector<2x16x16xf32>
    %133 = vector.broadcast %131 : f32 to vector<2x16x16xf32>
    %134 = arith.mulf %133, %132 : vector<2x16x16xf32>
    %135 = arith.addf %130, %134 : vector<2x16x16xf32>
    %c21 = arith.constant 21 : index
    %136 = memref.load %arg1[%c21] : memref<98xf32, #tpu.memory_space<smem>>
    %137 = vector.extract_strided_slice %30 {offsets = [0, 3, 0], sizes = [2, 16, 16], strides = [1, 1, 1]} : vector<2x22x22xf32> to vector<2x16x16xf32>
    %138 = vector.broadcast %136 : f32 to vector<2x16x16xf32>
    %139 = arith.mulf %138, %137 : vector<2x16x16xf32>
    %140 = arith.addf %135, %139 : vector<2x16x16xf32>
    %c22 = arith.constant 22 : index
    %141 = memref.load %arg1[%c22] : memref<98xf32, #tpu.memory_space<smem>>
    %142 = vector.extract_strided_slice %30 {offsets = [0, 3, 1], sizes = [2, 16, 16], strides = [1, 1, 1]} : vector<2x22x22xf32> to vector<2x16x16xf32>
    %143 = vector.broadcast %141 : f32 to vector<2x16x16xf32>
    %144 = arith.mulf %143, %142 : vector<2x16x16xf32>
    %145 = arith.addf %140, %144 : vector<2x16x16xf32>
    %c23 = arith.constant 23 : index
    %146 = memref.load %arg1[%c23] : memref<98xf32, #tpu.memory_space<smem>>
    %147 = vector.extract_strided_slice %30 {offsets = [0, 3, 2], sizes = [2, 16, 16], strides = [1, 1, 1]} : vector<2x22x22xf32> to vector<2x16x16xf32>
    %148 = vector.broadcast %146 : f32 to vector<2x16x16xf32>
    %149 = arith.mulf %148, %147 : vector<2x16x16xf32>
    %150 = arith.addf %145, %149 : vector<2x16x16xf32>
    %c24 = arith.constant 24 : index
    %151 = memref.load %arg1[%c24] : memref<98xf32, #tpu.memory_space<smem>>
    %152 = vector.extract_strided_slice %30 {offsets = [0, 3, 3], sizes = [2, 16, 16], strides = [1, 1, 1]} : vector<2x22x22xf32> to vector<2x16x16xf32>
    %153 = vector.broadcast %151 : f32 to vector<2x16x16xf32>
    %154 = arith.mulf %153, %152 : vector<2x16x16xf32>
    %155 = arith.addf %150, %154 : vector<2x16x16xf32>
    %c25 = arith.constant 25 : index
    %156 = memref.load %arg1[%c25] : memref<98xf32, #tpu.memory_space<smem>>
    %157 = vector.extract_strided_slice %30 {offsets = [0, 3, 4], sizes = [2, 16, 16], strides = [1, 1, 1]} : vector<2x22x22xf32> to vector<2x16x16xf32>
    %158 = vector.broadcast %156 : f32 to vector<2x16x16xf32>
    %159 = arith.mulf %158, %157 : vector<2x16x16xf32>
    %160 = arith.addf %155, %159 : vector<2x16x16xf32>
    %c26 = arith.constant 26 : index
    %161 = memref.load %arg1[%c26] : memref<98xf32, #tpu.memory_space<smem>>
    %162 = vector.extract_strided_slice %30 {offsets = [0, 3, 5], sizes = [2, 16, 16], strides = [1, 1, 1]} : vector<2x22x22xf32> to vector<2x16x16xf32>
    %163 = vector.broadcast %161 : f32 to vector<2x16x16xf32>
    %164 = arith.mulf %163, %162 : vector<2x16x16xf32>
    %165 = arith.addf %160, %164 : vector<2x16x16xf32>
    %c27 = arith.constant 27 : index
    %166 = memref.load %arg1[%c27] : memref<98xf32, #tpu.memory_space<smem>>
    %167 = vector.extract_strided_slice %30 {offsets = [0, 3, 6], sizes = [2, 16, 16], strides = [1, 1, 1]} : vector<2x22x22xf32> to vector<2x16x16xf32>
    %168 = vector.broadcast %166 : f32 to vector<2x16x16xf32>
    %169 = arith.mulf %168, %167 : vector<2x16x16xf32>
    %170 = arith.addf %165, %169 : vector<2x16x16xf32>
    %c28 = arith.constant 28 : index
    %171 = memref.load %arg1[%c28] : memref<98xf32, #tpu.memory_space<smem>>
    %172 = vector.extract_strided_slice %30 {offsets = [0, 4, 0], sizes = [2, 16, 16], strides = [1, 1, 1]} : vector<2x22x22xf32> to vector<2x16x16xf32>
    %173 = vector.broadcast %171 : f32 to vector<2x16x16xf32>
    %174 = arith.mulf %173, %172 : vector<2x16x16xf32>
    %175 = arith.addf %170, %174 : vector<2x16x16xf32>
    %c29 = arith.constant 29 : index
    %176 = memref.load %arg1[%c29] : memref<98xf32, #tpu.memory_space<smem>>
    %177 = vector.extract_strided_slice %30 {offsets = [0, 4, 1], sizes = [2, 16, 16], strides = [1, 1, 1]} : vector<2x22x22xf32> to vector<2x16x16xf32>
    %178 = vector.broadcast %176 : f32 to vector<2x16x16xf32>
    %179 = arith.mulf %178, %177 : vector<2x16x16xf32>
    %180 = arith.addf %175, %179 : vector<2x16x16xf32>
    %c30 = arith.constant 30 : index
    %181 = memref.load %arg1[%c30] : memref<98xf32, #tpu.memory_space<smem>>
    %182 = vector.extract_strided_slice %30 {offsets = [0, 4, 2], sizes = [2, 16, 16], strides = [1, 1, 1]} : vector<2x22x22xf32> to vector<2x16x16xf32>
    %183 = vector.broadcast %181 : f32 to vector<2x16x16xf32>
    %184 = arith.mulf %183, %182 : vector<2x16x16xf32>
    %185 = arith.addf %180, %184 : vector<2x16x16xf32>
    %c31 = arith.constant 31 : index
    %186 = memref.load %arg1[%c31] : memref<98xf32, #tpu.memory_space<smem>>
    %187 = vector.extract_strided_slice %30 {offsets = [0, 4, 3], sizes = [2, 16, 16], strides = [1, 1, 1]} : vector<2x22x22xf32> to vector<2x16x16xf32>
    %188 = vector.broadcast %186 : f32 to vector<2x16x16xf32>
    %189 = arith.mulf %188, %187 : vector<2x16x16xf32>
    %190 = arith.addf %185, %189 : vector<2x16x16xf32>
    %c32 = arith.constant 32 : index
    %191 = memref.load %arg1[%c32] : memref<98xf32, #tpu.memory_space<smem>>
    %192 = vector.extract_strided_slice %30 {offsets = [0, 4, 4], sizes = [2, 16, 16], strides = [1, 1, 1]} : vector<2x22x22xf32> to vector<2x16x16xf32>
    %193 = vector.broadcast %191 : f32 to vector<2x16x16xf32>
    %194 = arith.mulf %193, %192 : vector<2x16x16xf32>
    %195 = arith.addf %190, %194 : vector<2x16x16xf32>
    %c33 = arith.constant 33 : index
    %196 = memref.load %arg1[%c33] : memref<98xf32, #tpu.memory_space<smem>>
    %197 = vector.extract_strided_slice %30 {offsets = [0, 4, 5], sizes = [2, 16, 16], strides = [1, 1, 1]} : vector<2x22x22xf32> to vector<2x16x16xf32>
    %198 = vector.broadcast %196 : f32 to vector<2x16x16xf32>
    %199 = arith.mulf %198, %197 : vector<2x16x16xf32>
    %200 = arith.addf %195, %199 : vector<2x16x16xf32>
    %c34 = arith.constant 34 : index
    %201 = memref.load %arg1[%c34] : memref<98xf32, #tpu.memory_space<smem>>
    %202 = vector.extract_strided_slice %30 {offsets = [0, 4, 6], sizes = [2, 16, 16], strides = [1, 1, 1]} : vector<2x22x22xf32> to vector<2x16x16xf32>
    %203 = vector.broadcast %201 : f32 to vector<2x16x16xf32>
    %204 = arith.mulf %203, %202 : vector<2x16x16xf32>
    %205 = arith.addf %200, %204 : vector<2x16x16xf32>
    %c35 = arith.constant 35 : index
    %206 = memref.load %arg1[%c35] : memref<98xf32, #tpu.memory_space<smem>>
    %207 = vector.extract_strided_slice %30 {offsets = [0, 5, 0], sizes = [2, 16, 16], strides = [1, 1, 1]} : vector<2x22x22xf32> to vector<2x16x16xf32>
    %208 = vector.broadcast %206 : f32 to vector<2x16x16xf32>
    %209 = arith.mulf %208, %207 : vector<2x16x16xf32>
    %210 = arith.addf %205, %209 : vector<2x16x16xf32>
    %c36 = arith.constant 36 : index
    %211 = memref.load %arg1[%c36] : memref<98xf32, #tpu.memory_space<smem>>
    %212 = vector.extract_strided_slice %30 {offsets = [0, 5, 1], sizes = [2, 16, 16], strides = [1, 1, 1]} : vector<2x22x22xf32> to vector<2x16x16xf32>
    %213 = vector.broadcast %211 : f32 to vector<2x16x16xf32>
    %214 = arith.mulf %213, %212 : vector<2x16x16xf32>
    %215 = arith.addf %210, %214 : vector<2x16x16xf32>
    %c37 = arith.constant 37 : index
    %216 = memref.load %arg1[%c37] : memref<98xf32, #tpu.memory_space<smem>>
    %217 = vector.extract_strided_slice %30 {offsets = [0, 5, 2], sizes = [2, 16, 16], strides = [1, 1, 1]} : vector<2x22x22xf32> to vector<2x16x16xf32>
    %218 = vector.broadcast %216 : f32 to vector<2x16x16xf32>
    %219 = arith.mulf %218, %217 : vector<2x16x16xf32>
    %220 = arith.addf %215, %219 : vector<2x16x16xf32>
    %c38 = arith.constant 38 : index
    %221 = memref.load %arg1[%c38] : memref<98xf32, #tpu.memory_space<smem>>
    %222 = vector.extract_strided_slice %30 {offsets = [0, 5, 3], sizes = [2, 16, 16], strides = [1, 1, 1]} : vector<2x22x22xf32> to vector<2x16x16xf32>
    %223 = vector.broadcast %221 : f32 to vector<2x16x16xf32>
    %224 = arith.mulf %223, %222 : vector<2x16x16xf32>
    %225 = arith.addf %220, %224 : vector<2x16x16xf32>
    %c39 = arith.constant 39 : index
    %226 = memref.load %arg1[%c39] : memref<98xf32, #tpu.memory_space<smem>>
    %227 = vector.extract_strided_slice %30 {offsets = [0, 5, 4], sizes = [2, 16, 16], strides = [1, 1, 1]} : vector<2x22x22xf32> to vector<2x16x16xf32>
    %228 = vector.broadcast %226 : f32 to vector<2x16x16xf32>
    %229 = arith.mulf %228, %227 : vector<2x16x16xf32>
    %230 = arith.addf %225, %229 : vector<2x16x16xf32>
    %c40 = arith.constant 40 : index
    %231 = memref.load %arg1[%c40] : memref<98xf32, #tpu.memory_space<smem>>
    %232 = vector.extract_strided_slice %30 {offsets = [0, 5, 5], sizes = [2, 16, 16], strides = [1, 1, 1]} : vector<2x22x22xf32> to vector<2x16x16xf32>
    %233 = vector.broadcast %231 : f32 to vector<2x16x16xf32>
    %234 = arith.mulf %233, %232 : vector<2x16x16xf32>
    %235 = arith.addf %230, %234 : vector<2x16x16xf32>
    %c41 = arith.constant 41 : index
    %236 = memref.load %arg1[%c41] : memref<98xf32, #tpu.memory_space<smem>>
    %237 = vector.extract_strided_slice %30 {offsets = [0, 5, 6], sizes = [2, 16, 16], strides = [1, 1, 1]} : vector<2x22x22xf32> to vector<2x16x16xf32>
    %238 = vector.broadcast %236 : f32 to vector<2x16x16xf32>
    %239 = arith.mulf %238, %237 : vector<2x16x16xf32>
    %240 = arith.addf %235, %239 : vector<2x16x16xf32>
    %c42 = arith.constant 42 : index
    %241 = memref.load %arg1[%c42] : memref<98xf32, #tpu.memory_space<smem>>
    %242 = vector.extract_strided_slice %30 {offsets = [0, 6, 0], sizes = [2, 16, 16], strides = [1, 1, 1]} : vector<2x22x22xf32> to vector<2x16x16xf32>
    %243 = vector.broadcast %241 : f32 to vector<2x16x16xf32>
    %244 = arith.mulf %243, %242 : vector<2x16x16xf32>
    %245 = arith.addf %240, %244 : vector<2x16x16xf32>
    %c43 = arith.constant 43 : index
    %246 = memref.load %arg1[%c43] : memref<98xf32, #tpu.memory_space<smem>>
    %247 = vector.extract_strided_slice %30 {offsets = [0, 6, 1], sizes = [2, 16, 16], strides = [1, 1, 1]} : vector<2x22x22xf32> to vector<2x16x16xf32>
    %248 = vector.broadcast %246 : f32 to vector<2x16x16xf32>
    %249 = arith.mulf %248, %247 : vector<2x16x16xf32>
    %250 = arith.addf %245, %249 : vector<2x16x16xf32>
    %c44 = arith.constant 44 : index
    %251 = memref.load %arg1[%c44] : memref<98xf32, #tpu.memory_space<smem>>
    %252 = vector.extract_strided_slice %30 {offsets = [0, 6, 2], sizes = [2, 16, 16], strides = [1, 1, 1]} : vector<2x22x22xf32> to vector<2x16x16xf32>
    %253 = vector.broadcast %251 : f32 to vector<2x16x16xf32>
    %254 = arith.mulf %253, %252 : vector<2x16x16xf32>
    %255 = arith.addf %250, %254 : vector<2x16x16xf32>
    %c45 = arith.constant 45 : index
    %256 = memref.load %arg1[%c45] : memref<98xf32, #tpu.memory_space<smem>>
    %257 = vector.extract_strided_slice %30 {offsets = [0, 6, 3], sizes = [2, 16, 16], strides = [1, 1, 1]} : vector<2x22x22xf32> to vector<2x16x16xf32>
    %258 = vector.broadcast %256 : f32 to vector<2x16x16xf32>
    %259 = arith.mulf %258, %257 : vector<2x16x16xf32>
    %260 = arith.addf %255, %259 : vector<2x16x16xf32>
    %c46 = arith.constant 46 : index
    %261 = memref.load %arg1[%c46] : memref<98xf32, #tpu.memory_space<smem>>
    %262 = vector.extract_strided_slice %30 {offsets = [0, 6, 4], sizes = [2, 16, 16], strides = [1, 1, 1]} : vector<2x22x22xf32> to vector<2x16x16xf32>
    %263 = vector.broadcast %261 : f32 to vector<2x16x16xf32>
    %264 = arith.mulf %263, %262 : vector<2x16x16xf32>
    %265 = arith.addf %260, %264 : vector<2x16x16xf32>
    %c47 = arith.constant 47 : index
    %266 = memref.load %arg1[%c47] : memref<98xf32, #tpu.memory_space<smem>>
    %267 = vector.extract_strided_slice %30 {offsets = [0, 6, 5], sizes = [2, 16, 16], strides = [1, 1, 1]} : vector<2x22x22xf32> to vector<2x16x16xf32>
    %268 = vector.broadcast %266 : f32 to vector<2x16x16xf32>
    %269 = arith.mulf %268, %267 : vector<2x16x16xf32>
    %270 = arith.addf %265, %269 : vector<2x16x16xf32>
    %c48 = arith.constant 48 : index
    %271 = memref.load %arg1[%c48] : memref<98xf32, #tpu.memory_space<smem>>
    %272 = vector.extract_strided_slice %30 {offsets = [0, 6, 6], sizes = [2, 16, 16], strides = [1, 1, 1]} : vector<2x22x22xf32> to vector<2x16x16xf32>
    %273 = vector.broadcast %271 : f32 to vector<2x16x16xf32>
    %274 = arith.mulf %273, %272 : vector<2x16x16xf32>
    %275 = arith.addf %270, %274 : vector<2x16x16xf32>
    %276 = vector.extract_strided_slice %24 {offsets = [1, 0, 0, 0], sizes = [1, 2, 22, 22], strides = [1, 1, 1, 1]} : vector<2x2x22x22xf32> to vector<1x2x22x22xf32>
    %277 = vector.shape_cast %276 : vector<1x2x22x22xf32> to vector<2x22x22xf32>
    %c49 = arith.constant 49 : index
    %278 = memref.load %arg1[%c49] : memref<98xf32, #tpu.memory_space<smem>>
    %279 = vector.extract_strided_slice %277 {offsets = [0, 0, 0], sizes = [2, 16, 16], strides = [1, 1, 1]} : vector<2x22x22xf32> to vector<2x16x16xf32>
    %280 = vector.broadcast %278 : f32 to vector<2x16x16xf32>
    %281 = arith.mulf %280, %279 : vector<2x16x16xf32>
    %282 = arith.addf %275, %281 : vector<2x16x16xf32>
    %c50 = arith.constant 50 : index
    %283 = memref.load %arg1[%c50] : memref<98xf32, #tpu.memory_space<smem>>
    %284 = vector.extract_strided_slice %277 {offsets = [0, 0, 1], sizes = [2, 16, 16], strides = [1, 1, 1]} : vector<2x22x22xf32> to vector<2x16x16xf32>
    %285 = vector.broadcast %283 : f32 to vector<2x16x16xf32>
    %286 = arith.mulf %285, %284 : vector<2x16x16xf32>
    %287 = arith.addf %282, %286 : vector<2x16x16xf32>
    %c51 = arith.constant 51 : index
    %288 = memref.load %arg1[%c51] : memref<98xf32, #tpu.memory_space<smem>>
    %289 = vector.extract_strided_slice %277 {offsets = [0, 0, 2], sizes = [2, 16, 16], strides = [1, 1, 1]} : vector<2x22x22xf32> to vector<2x16x16xf32>
    %290 = vector.broadcast %288 : f32 to vector<2x16x16xf32>
    %291 = arith.mulf %290, %289 : vector<2x16x16xf32>
    %292 = arith.addf %287, %291 : vector<2x16x16xf32>
    %c52 = arith.constant 52 : index
    %293 = memref.load %arg1[%c52] : memref<98xf32, #tpu.memory_space<smem>>
    %294 = vector.extract_strided_slice %277 {offsets = [0, 0, 3], sizes = [2, 16, 16], strides = [1, 1, 1]} : vector<2x22x22xf32> to vector<2x16x16xf32>
    %295 = vector.broadcast %293 : f32 to vector<2x16x16xf32>
    %296 = arith.mulf %295, %294 : vector<2x16x16xf32>
    %297 = arith.addf %292, %296 : vector<2x16x16xf32>
    %c53 = arith.constant 53 : index
    %298 = memref.load %arg1[%c53] : memref<98xf32, #tpu.memory_space<smem>>
    %299 = vector.extract_strided_slice %277 {offsets = [0, 0, 4], sizes = [2, 16, 16], strides = [1, 1, 1]} : vector<2x22x22xf32> to vector<2x16x16xf32>
    %300 = vector.broadcast %298 : f32 to vector<2x16x16xf32>
    %301 = arith.mulf %300, %299 : vector<2x16x16xf32>
    %302 = arith.addf %297, %301 : vector<2x16x16xf32>
    %c54 = arith.constant 54 : index
    %303 = memref.load %arg1[%c54] : memref<98xf32, #tpu.memory_space<smem>>
    %304 = vector.extract_strided_slice %277 {offsets = [0, 0, 5], sizes = [2, 16, 16], strides = [1, 1, 1]} : vector<2x22x22xf32> to vector<2x16x16xf32>
    %305 = vector.broadcast %303 : f32 to vector<2x16x16xf32>
    %306 = arith.mulf %305, %304 : vector<2x16x16xf32>
    %307 = arith.addf %302, %306 : vector<2x16x16xf32>
    %c55 = arith.constant 55 : index
    %308 = memref.load %arg1[%c55] : memref<98xf32, #tpu.memory_space<smem>>
    %309 = vector.extract_strided_slice %277 {offsets = [0, 0, 6], sizes = [2, 16, 16], strides = [1, 1, 1]} : vector<2x22x22xf32> to vector<2x16x16xf32>
    %310 = vector.broadcast %308 : f32 to vector<2x16x16xf32>
    %311 = arith.mulf %310, %309 : vector<2x16x16xf32>
    %312 = arith.addf %307, %311 : vector<2x16x16xf32>
    %c56 = arith.constant 56 : index
    %313 = memref.load %arg1[%c56] : memref<98xf32, #tpu.memory_space<smem>>
    %314 = vector.extract_strided_slice %277 {offsets = [0, 1, 0], sizes = [2, 16, 16], strides = [1, 1, 1]} : vector<2x22x22xf32> to vector<2x16x16xf32>
    %315 = vector.broadcast %313 : f32 to vector<2x16x16xf32>
    %316 = arith.mulf %315, %314 : vector<2x16x16xf32>
    %317 = arith.addf %312, %316 : vector<2x16x16xf32>
    %c57 = arith.constant 57 : index
    %318 = memref.load %arg1[%c57] : memref<98xf32, #tpu.memory_space<smem>>
    %319 = vector.extract_strided_slice %277 {offsets = [0, 1, 1], sizes = [2, 16, 16], strides = [1, 1, 1]} : vector<2x22x22xf32> to vector<2x16x16xf32>
    %320 = vector.broadcast %318 : f32 to vector<2x16x16xf32>
    %321 = arith.mulf %320, %319 : vector<2x16x16xf32>
    %322 = arith.addf %317, %321 : vector<2x16x16xf32>
    %c58 = arith.constant 58 : index
    %323 = memref.load %arg1[%c58] : memref<98xf32, #tpu.memory_space<smem>>
    %324 = vector.extract_strided_slice %277 {offsets = [0, 1, 2], sizes = [2, 16, 16], strides = [1, 1, 1]} : vector<2x22x22xf32> to vector<2x16x16xf32>
    %325 = vector.broadcast %323 : f32 to vector<2x16x16xf32>
    %326 = arith.mulf %325, %324 : vector<2x16x16xf32>
    %327 = arith.addf %322, %326 : vector<2x16x16xf32>
    %c59 = arith.constant 59 : index
    %328 = memref.load %arg1[%c59] : memref<98xf32, #tpu.memory_space<smem>>
    %329 = vector.extract_strided_slice %277 {offsets = [0, 1, 3], sizes = [2, 16, 16], strides = [1, 1, 1]} : vector<2x22x22xf32> to vector<2x16x16xf32>
    %330 = vector.broadcast %328 : f32 to vector<2x16x16xf32>
    %331 = arith.mulf %330, %329 : vector<2x16x16xf32>
    %332 = arith.addf %327, %331 : vector<2x16x16xf32>
    %c60 = arith.constant 60 : index
    %333 = memref.load %arg1[%c60] : memref<98xf32, #tpu.memory_space<smem>>
    %334 = vector.extract_strided_slice %277 {offsets = [0, 1, 4], sizes = [2, 16, 16], strides = [1, 1, 1]} : vector<2x22x22xf32> to vector<2x16x16xf32>
    %335 = vector.broadcast %333 : f32 to vector<2x16x16xf32>
    %336 = arith.mulf %335, %334 : vector<2x16x16xf32>
    %337 = arith.addf %332, %336 : vector<2x16x16xf32>
    %c61 = arith.constant 61 : index
    %338 = memref.load %arg1[%c61] : memref<98xf32, #tpu.memory_space<smem>>
    %339 = vector.extract_strided_slice %277 {offsets = [0, 1, 5], sizes = [2, 16, 16], strides = [1, 1, 1]} : vector<2x22x22xf32> to vector<2x16x16xf32>
    %340 = vector.broadcast %338 : f32 to vector<2x16x16xf32>
    %341 = arith.mulf %340, %339 : vector<2x16x16xf32>
    %342 = arith.addf %337, %341 : vector<2x16x16xf32>
    %c62 = arith.constant 62 : index
    %343 = memref.load %arg1[%c62] : memref<98xf32, #tpu.memory_space<smem>>
    %344 = vector.extract_strided_slice %277 {offsets = [0, 1, 6], sizes = [2, 16, 16], strides = [1, 1, 1]} : vector<2x22x22xf32> to vector<2x16x16xf32>
    %345 = vector.broadcast %343 : f32 to vector<2x16x16xf32>
    %346 = arith.mulf %345, %344 : vector<2x16x16xf32>
    %347 = arith.addf %342, %346 : vector<2x16x16xf32>
    %c63 = arith.constant 63 : index
    %348 = memref.load %arg1[%c63] : memref<98xf32, #tpu.memory_space<smem>>
    %349 = vector.extract_strided_slice %277 {offsets = [0, 2, 0], sizes = [2, 16, 16], strides = [1, 1, 1]} : vector<2x22x22xf32> to vector<2x16x16xf32>
    %350 = vector.broadcast %348 : f32 to vector<2x16x16xf32>
    %351 = arith.mulf %350, %349 : vector<2x16x16xf32>
    %352 = arith.addf %347, %351 : vector<2x16x16xf32>
    %c64 = arith.constant 64 : index
    %353 = memref.load %arg1[%c64] : memref<98xf32, #tpu.memory_space<smem>>
    %354 = vector.extract_strided_slice %277 {offsets = [0, 2, 1], sizes = [2, 16, 16], strides = [1, 1, 1]} : vector<2x22x22xf32> to vector<2x16x16xf32>
    %355 = vector.broadcast %353 : f32 to vector<2x16x16xf32>
    %356 = arith.mulf %355, %354 : vector<2x16x16xf32>
    %357 = arith.addf %352, %356 : vector<2x16x16xf32>
    %c65 = arith.constant 65 : index
    %358 = memref.load %arg1[%c65] : memref<98xf32, #tpu.memory_space<smem>>
    %359 = vector.extract_strided_slice %277 {offsets = [0, 2, 2], sizes = [2, 16, 16], strides = [1, 1, 1]} : vector<2x22x22xf32> to vector<2x16x16xf32>
    %360 = vector.broadcast %358 : f32 to vector<2x16x16xf32>
    %361 = arith.mulf %360, %359 : vector<2x16x16xf32>
    %362 = arith.addf %357, %361 : vector<2x16x16xf32>
    %c66 = arith.constant 66 : index
    %363 = memref.load %arg1[%c66] : memref<98xf32, #tpu.memory_space<smem>>
    %364 = vector.extract_strided_slice %277 {offsets = [0, 2, 3], sizes = [2, 16, 16], strides = [1, 1, 1]} : vector<2x22x22xf32> to vector<2x16x16xf32>
    %365 = vector.broadcast %363 : f32 to vector<2x16x16xf32>
    %366 = arith.mulf %365, %364 : vector<2x16x16xf32>
    %367 = arith.addf %362, %366 : vector<2x16x16xf32>
    %c67 = arith.constant 67 : index
    %368 = memref.load %arg1[%c67] : memref<98xf32, #tpu.memory_space<smem>>
    %369 = vector.extract_strided_slice %277 {offsets = [0, 2, 4], sizes = [2, 16, 16], strides = [1, 1, 1]} : vector<2x22x22xf32> to vector<2x16x16xf32>
    %370 = vector.broadcast %368 : f32 to vector<2x16x16xf32>
    %371 = arith.mulf %370, %369 : vector<2x16x16xf32>
    %372 = arith.addf %367, %371 : vector<2x16x16xf32>
    %c68 = arith.constant 68 : index
    %373 = memref.load %arg1[%c68] : memref<98xf32, #tpu.memory_space<smem>>
    %374 = vector.extract_strided_slice %277 {offsets = [0, 2, 5], sizes = [2, 16, 16], strides = [1, 1, 1]} : vector<2x22x22xf32> to vector<2x16x16xf32>
    %375 = vector.broadcast %373 : f32 to vector<2x16x16xf32>
    %376 = arith.mulf %375, %374 : vector<2x16x16xf32>
    %377 = arith.addf %372, %376 : vector<2x16x16xf32>
    %c69 = arith.constant 69 : index
    %378 = memref.load %arg1[%c69] : memref<98xf32, #tpu.memory_space<smem>>
    %379 = vector.extract_strided_slice %277 {offsets = [0, 2, 6], sizes = [2, 16, 16], strides = [1, 1, 1]} : vector<2x22x22xf32> to vector<2x16x16xf32>
    %380 = vector.broadcast %378 : f32 to vector<2x16x16xf32>
    %381 = arith.mulf %380, %379 : vector<2x16x16xf32>
    %382 = arith.addf %377, %381 : vector<2x16x16xf32>
    %c70 = arith.constant 70 : index
    %383 = memref.load %arg1[%c70] : memref<98xf32, #tpu.memory_space<smem>>
    %384 = vector.extract_strided_slice %277 {offsets = [0, 3, 0], sizes = [2, 16, 16], strides = [1, 1, 1]} : vector<2x22x22xf32> to vector<2x16x16xf32>
    %385 = vector.broadcast %383 : f32 to vector<2x16x16xf32>
    %386 = arith.mulf %385, %384 : vector<2x16x16xf32>
    %387 = arith.addf %382, %386 : vector<2x16x16xf32>
    %c71 = arith.constant 71 : index
    %388 = memref.load %arg1[%c71] : memref<98xf32, #tpu.memory_space<smem>>
    %389 = vector.extract_strided_slice %277 {offsets = [0, 3, 1], sizes = [2, 16, 16], strides = [1, 1, 1]} : vector<2x22x22xf32> to vector<2x16x16xf32>
    %390 = vector.broadcast %388 : f32 to vector<2x16x16xf32>
    %391 = arith.mulf %390, %389 : vector<2x16x16xf32>
    %392 = arith.addf %387, %391 : vector<2x16x16xf32>
    %c72 = arith.constant 72 : index
    %393 = memref.load %arg1[%c72] : memref<98xf32, #tpu.memory_space<smem>>
    %394 = vector.extract_strided_slice %277 {offsets = [0, 3, 2], sizes = [2, 16, 16], strides = [1, 1, 1]} : vector<2x22x22xf32> to vector<2x16x16xf32>
    %395 = vector.broadcast %393 : f32 to vector<2x16x16xf32>
    %396 = arith.mulf %395, %394 : vector<2x16x16xf32>
    %397 = arith.addf %392, %396 : vector<2x16x16xf32>
    %c73 = arith.constant 73 : index
    %398 = memref.load %arg1[%c73] : memref<98xf32, #tpu.memory_space<smem>>
    %399 = vector.extract_strided_slice %277 {offsets = [0, 3, 3], sizes = [2, 16, 16], strides = [1, 1, 1]} : vector<2x22x22xf32> to vector<2x16x16xf32>
    %400 = vector.broadcast %398 : f32 to vector<2x16x16xf32>
    %401 = arith.mulf %400, %399 : vector<2x16x16xf32>
    %402 = arith.addf %397, %401 : vector<2x16x16xf32>
    %c74 = arith.constant 74 : index
    %403 = memref.load %arg1[%c74] : memref<98xf32, #tpu.memory_space<smem>>
    %404 = vector.extract_strided_slice %277 {offsets = [0, 3, 4], sizes = [2, 16, 16], strides = [1, 1, 1]} : vector<2x22x22xf32> to vector<2x16x16xf32>
    %405 = vector.broadcast %403 : f32 to vector<2x16x16xf32>
    %406 = arith.mulf %405, %404 : vector<2x16x16xf32>
    %407 = arith.addf %402, %406 : vector<2x16x16xf32>
    %c75 = arith.constant 75 : index
    %408 = memref.load %arg1[%c75] : memref<98xf32, #tpu.memory_space<smem>>
    %409 = vector.extract_strided_slice %277 {offsets = [0, 3, 5], sizes = [2, 16, 16], strides = [1, 1, 1]} : vector<2x22x22xf32> to vector<2x16x16xf32>
    %410 = vector.broadcast %408 : f32 to vector<2x16x16xf32>
    %411 = arith.mulf %410, %409 : vector<2x16x16xf32>
    %412 = arith.addf %407, %411 : vector<2x16x16xf32>
    %c76 = arith.constant 76 : index
    %413 = memref.load %arg1[%c76] : memref<98xf32, #tpu.memory_space<smem>>
    %414 = vector.extract_strided_slice %277 {offsets = [0, 3, 6], sizes = [2, 16, 16], strides = [1, 1, 1]} : vector<2x22x22xf32> to vector<2x16x16xf32>
    %415 = vector.broadcast %413 : f32 to vector<2x16x16xf32>
    %416 = arith.mulf %415, %414 : vector<2x16x16xf32>
    %417 = arith.addf %412, %416 : vector<2x16x16xf32>
    %c77 = arith.constant 77 : index
    %418 = memref.load %arg1[%c77] : memref<98xf32, #tpu.memory_space<smem>>
    %419 = vector.extract_strided_slice %277 {offsets = [0, 4, 0], sizes = [2, 16, 16], strides = [1, 1, 1]} : vector<2x22x22xf32> to vector<2x16x16xf32>
    %420 = vector.broadcast %418 : f32 to vector<2x16x16xf32>
    %421 = arith.mulf %420, %419 : vector<2x16x16xf32>
    %422 = arith.addf %417, %421 : vector<2x16x16xf32>
    %c78 = arith.constant 78 : index
    %423 = memref.load %arg1[%c78] : memref<98xf32, #tpu.memory_space<smem>>
    %424 = vector.extract_strided_slice %277 {offsets = [0, 4, 1], sizes = [2, 16, 16], strides = [1, 1, 1]} : vector<2x22x22xf32> to vector<2x16x16xf32>
    %425 = vector.broadcast %423 : f32 to vector<2x16x16xf32>
    %426 = arith.mulf %425, %424 : vector<2x16x16xf32>
    %427 = arith.addf %422, %426 : vector<2x16x16xf32>
    %c79 = arith.constant 79 : index
    %428 = memref.load %arg1[%c79] : memref<98xf32, #tpu.memory_space<smem>>
    %429 = vector.extract_strided_slice %277 {offsets = [0, 4, 2], sizes = [2, 16, 16], strides = [1, 1, 1]} : vector<2x22x22xf32> to vector<2x16x16xf32>
    %430 = vector.broadcast %428 : f32 to vector<2x16x16xf32>
    %431 = arith.mulf %430, %429 : vector<2x16x16xf32>
    %432 = arith.addf %427, %431 : vector<2x16x16xf32>
    %c80 = arith.constant 80 : index
    %433 = memref.load %arg1[%c80] : memref<98xf32, #tpu.memory_space<smem>>
    %434 = vector.extract_strided_slice %277 {offsets = [0, 4, 3], sizes = [2, 16, 16], strides = [1, 1, 1]} : vector<2x22x22xf32> to vector<2x16x16xf32>
    %435 = vector.broadcast %433 : f32 to vector<2x16x16xf32>
    %436 = arith.mulf %435, %434 : vector<2x16x16xf32>
    %437 = arith.addf %432, %436 : vector<2x16x16xf32>
    %c81 = arith.constant 81 : index
    %438 = memref.load %arg1[%c81] : memref<98xf32, #tpu.memory_space<smem>>
    %439 = vector.extract_strided_slice %277 {offsets = [0, 4, 4], sizes = [2, 16, 16], strides = [1, 1, 1]} : vector<2x22x22xf32> to vector<2x16x16xf32>
    %440 = vector.broadcast %438 : f32 to vector<2x16x16xf32>
    %441 = arith.mulf %440, %439 : vector<2x16x16xf32>
    %442 = arith.addf %437, %441 : vector<2x16x16xf32>
    %c82 = arith.constant 82 : index
    %443 = memref.load %arg1[%c82] : memref<98xf32, #tpu.memory_space<smem>>
    %444 = vector.extract_strided_slice %277 {offsets = [0, 4, 5], sizes = [2, 16, 16], strides = [1, 1, 1]} : vector<2x22x22xf32> to vector<2x16x16xf32>
    %445 = vector.broadcast %443 : f32 to vector<2x16x16xf32>
    %446 = arith.mulf %445, %444 : vector<2x16x16xf32>
    %447 = arith.addf %442, %446 : vector<2x16x16xf32>
    %c83 = arith.constant 83 : index
    %448 = memref.load %arg1[%c83] : memref<98xf32, #tpu.memory_space<smem>>
    %449 = vector.extract_strided_slice %277 {offsets = [0, 4, 6], sizes = [2, 16, 16], strides = [1, 1, 1]} : vector<2x22x22xf32> to vector<2x16x16xf32>
    %450 = vector.broadcast %448 : f32 to vector<2x16x16xf32>
    %451 = arith.mulf %450, %449 : vector<2x16x16xf32>
    %452 = arith.addf %447, %451 : vector<2x16x16xf32>
    %c84 = arith.constant 84 : index
    %453 = memref.load %arg1[%c84] : memref<98xf32, #tpu.memory_space<smem>>
    %454 = vector.extract_strided_slice %277 {offsets = [0, 5, 0], sizes = [2, 16, 16], strides = [1, 1, 1]} : vector<2x22x22xf32> to vector<2x16x16xf32>
    %455 = vector.broadcast %453 : f32 to vector<2x16x16xf32>
    %456 = arith.mulf %455, %454 : vector<2x16x16xf32>
    %457 = arith.addf %452, %456 : vector<2x16x16xf32>
    %c85 = arith.constant 85 : index
    %458 = memref.load %arg1[%c85] : memref<98xf32, #tpu.memory_space<smem>>
    %459 = vector.extract_strided_slice %277 {offsets = [0, 5, 1], sizes = [2, 16, 16], strides = [1, 1, 1]} : vector<2x22x22xf32> to vector<2x16x16xf32>
    %460 = vector.broadcast %458 : f32 to vector<2x16x16xf32>
    %461 = arith.mulf %460, %459 : vector<2x16x16xf32>
    %462 = arith.addf %457, %461 : vector<2x16x16xf32>
    %c86 = arith.constant 86 : index
    %463 = memref.load %arg1[%c86] : memref<98xf32, #tpu.memory_space<smem>>
    %464 = vector.extract_strided_slice %277 {offsets = [0, 5, 2], sizes = [2, 16, 16], strides = [1, 1, 1]} : vector<2x22x22xf32> to vector<2x16x16xf32>
    %465 = vector.broadcast %463 : f32 to vector<2x16x16xf32>
    %466 = arith.mulf %465, %464 : vector<2x16x16xf32>
    %467 = arith.addf %462, %466 : vector<2x16x16xf32>
    %c87 = arith.constant 87 : index
    %468 = memref.load %arg1[%c87] : memref<98xf32, #tpu.memory_space<smem>>
    %469 = vector.extract_strided_slice %277 {offsets = [0, 5, 3], sizes = [2, 16, 16], strides = [1, 1, 1]} : vector<2x22x22xf32> to vector<2x16x16xf32>
    %470 = vector.broadcast %468 : f32 to vector<2x16x16xf32>
    %471 = arith.mulf %470, %469 : vector<2x16x16xf32>
    %472 = arith.addf %467, %471 : vector<2x16x16xf32>
    %c88 = arith.constant 88 : index
    %473 = memref.load %arg1[%c88] : memref<98xf32, #tpu.memory_space<smem>>
    %474 = vector.extract_strided_slice %277 {offsets = [0, 5, 4], sizes = [2, 16, 16], strides = [1, 1, 1]} : vector<2x22x22xf32> to vector<2x16x16xf32>
    %475 = vector.broadcast %473 : f32 to vector<2x16x16xf32>
    %476 = arith.mulf %475, %474 : vector<2x16x16xf32>
    %477 = arith.addf %472, %476 : vector<2x16x16xf32>
    %c89 = arith.constant 89 : index
    %478 = memref.load %arg1[%c89] : memref<98xf32, #tpu.memory_space<smem>>
    %479 = vector.extract_strided_slice %277 {offsets = [0, 5, 5], sizes = [2, 16, 16], strides = [1, 1, 1]} : vector<2x22x22xf32> to vector<2x16x16xf32>
    %480 = vector.broadcast %478 : f32 to vector<2x16x16xf32>
    %481 = arith.mulf %480, %479 : vector<2x16x16xf32>
    %482 = arith.addf %477, %481 : vector<2x16x16xf32>
    %c90 = arith.constant 90 : index
    %483 = memref.load %arg1[%c90] : memref<98xf32, #tpu.memory_space<smem>>
    %484 = vector.extract_strided_slice %277 {offsets = [0, 5, 6], sizes = [2, 16, 16], strides = [1, 1, 1]} : vector<2x22x22xf32> to vector<2x16x16xf32>
    %485 = vector.broadcast %483 : f32 to vector<2x16x16xf32>
    %486 = arith.mulf %485, %484 : vector<2x16x16xf32>
    %487 = arith.addf %482, %486 : vector<2x16x16xf32>
    %c91 = arith.constant 91 : index
    %488 = memref.load %arg1[%c91] : memref<98xf32, #tpu.memory_space<smem>>
    %489 = vector.extract_strided_slice %277 {offsets = [0, 6, 0], sizes = [2, 16, 16], strides = [1, 1, 1]} : vector<2x22x22xf32> to vector<2x16x16xf32>
    %490 = vector.broadcast %488 : f32 to vector<2x16x16xf32>
    %491 = arith.mulf %490, %489 : vector<2x16x16xf32>
    %492 = arith.addf %487, %491 : vector<2x16x16xf32>
    %c92 = arith.constant 92 : index
    %493 = memref.load %arg1[%c92] : memref<98xf32, #tpu.memory_space<smem>>
    %494 = vector.extract_strided_slice %277 {offsets = [0, 6, 1], sizes = [2, 16, 16], strides = [1, 1, 1]} : vector<2x22x22xf32> to vector<2x16x16xf32>
    %495 = vector.broadcast %493 : f32 to vector<2x16x16xf32>
    %496 = arith.mulf %495, %494 : vector<2x16x16xf32>
    %497 = arith.addf %492, %496 : vector<2x16x16xf32>
    %c93 = arith.constant 93 : index
    %498 = memref.load %arg1[%c93] : memref<98xf32, #tpu.memory_space<smem>>
    %499 = vector.extract_strided_slice %277 {offsets = [0, 6, 2], sizes = [2, 16, 16], strides = [1, 1, 1]} : vector<2x22x22xf32> to vector<2x16x16xf32>
    %500 = vector.broadcast %498 : f32 to vector<2x16x16xf32>
    %501 = arith.mulf %500, %499 : vector<2x16x16xf32>
    %502 = arith.addf %497, %501 : vector<2x16x16xf32>
    %c94 = arith.constant 94 : index
    %503 = memref.load %arg1[%c94] : memref<98xf32, #tpu.memory_space<smem>>
    %504 = vector.extract_strided_slice %277 {offsets = [0, 6, 3], sizes = [2, 16, 16], strides = [1, 1, 1]} : vector<2x22x22xf32> to vector<2x16x16xf32>
    %505 = vector.broadcast %503 : f32 to vector<2x16x16xf32>
    %506 = arith.mulf %505, %504 : vector<2x16x16xf32>
    %507 = arith.addf %502, %506 : vector<2x16x16xf32>
    %c95 = arith.constant 95 : index
    %508 = memref.load %arg1[%c95] : memref<98xf32, #tpu.memory_space<smem>>
    %509 = vector.extract_strided_slice %277 {offsets = [0, 6, 4], sizes = [2, 16, 16], strides = [1, 1, 1]} : vector<2x22x22xf32> to vector<2x16x16xf32>
    %510 = vector.broadcast %508 : f32 to vector<2x16x16xf32>
    %511 = arith.mulf %510, %509 : vector<2x16x16xf32>
    %512 = arith.addf %507, %511 : vector<2x16x16xf32>
    %c96 = arith.constant 96 : index
    %513 = memref.load %arg1[%c96] : memref<98xf32, #tpu.memory_space<smem>>
    %514 = vector.extract_strided_slice %277 {offsets = [0, 6, 5], sizes = [2, 16, 16], strides = [1, 1, 1]} : vector<2x22x22xf32> to vector<2x16x16xf32>
    %515 = vector.broadcast %513 : f32 to vector<2x16x16xf32>
    %516 = arith.mulf %515, %514 : vector<2x16x16xf32>
    %517 = arith.addf %512, %516 : vector<2x16x16xf32>
    %c97 = arith.constant 97 : index
    %518 = memref.load %arg1[%c97] : memref<98xf32, #tpu.memory_space<smem>>
    %519 = vector.extract_strided_slice %277 {offsets = [0, 6, 6], sizes = [2, 16, 16], strides = [1, 1, 1]} : vector<2x22x22xf32> to vector<2x16x16xf32>
    %520 = vector.broadcast %518 : f32 to vector<2x16x16xf32>
    %521 = arith.mulf %520, %519 : vector<2x16x16xf32>
    %522 = arith.addf %517, %521 : vector<2x16x16xf32>
    %cst_35 = arith.constant 0.000000e+00 : f32
    %523 = vector.broadcast %cst_35 : f32 to vector<2x16x16xf32>
    %524 = arith.subf %523, %522 : vector<2x16x16xf32>
    %525 = math.exp %524 : vector<2x16x16xf32>
    %cst_36 = arith.constant 1.000000e+00 : f32
    %526 = vector.broadcast %cst_36 : f32 to vector<2x16x16xf32>
    %527 = arith.addf %526, %525 : vector<2x16x16xf32>
    %cst_37 = arith.constant 1.000000e+00 : f32
    %528 = vector.broadcast %cst_37 : f32 to vector<2x16x16xf32>
    %529 = arith.divf %528, %527 : vector<2x16x16xf32>
    %c0_38 = arith.constant 0 : index
    %c0_39 = arith.constant 0 : index
    %c0_40 = arith.constant 0 : index
    %c0_41 = arith.constant 0 : index
    %530 = vector.load %arg3[%c0_38, %c0_39, %c0_40, %c0_41] : memref<2x1x16x16xf32, #tpu.memory_space<vmem>>, vector<2x1x16x16xf32>
    %531 = vector.shape_cast %530 : vector<2x1x16x16xf32> to vector<2x16x16xf32>
    %532 = vector.shape_cast %529 : vector<2x16x16xf32> to vector<2x1x16x16xf32>
    tpu.vector_store %arg3[%c0_38, %c0_39, %c0_40, %c0_41], %532 {strides = array<i32>} : memref<2x1x16x16xf32, #tpu.memory_space<vmem>>, vector<2x1x16x16xf32>,
    return
  }
}

</mosaic_0001>

<bundles_post_ra>
// kernel: tpu_custom_call.1
= control target key start
LH: loop header
LB: loop body
LE: loop exit
PB: predicated region body
PF: predicated region fallthrough
CT: control target
= control target key end

     0   :  { %9 = vsyncpa [#allocation5], 0  ;;  %s6568_s0 = inlined_call_operand.hbm [shape: f32[2,4,16,16], index: 0, kind: input, shape index: {}]   ;;  %s6569_s1 = inlined_call_operand.vmem [shape: f32[98], index: 1, kind: input, shape index: {}]   ;;  %s6570_s2 = inlined_call_operand.<no memory space> [shape: f32[1], index: 2, kind: input, shape index: {}]   ;;  %s6571_s3 = inlined_call_operand.hbm [shape: f32[2,1,16,16], index: 3, kind: output, shape index: {}]  }
   0x1   :  { %10 = vsyncpa [#allocation7], 0 }
   0x2   :  { %11 = vsyncpa [#allocation6], 0  ;;  %s4022_s12 = smov [#allocation4]   ;;  %s30_s16 = sshll.u32 %s6569_s1, 4  ;;  %s31_s16 = int_to_ptr.vmem [resolvable:$true] %s30_s16 }
   0x3   :  { %s17_s13 = sshll.u32 %s4022_s12, 4  ;;  %s18_s13 = int_to_ptr.vmem [resolvable:$true] %s17_s13 }
   0x4   :  { %s3972_s17 = scalar_lea.vmem %s18_s13, 2048  ;;  %p3977_p1 = scmp.lt.s32.totalorder %s18_s13, %s18_s13 }
   0x5   :  { %p3973_p0 = scmp.ne.s32.totalorder %s18_s13, %s3972_s17  ;;  %p3978_p2 = scmp.lt.s32.totalorder %s3972_s17, %s3972_s17 }
   0x7   :  { %p3979_p3 = por %p3978_p2, %p3977_p1 }
   0x9   :  { %p3980_p4 = pnand %p3979_p3, %p3973_p0 }
   0xb   :  { %3983 = shalt.err (!%p3980_p4)
}
   0xc   :  { %s4023_s18 = smov 128   ;;  %s4024_s19 = smov 8  }
   0xd   :  { %23 = dma.hbm_to_vmem [thread:$0]  %s6568_s0, 2048, %s18_s13, [#allocation5], %s4023_s18, %s4023_s18, %s4024_s19  }
   0xe   :  { %s3984_s22 = scalar_lea.vmem %s31_s16, 16  ;;  %p3989_p6 = scmp.lt.s32.totalorder %s31_s16, %s31_s16 }
   0xf   :  { %p3985_p5 = scmp.ne.s32.totalorder %s31_s16, %s3984_s22  ;;  %p3990_p7 = scmp.lt.s32.totalorder %s3984_s22, %s3984_s22 }
  0x11   :  { %p3991_p8 = por %p3990_p7, %p3989_p6 }
  0x13   :  { %p3992_p9 = pnand %p3991_p8, %p3985_p5 }
  0x15   :  { %3995 = shalt.err (!%p3992_p9)
}
  0x16   :  { %s4025_s1 = smov [#allocation8]  }
  0x17   :  { %33 = dma.vmem_to_smem %s31_s16, 16, %s4025_s1, [#allocation7]  }
  0x18   :  { %4016 = dma.done.wait [#allocation5], 2048  }
  0x19   :  { %4017 = vsyncadd [#allocation5], 4294965248 }
  0x1a   :  { %4018 = dma.done.wait [#allocation7], 16  }
  0x1b   :  { %4019 = vsyncadd [#allocation7], 4294967280 }
  0x1c   :  { %42 = sfence }
  0x1d   :  { %v45_v0 = vld [vmem:[#allocation4 + $0x40] sm:$0xff]  ;;  %v50_v1 = vld [vmem:[#allocation4 + $0x50] sm:$0xff]  ;;  %vm90_vm0 = vcmask 179200   ;;  %v4026_v6 = vmov 0.0   ;;  %vm93_vm1 = vcmask 177152   ;;  %v46_v11 = vld [vmem:[#allocation4 + $0x48] sm:$0xff] }
  0x1e   :  { %v63_v2 = vld [vmem:[#allocation4 + $0x60] sm:$0xff]  ;;  %v54_v3 = vmax.f32 %v45_v0, %v50_v1  ;;  %v48_v5 = vld [vmem:[#allocation4 + $0x10] sm:$0xff]  ;;  %95 = vst.msk [vmem:[#allocation2 + $0x18] sm:$0xff] %vm90_vm0, %v4026_v6  ;;  %96 = vst.msk [vmem:[#allocation2 + $0x20] sm:$0xff] %vm90_vm0, %v4026_v6  ;;  %v58_v12 = vadd.f32 %v50_v1, %v45_v0  ;;  %s4027_s0 = smov 3   ;;  %vm120_vm2 = vcmask 154648  }
  0x1f   :  { %v43_v4 = vld [vmem:[#allocation4] sm:$0xff]  ;;  %91 = vst.msk [vmem:[#allocation2] sm:$0xff] %vm90_vm0, %v4026_v6  ;;  %92 = vst.msk [vmem:[#allocation2 + $0x8] sm:$0xff] %vm90_vm0, %v4026_v6  ;;  %v76_v7 = vld [vmem:[#allocation4 + $0x70] sm:$0xff]  ;;  %s3810_s23 = sld [smem:[#allocation8 + $0x1]]  ;;  %s4028_s25 = smov 127  }
  0x20   :  { %98 = vst.msk [vmem:[#allocation2 + $0x30] sm:$0xff] %vm90_vm0, %v4026_v6  ;;  %99 = vst.msk [vmem:[#allocation2 + $0x38] sm:$0xff] %vm90_vm0, %v4026_v6  ;;  %v52_v8 = vmax.f32 %v43_v4, %v48_v5  ;;  %v56_v9 = vadd.f32 %v48_v5, %v43_v4  ;;  %v61_v10 = vld [vmem:[#allocation4 + $0x20] sm:$0xff]  ;;  %v67_v13 = vmax.f32 %v54_v3, %v63_v2  ;;  %v74_v14 = vld [vmem:[#allocation4 + $0x30] sm:$0xff]  ;;  %s3811_s24 = sld [smem:[#allocation8 + $0x2]]  ;;  %s4029_s27 = smov 126  }
  0x21   :  { %101 = vst.msk [vmem:[#allocation2 + $0x48] sm:$0xff] %vm90_vm0, %v4026_v6  ;;  %102 = vst.msk [vmem:[#allocation2 + $0x50] sm:$0xff] %vm90_vm0, %v4026_v6  ;;  %v51_v15 = vld [vmem:[#allocation4 + $0x58] sm:$0xff]  ;;  %v64_v16 = vld [vmem:[#allocation4 + $0x68] sm:$0xff]  ;;  %v71_v34 = vadd.f32 %v63_v2, %v58_v12  ;;  %s3812_s26 = sld [smem:[#allocation8 + $0x3]]  ;;  %s4030_s29 = smov 125  }
  0x22   :  { %97 = vst.msk [vmem:[#allocation2 + $0x28] sm:$0x3f] %vm93_vm1, %v4026_v6  ;;  %94 = vst.msk [vmem:[#allocation2 + $0x10] sm:$0x3f] %vm93_vm1, %v4026_v6  ;;  %v65_v17 = vmax.f32 %v52_v8, %v61_v10  ;;  %v69_v18 = vadd.f32 %v61_v10, %v56_v9  ;;  %v55_v19 = vmax.f32 %v46_v11, %v51_v15  ;;  %v44_v20 = vld [vmem:[#allocation4 + $0x8] sm:$0xff]  ;;  %v49_v21 = vld [vmem:[#allocation4 + $0x18] sm:$0xff] }
  0x23   :  { %100 = vst.msk [vmem:[#allocation2 + $0x40] sm:$0x3f] %vm93_vm1, %v4026_v6  ;;  %103 = vst.msk [vmem:[#allocation2 + $0x58] sm:$0x3f] %vm93_vm1, %v4026_v6  ;;  %v62_v22 = vld [vmem:[#allocation4 + $0x28] sm:$0xff]  ;;  %v59_v23 = vadd.f32 %v51_v15, %v46_v11  ;;  %v80_v24 = vmax.f32 %v67_v13, %v76_v7  ;;  %v77_v25 = vld [vmem:[#allocation4 + $0x78] sm:$0xff]  ;;  %v53_v26 = vmax.f32 %v44_v20, %v49_v21 }
  0x24   :  { %v57_v27 = vadd.f32 %v49_v21, %v44_v20  ;;  %v78_v28 = vmax.f32 %v65_v17, %v74_v14  ;;  %v68_v29 = vmax.f32 %v55_v19, %v64_v16  ;;  %v75_v30 = vld [vmem:[#allocation4 + $0x38] sm:$0xff]  ;;  %v82_v35 = vadd.f32 %v74_v14, %v69_v18  ;;  %s3813_s28 = sld [smem:[#allocation8 + $0x4]]  ;;  %s4031_s4 = smov 124  }
  0x25   :  { %112 = vrot.lane.b32.xlu1 %v80_v24, %s4027_s0  ;;  %v66_v31 = vmax.f32 %v53_v26, %v62_v22  ;;  %v72_v33 = vadd.f32 %v64_v16, %v59_v23  ;;  %v84_v41 = vadd.f32 %v76_v7, %v71_v34  ;;  %v172_v49 = vstv %s3810_s23  ;;  %s3814_s30 = sld [smem:[#allocation8 + $0x5]]  ;;  %s4032_s7 = smov 123  }
  0x26   :  { %v70_v32 = vadd.f32 %v62_v22, %v57_v27  ;;  %108 = vrot.lane.b32.xlu0 %v78_v28, %s4027_s0  ;;  %v81_v36 = vmax.f32 %v68_v29, %v77_v25  ;;  %v86_v42 = vmul.f32 0.25, %v82_v35  ;;  %v198_v61 = vstv %s3811_s24  ;;  %s3815_s5 = sld [smem:[#allocation8 + $0x6]]  ;;  %s4033_s9 = smov 122  }
  0x27   :  { %v79_v37 = vmax.f32 %v66_v31, %v75_v30  ;;  %v85_v40 = vadd.f32 %v77_v25, %v72_v33  ;;  %v88_v44 = vmul.f32 0.25, %v84_v41  ;;  %v224_v2 = vstv %s3812_s26  ;;  %s3817_s6 = sld [smem:[#allocation8 + $0x8]] }
  0x28   :  { %v83_v38 = vadd.f32 %v75_v30, %v70_v32  ;;  %s3818_s8 = sld [smem:[#allocation8 + $0x9]]  ;;  %vm341_vm3 = vcmask 1046528   ;;  %vm614_vm4 = vcmask 1045504   ;;  %vm887_vm5 = vcmask 1044480  }
  0x29   :  { %114 = vrot.lane.b32.xlu1 %v81_v36, %s4027_s0  ;;  %v89_v43 = vmul.f32 0.25, %v85_v40  ;;  %s3819_s10 = sld [smem:[#allocation8 + $0xa]]  ;;  %vm1160_vm6 = vcmask 1043456   ;;  %vm1433_vm7 = vcmask 1042432   ;;  %vm1706_vm8 = vcmask 1041408  }
  0x2a   :  { %v87_v39 = vmul.f32 0.25, %v83_v38  ;;  %110 = vrot.lane.b32.xlu0 %v79_v37, %s4027_s0  ;;  %v250_v7 = vstv %s3813_s28  ;;  %s3820_s11 = sld [smem:[#allocation8 + $0xb]]  ;;  %vm3787_vm9 = vcmask 130048  }
  0x2b   :  { %v276_v12 = vstv %s3814_s30  ;;  %s3821_s12 = sld [smem:[#allocation8 + $0xc]] }
  0x2c   :  { %v302_v17 = vstv %s3815_s5  ;;  %s3822_s13 = sld [smem:[#allocation8 + $0xd]] }
  0x2d   :  { %131 = vrot.lane.b32.xlu1 %v87_v39, %s4027_s0  ;;  %v361_v20 = vstv %s3817_s6  ;;  %s3824_s14 = sld [smem:[#allocation8 + $0xf]] }
  0x2e   :  { %129 = vrot.lane.b32.xlu0 %v86_v42, %s4027_s0  ;;  %v401_v32 = vstv %s3818_s8  ;;  %s3825_s15 = sld [smem:[#allocation8 + $0x10]] }
  0x2f   :  { %s3826_s16 = sld [smem:[#allocation8 + $0x11]] }
  0x30   :  { %s3827_s17 = sld [smem:[#allocation8 + $0x12]] }
  0x31   :  { %135 = vrot.lane.b32.xlu1 %v89_v43, %s4027_s0  ;;  %s3828_s20 = sld [smem:[#allocation8 + $0x13]] }
  0x32   :  { %133 = vrot.lane.b32.xlu0 %v88_v44, %s4027_s0  ;;  %s3829_s21 = sld [smem:[#allocation8 + $0x14]] }
  0x33   :  { %s3831_s22 = sld [smem:[#allocation8 + $0x16]] }
  0x34   :  { %s3832_s1 = sld [smem:[#allocation8 + $0x17]] }
  0x35   :  { %s3833_s0 = sld [smem:[#allocation8 + $0x18]] }
  0x36   :  { %s3834_s23 = sld [smem:[#allocation8 + $0x19]] }
  0x37   :  { %s3835_s24 = sld [smem:[#allocation8 + $0x1a]] }
  0x38   :  { %s3836_s26 = sld [smem:[#allocation8 + $0x1b]] }
  0x39   :  { %s3838_s28 = sld [smem:[#allocation8 + $0x1d]] }
  0x3a   :  { %s3839_s30 = sld [smem:[#allocation8 + $0x1e]] }
  0x3b   :  { %s3840_s5 = sld [smem:[#allocation8 + $0x1f]] }
  0x3c   :  { %s3841_s6 = sld [smem:[#allocation8 + $0x20]] }
  0x3d   :  { %s3842_s8 = sld [smem:[#allocation8 + $0x21]] }
  0x97   :  { %v113_v45 = vpop.permute.xlu1 %112 }
  0x98   :  { %123 = vst.msk [vmem:[#allocation2 + $0x1b] sm:$0xff] %vm120_vm2, %v113_v45  ;;  %v109_v46 = vpop.permute.xlu0 %108 }
  0x99   :  { %121 = vst.msk [vmem:[#allocation2 + $0x3] sm:$0xff] %vm120_vm2, %v109_v46 }
  0x9b   :  { %v115_v47 = vpop.permute.xlu1 %114 }
  0x9c   :  { %124 = vst.msk [vmem:[#allocation2 + $0x23] sm:$0xff] %vm120_vm2, %v115_v47  ;;  %v111_v48 = vpop.permute.xlu0 %110 }
  0x9d   :  { %122 = vst.msk [vmem:[#allocation2 + $0xb] sm:$0xff] %vm120_vm2, %v111_v48 }
  0x9f   :  { %v132_v50 = vpop.permute.xlu1 %131  ;;  %v4068_v51 = vld [vmem:[#allocation2 + $0x18] sm:$0xff] }
  0xa0   :  { %v4070_v52 = vld [vmem:[#allocation2] sm:$0xff]  ;;  %v130_v53 = vpop.permute.xlu0 %129  ;;  %143 = vst.msk [vmem:[#allocation2 + $0x3b] sm:$0xff] %vm120_vm2, %v132_v50  ;;  %v175_v55 = vmul.f32 %v172_v49, %v4068_v51  ;;  %v201_v0 = vmul.f32 %v198_v61, %v4068_v51  ;;  %v227_v5 = vmul.f32 %v224_v2, %v4068_v51  ;;  %v253_v10 = vmul.f32 %v250_v7, %v4068_v51 }
  0xa1   :  { %v173_v54 = vmul.f32 %v172_v49, %v4070_v52  ;;  %142 = vst.msk [vmem:[#allocation2 + $0x33] sm:$0xff] %vm120_vm2, %v130_v53  ;;  %v199_v62 = vmul.f32 %v198_v61, %v4070_v52  ;;  %v225_v3 = vmul.f32 %v224_v2, %v4070_v52  ;;  %v251_v8 = vmul.f32 %v250_v7, %v4070_v52 }
  0xa2   :  { %v277_v13 = vmul.f32 %v276_v12, %v4070_v52  ;;  %v279_v15 = vmul.f32 %v276_v12, %v4068_v51  ;;  %v303_v18 = vmul.f32 %v302_v17, %v4070_v52  ;;  %v362_v23 = vmul.f32 %v361_v20, %v4070_v52 }
  0xa3   :  { %181 = vrot.lane.b32.xlu0 %v173_v54, %s4028_s25  ;;  %v136_v56 = vpop.permute.xlu1 %135  ;;  %v4082_v60 = vld [vmem:[#allocation2 + $0x20] sm:$0xff]  ;;  %v305_v24 = vmul.f32 %v302_v17, %v4068_v51  ;;  %v365_v26 = vmul.f32 %v361_v20, %v4068_v51  ;;  %v4131_v30 = vld [vmem:[#allocation2 + $0x28] sm:$0x3f]  ;;  %v402_v40 = vmul.f32 %v401_v32, %v4070_v52  ;;  %v405_v42 = vmul.f32 %v401_v32, %v4068_v51 }
  0xa4   :  { %v4077_v57 = vld [vmem:[#allocation2 + $0x8] sm:$0xff]  ;;  %v134_v58 = vpop.permute.xlu0 %133  ;;  %145 = vst.msk [vmem:[#allocation2 + $0x53] sm:$0xff] %vm120_vm2, %v136_v56  ;;  %v176_v63 = vmul.f32 %v172_v49, %v4082_v60  ;;  %v202_v4 = vmul.f32 %v198_v61, %v4082_v60  ;;  %v228_v9 = vmul.f32 %v224_v2, %v4082_v60  ;;  %v254_v14 = vmul.f32 %v250_v7, %v4082_v60  ;;  %v4121_v22 = vld [vmem:[#allocation2 + $0x10] sm:$0x3f] }
  0xa5   :  { %v174_v59 = vmul.f32 %v172_v49, %v4077_v57  ;;  %144 = vst.msk [vmem:[#allocation2 + $0x4b] sm:$0xff] %vm120_vm2, %v134_v58  ;;  %v200_v1 = vmul.f32 %v198_v61, %v4077_v57  ;;  %v226_v6 = vmul.f32 %v224_v2, %v4077_v57  ;;  %v252_v11 = vmul.f32 %v250_v7, %v4077_v57 }
  0xa6   :  { %v278_v16 = vmul.f32 %v276_v12, %v4077_v57  ;;  %v280_v19 = vmul.f32 %v276_v12, %v4082_v60  ;;  %v363_v21 = vmul.f32 %v361_v20, %v4077_v57  ;;  %v304_v25 = vmul.f32 %v302_v17, %v4077_v57 }
  0xa7   :  { %185 = vrot.lane.b32.xlu0 %v175_v55, %s4028_s25  ;;  %183 = vrot.lane.b32.xlu1 %v174_v59, %s4028_s25  ;;  %v366_v28 = vmul.f32 %v361_v20, %v4082_v60  ;;  %v364_v29 = vmul.f32 %v361_v20, %v4121_v22  ;;  %v374_v31 = vrot.slane %v362_v23, 1  ;;  %v306_v33 = vmul.f32 %v302_v17, %v4082_v60 }
  0xa8   :  { %v375_v27 = vrot.slane %v363_v21, 1  ;;  %v379_v34 = vrot.slane %v365_v26, 1  ;;  %v403_v35 = vmul.f32 %v401_v32, %v4077_v57  ;;  %v367_v39 = vmul.f32 %v361_v20, %v4131_v30 }
  0xa9   :  { %v380_v37 = vrot.slane %v366_v28, 1  ;;  %v377_v38 = vrot.slane %v364_v29, 1  ;;  %v406_v43 = vmul.f32 %v401_v32, %v4082_v60  ;;  %v404_v47 = vmul.f32 %v401_v32, %v4121_v22 }
  0xaa   :  { %v376_v36 = vsel %vm341_vm3, %v374_v31, %v375_v27  ;;  %v415_v41 = vrot.slane %v403_v35, 1  ;;  %v382_v46 = vrot.slane %v367_v39, 1  ;;  %v414_v48 = vrot.slane %v402_v40, 1 }
  0xab   :  { %207 = vrot.lane.b32.xlu0 %v199_v62, %s4029_s27  ;;  %187 = vrot.lane.b32.xlu1 %v176_v63, %s4028_s25  ;;  %v381_v44 = vsel %vm341_vm3, %v379_v34, %v380_v37  ;;  %v378_v45 = vsel %vm341_vm3, %v375_v27, %v377_v38  ;;  %v441_v49 = vstv %s3819_s10  ;;  %v419_v50 = vrot.slane %v405_v42, 1  ;;  %s3843_s10 = sld [smem:[#allocation8 + $0x22]] }
  0xac   :  { %v420_v53 = vrot.slane %v406_v43, 1  ;;  %v443_v54 = vmul.f32 %v441_v49, %v4077_v57  ;;  %v416_v55 = vsel %vm341_vm3, %v414_v48, %v415_v41  ;;  %v383_v56 = vsel %vm341_vm3, %v380_v37, %v382_v46 }
  0xad   :  { %v417_v58 = vrot.slane %v404_v47, 1  ;;  %v407_v59 = vmul.f32 %v401_v32, %v4131_v30  ;;  %v442_v61 = vmul.f32 %v441_v49, %v4070_v52  ;;  %v521_v27 = vstv %s3821_s12  ;;  %s3846_s12 = sld [smem:[#allocation8 + $0x25]] }
  0xae   :  { %v421_v62 = vsel %vm341_vm3, %v419_v50, %v420_v53  ;;  %v455_v63 = vrot.slane %v443_v54, 1  ;;  %v523_v31 = vmul.f32 %v521_v27, %v4077_v57  ;;  %v525_v35 = vmul.f32 %v521_v27, %v4068_v51 }
  0xaf   :  { %211 = vrot.lane.b32.xlu0 %v201_v0, %s4029_s27  ;;  %209 = vrot.lane.b32.xlu1 %v200_v1, %s4029_s27  ;;  %v445_v0 = vmul.f32 %v441_v49, %v4068_v51  ;;  %v418_v1 = vsel %vm341_vm3, %v415_v41, %v417_v58  ;;  %v422_v2 = vrot.slane %v407_v59, 1  ;;  %v524_v40 = vmul.f32 %v521_v27, %v4121_v22 }
  0xb0   :  { %v535_v38 = vrot.slane %v523_v31, 1  ;;  %v561_v42 = vstv %s3822_s13  ;;  %v539_v43 = vrot.slane %v525_v35, 1  ;;  %v714_v35 = vstv %s3826_s16  ;;  %s3847_s13 = sld [smem:[#allocation8 + $0x26]] }
  0xb1   :  { %v537_v48 = vrot.slane %v524_v40, 1  ;;  %v562_v50 = vmul.f32 %v561_v42, %v4070_v52  ;;  %v566_v59 = vmul.f32 %v561_v42, %v4082_v60  ;;  %s3850_s16 = sld [smem:[#allocation8 + $0x29]] }
  0xb3   :  { %233 = vrot.lane.b32.xlu0 %v225_v3, %s4030_s29  ;;  %213 = vrot.lane.b32.xlu1 %v202_v4, %s4029_s27  ;;  %v446_v3 = vmul.f32 %v441_v49, %v4082_v60  ;;  %v444_v4 = vmul.f32 %v441_v49, %v4121_v22 }
  0xb5   :  { %v457_v12 = vrot.slane %v444_v4, 1  ;;  %v580_v4 = vrot.slane %v566_v59, 1 }
  0xb7   :  { %237 = vrot.lane.b32.xlu0 %v227_v5, %s4030_s29  ;;  %235 = vrot.lane.b32.xlu1 %v226_v6, %s4030_s29  ;;  %v454_v5 = vrot.slane %v442_v61, 1  ;;  %v481_v6 = vstv %s3820_s11  ;;  %v564_v61 = vmul.f32 %v561_v42, %v4121_v22  ;;  %s3845_s11 = sld [smem:[#allocation8 + $0x24]] }
  0xb8   :  { %v486_v17 = vmul.f32 %v481_v6, %v4082_v60  ;;  %v484_v21 = vmul.f32 %v481_v6, %v4121_v22  ;;  %v487_v32 = vmul.f32 %v481_v6, %v4131_v30 }
  0xb9   :  { %v456_v7 = vsel %vm341_vm3, %v454_v5, %v455_v63  ;;  %v577_v5 = vrot.slane %v564_v61, 1 }
  0xba   :  { %v500_v26 = vrot.slane %v486_v17, 1  ;;  %v497_v29 = vrot.slane %v484_v21, 1  ;;  %v502_v39 = vrot.slane %v487_v32, 1 }
  0xbb   :  { %259 = vrot.lane.b32.xlu0 %v251_v8, %s4031_s4  ;;  %239 = vrot.lane.b32.xlu1 %v228_v9, %s4030_s29  ;;  %v459_v8 = vrot.slane %v445_v0, 1  ;;  %v483_v9 = vmul.f32 %v481_v6, %v4077_v57 }
  0xbc   :  { %v503_v47 = vsel %vm341_vm3, %v500_v26, %v502_v39 }
  0xbf   :  { %263 = vrot.lane.b32.xlu0 %v253_v10, %s4031_s4  ;;  %261 = vrot.lane.b32.xlu1 %v252_v11, %s4031_s4  ;;  %v423_v10 = vsel %vm341_vm3, %v420_v53, %v422_v2  ;;  %v460_v11 = vrot.slane %v446_v3, 1 }
  0xc3   :  { %285 = vrot.lane.b32.xlu0 %v277_v13, %s4032_s7  ;;  %265 = vrot.lane.b32.xlu1 %v254_v14, %s4031_s4  ;;  %v447_v13 = vmul.f32 %v441_v49, %v4131_v30  ;;  %v482_v14 = vmul.f32 %v481_v6, %v4070_v52  ;;  %v527_v49 = vmul.f32 %v521_v27, %v4131_v30 }
  0xc5   :  { %v462_v20 = vrot.slane %v447_v13, 1  ;;  %v494_v23 = vrot.slane %v482_v14, 1  ;;  %v542_v58 = vrot.slane %v527_v49, 1  ;;  %v719_v49 = vmul.f32 %v714_v35, %v4082_v60 }
  0xc7   :  { %289 = vrot.lane.b32.xlu0 %v279_v15, %s4032_s7  ;;  %287 = vrot.lane.b32.xlu1 %v278_v16, %s4032_s7  ;;  %v495_v15 = vrot.slane %v483_v9, 1  ;;  %v485_v16 = vmul.f32 %v481_v6, %v4068_v51  ;;  %v463_v28 = vsel %vm341_vm3, %v460_v11, %v462_v20  ;;  %v567_v6 = vmul.f32 %v561_v42, %v4131_v30 }
  0xc8   :  { %v733_v61 = vrot.slane %v719_v49, 2 }
  0xc9   :  { %v498_v37 = vsel %vm341_vm3, %v495_v15, %v497_v29  ;;  %v582_v13 = vrot.slane %v567_v6, 1 }
  0xcb   :  { %311 = vrot.lane.b32.xlu0 %v303_v18, %s4033_s9  ;;  %291 = vrot.lane.b32.xlu1 %v280_v19, %s4032_s7  ;;  %v461_v18 = vsel %vm341_vm3, %v459_v8, %v460_v11  ;;  %v458_v19 = vsel %vm341_vm3, %v455_v63, %v457_v12  ;;  %v634_v63 = vstv %s3824_s14  ;;  %v583_v20 = vsel %vm341_vm3, %v580_v4, %v582_v13  ;;  %s3848_s14 = sld [smem:[#allocation8 + $0x27]] }
  0xcc   :  { %v636_v2 = vmul.f32 %v634_v63, %v4077_v57  ;;  %v638_v9 = vmul.f32 %v634_v63, %v4068_v51  ;;  %v637_v14 = vmul.f32 %v634_v63, %v4121_v22 }
  0xce   :  { %v648_v8 = vrot.slane %v636_v2, 2  ;;  %v652_v17 = vrot.slane %v638_v9, 2  ;;  %v650_v21 = vrot.slane %v637_v14, 2 }
  0xcf   :  { %315 = vrot.lane.b32.xlu0 %v305_v24, %s4033_s9  ;;  %313 = vrot.lane.b32.xlu1 %v304_v25, %s4033_s9  ;;  %v496_v24 = vsel %vm341_vm3, %v494_v23, %v495_v15  ;;  %v499_v25 = vrot.slane %v485_v16, 1 }
  0xd0   :  { %v651_v29 = vsel %vm614_vm4, %v648_v8, %v650_v21 }
  0xd1   :  { %v501_v34 = vsel %vm341_vm3, %v499_v25, %v500_v26 }
  0xd3   :  { %384 = vrot.lane.b32.xlu0 %v376_v36, %s4028_s25  ;;  %317 = vrot.lane.b32.xlu1 %v306_v33, %s4033_s9  ;;  %v522_v33 = vmul.f32 %v521_v27, %v4070_v52  ;;  %v526_v36 = vmul.f32 %v521_v27, %v4082_v60 }
  0xd5   :  { %v534_v41 = vrot.slane %v522_v33, 1 }
  0xd7   :  { %388 = vrot.lane.b32.xlu0 %v381_v44, %s4028_s25  ;;  %386 = vrot.lane.b32.xlu1 %v378_v45, %s4028_s25  ;;  %v540_v44 = vrot.slane %v526_v36, 1  ;;  %v563_v45 = vmul.f32 %v561_v42, %v4077_v57  ;;  %v536_v46 = vsel %vm341_vm3, %v534_v41, %v535_v38 }
  0xd9   :  { %v541_v53 = vsel %vm341_vm3, %v539_v43, %v540_v44  ;;  %v575_v54 = vrot.slane %v563_v45, 1  ;;  %v543_v3 = vsel %vm341_vm3, %v540_v44, %v542_v58  ;;  %v715_v43 = vmul.f32 %v714_v35, %v4070_v52 }
  0xdb   :  { %424 = vrot.lane.b32.xlu0 %v416_v55, %s4029_s27  ;;  %390 = vrot.lane.b32.xlu1 %v383_v56, %s4028_s25  ;;  %v565_v55 = vmul.f32 %v561_v42, %v4068_v51  ;;  %v538_v56 = vsel %vm341_vm3, %v535_v38, %v537_v48  ;;  %v578_v12 = vsel %vm341_vm3, %v575_v54, %v577_v5 }
  0xdc   :  { %v716_v38 = vmul.f32 %v714_v35, %v4077_v57  ;;  %v718_v48 = vmul.f32 %v714_v35, %v4068_v51 }
  0xde   :  { %v728_v45 = vrot.slane %v716_v38, 2  ;;  %v732_v59 = vrot.slane %v718_v48, 2 }
  0xdf   :  { %428 = vrot.lane.b32.xlu0 %v421_v62, %s4029_s27  ;;  %426 = vrot.lane.b32.xlu1 %v418_v1, %s4029_s27  ;;  %v574_v62 = vrot.slane %v562_v50, 1  ;;  %v579_v1 = vrot.slane %v565_v55, 1  ;;  %v717_v50 = vmul.f32 %v714_v35, %v4121_v22 }
  0xe0   :  { %v734_v5 = vsel %vm614_vm4, %v732_v59, %v733_v61 }
  0xe1   :  { %v576_v0 = vsel %vm341_vm3, %v574_v62, %v575_v54  ;;  %v581_v11 = vsel %vm341_vm3, %v579_v1, %v580_v4  ;;  %v754_v54 = vstv %s3827_s17  ;;  %v730_v62 = vrot.slane %v717_v50, 2  ;;  %s3852_s17 = sld [smem:[#allocation8 + $0x2b]] }
  0xe2   :  { %v756_v58 = vmul.f32 %v754_v54, %v4077_v57  ;;  %v759_v4 = vmul.f32 %v754_v54, %v4082_v60 }
  0xe3   :  { %464 = vrot.lane.b32.xlu0 %v456_v7, %s4030_s29  ;;  %430 = vrot.lane.b32.xlu1 %v423_v10, %s4029_s27  ;;  %v635_v7 = vmul.f32 %v634_v63, %v4070_v52  ;;  %v639_v10 = vmul.f32 %v634_v63, %v4082_v60  ;;  %v731_v6 = vsel %vm614_vm4, %v728_v45, %v730_v62 }
  0xe4   :  { %v768_v2 = vrot.slane %v756_v58, 2  ;;  %v773_v14 = vrot.slane %v759_v4, 2 }
  0xe5   :  { %v647_v15 = vrot.slane %v635_v7, 2 }
  0xe7   :  { %468 = vrot.lane.b32.xlu0 %v461_v18, %s4030_s29  ;;  %466 = vrot.lane.b32.xlu1 %v458_v19, %s4030_s29  ;;  %v649_v16 = vsel %vm614_vm4, %v647_v15, %v648_v8  ;;  %v653_v18 = vrot.slane %v639_v10, 2  ;;  %v674_v19 = vstv %s3825_s15  ;;  %v757_v8 = vmul.f32 %v754_v54, %v4121_v22  ;;  %s3849_s15 = sld [smem:[#allocation8 + $0x28]] }
  0xe8   :  { %v676_v23 = vmul.f32 %v674_v19, %v4077_v57  ;;  %v675_v25 = vmul.f32 %v674_v19, %v4070_v52  ;;  %v678_v27 = vmul.f32 %v674_v19, %v4068_v51  ;;  %v677_v33 = vmul.f32 %v674_v19, %v4121_v22 }
  0xe9   :  { %v654_v26 = vsel %vm614_vm4, %v652_v17, %v653_v18  ;;  %v680_v39 = vmul.f32 %v674_v19, %v4131_v30  ;;  %v794_v15 = vstv %s3828_s20  ;;  %v770_v17 = vrot.slane %v757_v8, 2  ;;  %s3853_s20 = sld [smem:[#allocation8 + $0x2c]] }
  0xea   :  { %v688_v31 = vrot.slane %v676_v23, 2  ;;  %v692_v36 = vrot.slane %v678_v27, 2  ;;  %v690_v42 = vrot.slane %v677_v33, 2  ;;  %v834_v33 = vstv %s3829_s21  ;;  %s3854_s21 = sld [smem:[#allocation8 + $0x2d]] }
  0xeb   :  { %504 = vrot.lane.b32.xlu0 %v496_v24, %s4031_s4  ;;  %470 = vrot.lane.b32.xlu1 %v463_v28, %s4030_s29  ;;  %v640_v24 = vmul.f32 %v634_v63, %v4131_v30  ;;  %v679_v28 = vmul.f32 %v674_v19, %v4082_v60  ;;  %v720_v63 = vmul.f32 %v714_v35, %v4131_v30 }
  0xec   :  { %v760_v19 = vmul.f32 %v754_v54, %v4131_v30  ;;  %v771_v27 = vsel %vm614_vm4, %v768_v2, %v770_v17  ;;  %v836_v38 = vmul.f32 %v834_v33, %v4077_v57  ;;  %v838_v48 = vmul.f32 %v834_v33, %v4068_v51 }
  0xed   :  { %v655_v32 = vrot.slane %v640_v24, 2  ;;  %v735_v7 = vrot.slane %v720_v63, 2  ;;  %v840_v4 = vmul.f32 %v834_v33, %v4131_v30 }
  0xee   :  { %v852_v62 = vrot.slane %v838_v48, 2 }
  0xef   :  { %508 = vrot.lane.b32.xlu0 %v501_v34, %s4031_s4  ;;  %506 = vrot.lane.b32.xlu1 %v498_v37, %s4031_s4  ;;  %v687_v34 = vrot.slane %v675_v25, 2  ;;  %v693_v37 = vrot.slane %v679_v28, 2  ;;  %v656_v41 = vsel %vm614_vm4, %v653_v18, %v655_v32  ;;  %v796_v18 = vmul.f32 %v794_v15, %v4077_v57 }
  0xf0   :  { %v798_v25 = vmul.f32 %v794_v15, %v4068_v51 }
  0xf1   :  { %v689_v40 = vsel %vm614_vm4, %v687_v34, %v688_v31  ;;  %v694_v44 = vsel %vm614_vm4, %v692_v36, %v693_v37  ;;  %v808_v28 = vrot.slane %v796_v18, 2 }
  0xf2   :  { %v812_v36 = vrot.slane %v798_v25, 2 }
  0xf3   :  { %544 = vrot.lane.b32.xlu0 %v536_v46, %s4032_s7  ;;  %510 = vrot.lane.b32.xlu1 %v503_v47, %s4031_s4  ;;  %v695_v46 = vrot.slane %v680_v39, 2  ;;  %v691_v47 = vsel %vm614_vm4, %v688_v31, %v690_v42  ;;  %v797_v31 = vmul.f32 %v794_v15, %v4121_v22  ;;  %v800_v42 = vmul.f32 %v794_v15, %v4131_v30 }
  0xf5   :  { %v815_v50 = vrot.slane %v800_v42, 2 }
  0xf7   :  { %548 = vrot.lane.b32.xlu0 %v541_v53, %s4032_s7  ;;  %546 = vrot.lane.b32.xlu1 %v538_v56, %s4032_s7  ;;  %v727_v53 = vrot.slane %v715_v43, 2  ;;  %v696_v56 = vsel %vm614_vm4, %v693_v37, %v695_v46  ;;  %v835_v43 = vmul.f32 %v834_v33, %v4070_v52 }
  0xf9   :  { %v729_v55 = vsel %vm614_vm4, %v727_v53, %v728_v45  ;;  %v839_v53 = vmul.f32 %v834_v33, %v4082_v60 }
  0xfb   :  { %584 = vrot.lane.b32.xlu0 %v576_v0, %s4033_s9  ;;  %550 = vrot.lane.b32.xlu1 %v543_v3, %s4032_s7  ;;  %v755_v0 = vmul.f32 %v754_v54, %v4070_v52  ;;  %v758_v3 = vmul.f32 %v754_v54, %v4068_v51  ;;  %v837_v54 = vmul.f32 %v834_v33, %v4121_v22 }
  0xfd   :  { %v767_v9 = vrot.slane %v755_v0, 2  ;;  %v772_v13 = vrot.slane %v758_v3, 2  ;;  %v850_v3 = vrot.slane %v837_v54, 2 }
  0xff   :  { %588 = vrot.lane.b32.xlu0 %v581_v11, %s4033_s9  ;;  %586 = vrot.lane.b32.xlu1 %v578_v12, %s4033_s9  ;;  %v769_v12 = vsel %vm614_vm4, %v767_v9, %v768_v2  ;;  %v774_v24 = vsel %vm614_vm4, %v772_v13, %v773_v14  ;;  %v853_v2 = vrot.slane %v839_v53, 2 }
 0x101   :  { %v854_v13 = vsel %vm614_vm4, %v852_v62, %v853_v2 }
 0x103   :  { %657 = vrot.lane.b32.xlu0 %v649_v16, %s4028_s25  ;;  %590 = vrot.lane.b32.xlu1 %v583_v20, %s4033_s9  ;;  %v736_v16 = vsel %vm614_vm4, %v733_v61, %v735_v7  ;;  %v795_v20 = vmul.f32 %v794_v15, %v4070_v52 }
 0x105   :  { %v807_v32 = vrot.slane %v795_v20, 2 }
 0x107   :  { %661 = vrot.lane.b32.xlu0 %v654_v26, %s4028_s25  ;;  %659 = vrot.lane.b32.xlu1 %v651_v29, %s4028_s25  ;;  %v799_v26 = vmul.f32 %v794_v15, %v4082_v60  ;;  %v775_v29 = vrot.slane %v760_v19, 2  ;;  %v809_v39 = vsel %vm614_vm4, %v807_v32, %v808_v28  ;;  %v855_v15 = vrot.slane %v840_v4, 2 }
 0x109   :  { %v813_v37 = vrot.slane %v799_v26, 2  ;;  %v947_v26 = vstv %s3832_s1  ;;  %s3856_s1 = sld [smem:[#allocation8 + $0x2f]] }
 0x10a   :  { %v948_v32 = vmul.f32 %v947_v26, %v4070_v52 }
 0x10b   :  { %697 = vrot.lane.b32.xlu0 %v689_v40, %s4029_s27  ;;  %663 = vrot.lane.b32.xlu1 %v656_v41, %s4028_s25  ;;  %v776_v40 = vsel %vm614_vm4, %v773_v14, %v775_v29  ;;  %v810_v41 = vrot.slane %v797_v31, 2  ;;  %v814_v46 = vsel %vm614_vm4, %v812_v36, %v813_v37  ;;  %v816_v0 = vsel %vm614_vm4, %v813_v37, %v815_v50 }
 0x10c   :  { %v949_v29 = vmul.f32 %v947_v26, %v4077_v57 }
 0x10d   :  { %v811_v49 = vsel %vm614_vm4, %v808_v28, %v810_v41 }
 0x10e   :  { %v961_v41 = vrot.slane %v949_v29, 3 }
 0x10f   :  { %701 = vrot.lane.b32.xlu0 %v694_v44, %s4029_s27  ;;  %699 = vrot.lane.b32.xlu1 %v691_v47, %s4029_s27  ;;  %v848_v47 = vrot.slane %v836_v38, 2  ;;  %v951_v38 = vmul.f32 %v947_v26, %v4068_v51 }
 0x111   :  { %v851_v14 = vsel %vm614_vm4, %v848_v47, %v850_v3  ;;  %v965_v50 = vrot.slane %v951_v38, 3 }
 0x113   :  { %737 = vrot.lane.b32.xlu0 %v729_v55, %s4030_s29  ;;  %703 = vrot.lane.b32.xlu1 %v696_v56, %s4029_s27  ;;  %v847_v55 = vrot.slane %v835_v43, 2  ;;  %v907_v56 = vstv %s3831_s22  ;;  %v950_v43 = vmul.f32 %v947_v26, %v4121_v22  ;;  %s3855_s22 = sld [smem:[#allocation8 + $0x2e]] }
 0x114   :  { %v909_v63 = vmul.f32 %v907_v56, %v4077_v57  ;;  %v911_v9 = vmul.f32 %v907_v56, %v4068_v51  ;;  %v913_v31 = vmul.f32 %v907_v56, %v4131_v30 }
 0x115   :  { %v4254_v1 = vpop.permute.xlu0 %181  ;;  %v849_v61 = vsel %vm614_vm4, %v847_v55, %v848_v47  ;;  %v987_v47 = vstv %s3833_s0  ;;  %v953_v55 = vmul.f32 %v947_v26, %v4131_v30  ;;  %v963_v62 = vrot.slane %v950_v43, 3  ;;  %s3857_s0 = sld [smem:[#allocation8 + $0x30]] }
 0x116   :  { %v921_v8 = vrot.slane %v909_v63, 3  ;;  %v928_v42 = vrot.slane %v913_v31, 3  ;;  %v989_v54 = vmul.f32 %v987_v47, %v4077_v57  ;;  %v988_v63 = vmul.f32 %v987_v47, %v4070_v52 }
 0x117   :  { %741 = vrot.lane.b32.xlu0 %v734_v5, %s4030_s29  ;;  %739 = vrot.lane.b32.xlu1 %v731_v6, %s4030_s29  ;;  %v908_v5 = vmul.f32 %v907_v56, %v4070_v52  ;;  %v993_v29 = vmul.f32 %v987_v47, %v4131_v30 }
 0x118   :  { %v1001_v4 = vrot.slane %v989_v54, 3 }
 0x119   :  { %v4263_v10 = vpop.permute.xlu1 %183  ;;  %v4265_v11 = vpop.permute.xlu0 %185  ;;  %v920_v17 = vrot.slane %v908_v5, 3  ;;  %v968_v5 = vrot.slane %v953_v55, 3  ;;  %v1008_v43 = vrot.slane %v993_v29, 3 }
 0x11b   :  { %777 = vrot.lane.b32.xlu0 %v769_v12, %s4031_s4  ;;  %743 = vrot.lane.b32.xlu1 %v736_v16, %s4030_s29  ;;  %v912_v12 = vmul.f32 %v907_v56, %v4082_v60  ;;  %v910_v16 = vmul.f32 %v907_v56, %v4121_v22  ;;  %v922_v20 = vsel %vm887_vm5, %v920_v17, %v921_v8 }
 0x11d   :  { %v4274_v21 = vpop.permute.xlu1 %187  ;;  %v4276_v23 = vpop.permute.xlu0 %207  ;;  %v926_v25 = vrot.slane %v912_v12, 3  ;;  %v923_v28 = vrot.slane %v910_v16, 3  ;;  %v992_v12 = vmul.f32 %v987_v47, %v4082_v60 }
 0x11f   :  { %781 = vrot.lane.b32.xlu0 %v774_v24, %s4031_s4  ;;  %779 = vrot.lane.b32.xlu1 %v771_v27, %s4031_s4  ;;  %v925_v24 = vrot.slane %v911_v9, 3  ;;  %v856_v27 = vsel %vm614_vm4, %v853_v2, %v855_v15  ;;  %v991_v9 = vmul.f32 %v987_v47, %v4068_v51  ;;  %v1027_v15 = vstv %s3834_s23  ;;  %s3859_s23 = sld [smem:[#allocation8 + $0x32]] }
 0x120   :  { %v1028_v31 = vmul.f32 %v1027_v15, %v4070_v52 }
 0x121   :  { %v4285_v34 = vpop.permute.xlu1 %209  ;;  %v4287_v35 = vpop.permute.xlu0 %211  ;;  %v927_v37 = vsel %vm887_vm5, %v925_v24, %v926_v25 }
 0x123   :  { %817 = vrot.lane.b32.xlu0 %v809_v39, %s4032_s7  ;;  %783 = vrot.lane.b32.xlu1 %v776_v40, %s4031_s4  ;;  %v952_v39 = vmul.f32 %v947_v26, %v4082_v60  ;;  %v924_v40 = vsel %vm887_vm5, %v921_v8, %v923_v28  ;;  %v964_v8 = vsel %vm887_vm5, %v961_v41, %v963_v62  ;;  %v1005_v26 = vrot.slane %v991_v9, 3 }
 0x125   :  { %v4296_v44 = vpop.permute.xlu1 %213  ;;  %v4298_v45 = vpop.permute.xlu0 %233  ;;  %v966_v53 = vrot.slane %v952_v39, 3  ;;  %v1031_v39 = vmul.f32 %v1027_v15, %v4068_v51 }
 0x127   :  { %821 = vrot.lane.b32.xlu0 %v814_v46, %s4032_s7  ;;  %819 = vrot.lane.b32.xlu1 %v811_v49, %s4032_s7  ;;  %v960_v46 = vrot.slane %v948_v32, 3  ;;  %v967_v3 = vsel %vm887_vm5, %v965_v50, %v966_v53  ;;  %v969_v24 = vsel %vm887_vm5, %v966_v53, %v968_v5  ;;  %v1045_v55 = vrot.slane %v1031_v39, 3 }
 0x129   :  { %v4307_v58 = vpop.permute.xlu1 %235  ;;  %v4309_v59 = vpop.permute.xlu0 %237  ;;  %v962_v56 = vsel %vm887_vm5, %v960_v46, %v961_v41  ;;  %v1030_v46 = vmul.f32 %v1027_v15, %v4121_v22 }
 0x12b   :  { %857 = vrot.lane.b32.xlu0 %v849_v61, %s4033_s9  ;;  %823 = vrot.lane.b32.xlu1 %v816_v0, %s4032_s7  ;;  %v929_v61 = vsel %vm887_vm5, %v926_v25, %v928_v42  ;;  %v1029_v25 = vmul.f32 %v1027_v15, %v4077_v57 }
 0x12d   :  { %v4318_v6 = vpop.permute.xlu1 %239  ;;  %v4320_v7 = vpop.permute.xlu0 %259  ;;  %v1041_v38 = vrot.slane %v1029_v25, 3 }
 0x12f   :  { %861 = vrot.lane.b32.xlu0 %v854_v13, %s4033_s9  ;;  %859 = vrot.lane.b32.xlu1 %v851_v14, %s4033_s9  ;;  %v990_v13 = vmul.f32 %v987_v47, %v4121_v22  ;;  %v1000_v14 = vrot.slane %v988_v63, 3  ;;  %v1040_v47 = vrot.slane %v1028_v31, 3  ;;  %v1043_v63 = vrot.slane %v1030_v46, 3 }
 0x131   :  { %v4329_v18 = vpop.permute.xlu1 %261  ;;  %v4331_v19 = vpop.permute.xlu0 %263  ;;  %v1003_v28 = vrot.slane %v990_v13, 3  ;;  %v1042_v54 = vsel %vm887_vm5, %v1040_v47, %v1041_v38 }
 0x133   :  { %930 = vrot.lane.b32.xlu0 %v922_v20, %s4028_s25  ;;  %863 = vrot.lane.b32.xlu1 %v856_v27, %s4033_s9  ;;  %v1002_v20 = vsel %vm887_vm5, %v1000_v14, %v1001_v4  ;;  %v1006_v27 = vrot.slane %v992_v12, 3  ;;  %v1004_v42 = vsel %vm887_vm5, %v1001_v4, %v1003_v28  ;;  %v1033_v4 = vmul.f32 %v1027_v15, %v4131_v30 }
 0x135   :  { %v4340_v33 = vpop.permute.xlu1 %265  ;;  %v4342_v36 = vpop.permute.xlu0 %285  ;;  %v1007_v41 = vsel %vm887_vm5, %v1005_v26, %v1006_v27  ;;  %v1009_v62 = vsel %vm887_vm5, %v1006_v27, %v1008_v43  ;;  %v1107_v27 = vstv %s3836_s26  ;;  %s3861_s26 = sld [smem:[#allocation8 + $0x34]] }
 0x136   :  { %v1108_v46 = vmul.f32 %v1107_v27, %v4070_v52 }
 0x137   :  { %934 = vrot.lane.b32.xlu0 %v927_v37, %s4028_s25  ;;  %932 = vrot.lane.b32.xlu1 %v924_v40, %s4028_s25  ;;  %v1032_v40 = vmul.f32 %v1027_v15, %v4082_v60  ;;  %v1048_v15 = vrot.slane %v1033_v4, 3  ;;  %v1112_v4 = vmul.f32 %v1107_v27, %v4082_v60 }
 0x139   :  { %v4351_v48 = vpop.permute.xlu1 %287  ;;  %v4353_v49 = vpop.permute.xlu0 %289 }
 0x13b   :  { %970 = vrot.lane.b32.xlu0 %v962_v56, %s4029_s27  ;;  %936 = vrot.lane.b32.xlu1 %v929_v61, %s4028_s25  ;;  %v1046_v56 = vrot.slane %v1032_v40, 3  ;;  %v1067_v61 = vstv %s3835_s24  ;;  %v1109_v40 = vmul.f32 %v1107_v27, %v4077_v57  ;;  %s3860_s24 = sld [smem:[#allocation8 + $0x33]] }
 0x13c   :  { %v1068_v5 = vmul.f32 %v1067_v61, %v4070_v52  ;;  %v1071_v13 = vmul.f32 %v1067_v61, %v4068_v51  ;;  %v1072_v14 = vmul.f32 %v1067_v61, %v4082_v60  ;;  %v1070_v25 = vmul.f32 %v1067_v61, %v4121_v22 }
 0x13d   :  { %v4362_v0 = vpop.permute.xlu1 %291  ;;  %v4364_v2 = vpop.permute.xlu0 %311  ;;  %v1047_v12 = vsel %vm887_vm5, %v1045_v55, %v1046_v56  ;;  %v1073_v43 = vmul.f32 %v1067_v61, %v4131_v30 }
 0x13e   :  { %v1080_v26 = vrot.slane %v1068_v5, 3  ;;  %v1085_v31 = vrot.slane %v1071_v13, 3  ;;  %v1086_v39 = vrot.slane %v1072_v14, 3  ;;  %v1120_v5 = vrot.slane %v1108_v46, 3 }
 0x13f   :  { %974 = vrot.lane.b32.xlu0 %v967_v3, %s4029_s27  ;;  %972 = vrot.lane.b32.xlu1 %v964_v8, %s4029_s27  ;;  %v1069_v3 = vmul.f32 %v1067_v61, %v4077_v57  ;;  %v1111_v61 = vmul.f32 %v1107_v27, %v4068_v51 }
 0x140   :  { %v1087_v55 = vsel %vm887_vm5, %v1085_v31, %v1086_v39 }
 0x141   :  { %v4373_v16 = vpop.permute.xlu1 %313  ;;  %v4375_v17 = vpop.permute.xlu0 %315 }
 0x142   :  { %6572 = vst [vmem:[#allocation13_spill] sm:$0xff] %v4375_v17 }
 0x143   :  { %1010 = vrot.lane.b32.xlu0 %v1002_v20, %s4030_s29  ;;  %976 = vrot.lane.b32.xlu1 %v969_v24, %s4029_s27  ;;  %v1044_v20 = vsel %vm887_vm5, %v1041_v38, %v1043_v63  ;;  %v1081_v24 = vrot.slane %v1069_v3, 3  ;;  %v1110_v63 = vmul.f32 %v1107_v27, %v4121_v22  ;;  %v1088_v3 = vrot.slane %v1073_v43, 3 }
 0x145   :  { %v4384_v32 = vpop.permute.xlu1 %317  ;;  %v4386_v37 = vpop.permute.xlu0 %384  ;;  %v1082_v38 = vsel %vm887_vm5, %v1080_v26, %v1081_v24  ;;  %v1089_v51 = vsel %vm887_vm5, %v1086_v39, %v1088_v3  ;;  %v1126_v26 = vrot.slane %v1112_v4, 3 }
 0x146   :  { %6573 = vst [vmem:[#allocation14_spill] sm:$0xff] %v4384_v32  ;;  %6574 = vst [vmem:[#allocation15_spill] sm:$0xff] %v4386_v37 }
 0x147   :  { %1014 = vrot.lane.b32.xlu0 %v1007_v41, %s4030_s29  ;;  %1012 = vrot.lane.b32.xlu1 %v1004_v42, %s4030_s29  ;;  %v1049_v41 = vsel %vm887_vm5, %v1046_v56, %v1048_v15  ;;  %v1083_v42 = vrot.slane %v1070_v25, 3  ;;  %v1113_v15 = vmul.f32 %v1107_v27, %v4131_v30  ;;  %v1125_v25 = vrot.slane %v1111_v61, 3 }
 0x149   :  { %v4395_v50 = vpop.permute.xlu1 %386  ;;  %v4397_v53 = vpop.permute.xlu0 %388  ;;  %v1084_v56 = vsel %vm887_vm5, %v1081_v24, %v1083_v42  ;;  %v1180_v24 = vstv %s3838_s28  ;;  %v1128_v42 = vrot.slane %v1113_v15, 3  ;;  %v1127_v39 = vsel %vm887_vm5, %v1125_v25, %v1126_v26  ;;  %v4470_v15 = vld [vmem:[#allocation2 + $0x8] sm:$0xff]  ;;  %v4475_v25 = vld [vmem:[#allocation2] sm:$0xff]  ;;  %s3862_s28 = sld [smem:[#allocation8 + $0x35]] }
 0x14a   :  { %6575 = vst [vmem:[#allocation16_spill] sm:$0xff] %v4395_v50  ;;  %6576 = vst [vmem:[#allocation17_spill] sm:$0xff] %v4397_v53  ;;  %v1182_v31 = vmul.f32 %v1180_v24, %v4077_v57  ;;  %v1183_v43 = vmul.f32 %v1180_v24, %v4121_v22  ;;  %v1186_v4 = vmul.f32 %v1180_v24, %v4131_v30 }
 0x14b   :  { %1050 = vrot.lane.b32.xlu0 %v1042_v54, %s4031_s4  ;;  %1016 = vrot.lane.b32.xlu1 %v1009_v62, %s4030_s29  ;;  %v1121_v62 = vrot.slane %v1109_v40, 3  ;;  %v1181_v40 = vmul.f32 %v1180_v24, %v4070_v52  ;;  %v1129_v3 = vsel %vm887_vm5, %v1126_v26, %v1128_v42 }
 0x14c   :  { %v1194_v46 = vrot.slane %v1182_v31, 4  ;;  %v1196_v61 = vrot.slane %v1183_v43, 4 }
 0x14d   :  { %v4406_v8 = vpop.permute.xlu1 %390  ;;  %v4408_v9 = vpop.permute.xlu0 %424  ;;  %v1122_v14 = vsel %vm887_vm5, %v1120_v5, %v1121_v62  ;;  %v1193_v52 = vrot.slane %v1181_v40, 4  ;;  %v1220_v5 = vstv %s3839_s30  ;;  %s161_s30 = sld [smem:[#allocation8]] }
 0x14e   :  { %6577 = vst [vmem:[#allocation18_spill] sm:$0xff] %v4406_v8  ;;  %6578 = vst [vmem:[#allocation19_spill] sm:$0xff] %v4408_v9  ;;  %v1221_v26 = vmul.f32 %v4475_v25, %v1220_v5  ;;  %v1197_v40 = vsel %vm1160_vm6, %v1194_v46, %v1196_v61  ;;  %v1223_v42 = vmul.f32 %v1220_v5, %v4121_v22 }
 0x14f   :  { %1054 = vrot.lane.b32.xlu0 %v1047_v12, %s4031_s4  ;;  %1052 = vrot.lane.b32.xlu1 %v1044_v20, %s4031_s4  ;;  %v1123_v20 = vrot.slane %v1110_v63, 3  ;;  %v1185_v63 = vmul.f32 %v1180_v24, %v4082_v60 }
 0x151   :  { %v4417_v28 = vpop.permute.xlu1 %426  ;;  %v4419_v29 = vpop.permute.xlu0 %428  ;;  %v1124_v27 = vsel %vm887_vm5, %v1121_v62, %v1123_v20  ;;  %v1199_v20 = vrot.slane %v1185_v63, 4  ;;  %v4486_v63 = vld [vmem:[#allocation2 + $0x20] sm:$0xff] }
 0x152   :  { %6579 = vst [vmem:[#allocation20_spill] sm:$0xff] %v4417_v28  ;;  %6580 = vst [vmem:[#allocation21_spill] sm:$0xff] %v4419_v29 }
 0x153   :  { %1090 = vrot.lane.b32.xlu0 %v1082_v38, %s4032_s7  ;;  %1056 = vrot.lane.b32.xlu1 %v1049_v41, %s4031_s4 }
 0x155   :  { %v4428_v47 = vpop.permute.xlu1 %430  ;;  %v4430_v54 = vpop.permute.xlu0 %464 }
 0x156   :  { %6581 = vst [vmem:[#allocation22_spill] sm:$0xff] %v4428_v47  ;;  %6582 = vst [vmem:[#allocation23_spill] sm:$0xff] %v4430_v54 }
 0x157   :  { %1094 = vrot.lane.b32.xlu0 %v1087_v55, %s4032_s7  ;;  %1092 = vrot.lane.b32.xlu1 %v1084_v56, %s4032_s7  ;;  %v4457_v55 = vld [vmem:[#allocation2 + $0x18] sm:$0xff] }
 0x158   :  { %v1184_v57 = vmul.f32 %v4457_v55, %v1180_v24 }
 0x159   :  { %v4439_v12 = vpop.permute.xlu1 %466  ;;  %v4441_v13 = vpop.permute.xlu0 %468 }
 0x15a   :  { %6583 = vst [vmem:[#allocation24_spill] sm:$0xff] %v4439_v12  ;;  %6584 = vst [vmem:[#allocation25_spill] sm:$0xff] %v4441_v13  ;;  %v1198_v60 = vrot.slane %v1184_v57, 4  ;;  %v1224_v57 = vmul.f32 %v4457_v55, %v1220_v5 }
 0x15b   :  { %1130 = vrot.lane.b32.xlu0 %v1122_v14, %s4033_s9  ;;  %1096 = vrot.lane.b32.xlu1 %v1089_v51, %s4032_s7  ;;  %v1195_v14 = vsel %vm1160_vm6, %v1193_v52, %v1194_v46  ;;  %v1222_v51 = vmul.f32 %v4470_v15, %v1220_v5  ;;  %v1225_v52 = vmul.f32 %v4486_v63, %v1220_v5 }
 0x15c   :  { %v1200_v43 = vsel %vm1160_vm6, %v1198_v60, %v1199_v20  ;;  %v1226_v60 = vmul.f32 %v1220_v5, %v4131_v30 }
 0x15d   :  { %v4450_v38 = vpop.permute.xlu1 %470  ;;  %v4452_v41 = vpop.permute.xlu0 %504 }
 0x15e   :  { %6585 = vst [vmem:[#allocation26_spill] sm:$0xff] %v4450_v38  ;;  %6586 = vst [vmem:[#allocation27_spill] sm:$0xff] %v4452_v41  ;;  %v4969_v41 = vld [vmem:[#allocation2] sm:$0xff] }
 0x15f   :  { %1132 = vrot.lane.b32.xlu1 %v1124_v27, %s4033_s9  ;;  %1134 = vrot.lane.b32.xlu0 %v1127_v39, %s4033_s9  ;;  %v1201_v27 = vrot.slane %v1186_v4, 4  ;;  %v1234_v39 = vrot.slane %v1222_v51, 4  ;;  %v1236_v4 = vrot.slane %v1223_v42, 4  ;;  %v1260_v51 = vstv %s3840_s5  ;;  %s3863_s5 = sld [smem:[#allocation8 + $0x36]] }
 0x160   :  { %v1263_v42 = vmul.f32 %v1260_v51, %v4121_v22  ;;  %v1266_v22 = vmul.f32 %v1260_v51, %v4131_v30 }
 0x161   :  { %v4463_v56 = vpop.permute.xlu1 %506  ;;  %v4465_v62 = vpop.permute.xlu0 %508  ;;  %v1202_v61 = vsel %vm1160_vm6, %v1199_v20, %v1201_v27  ;;  %v1237_v5 = vsel %vm1160_vm6, %v1234_v39, %v1236_v4  ;;  %v1241_v27 = vrot.slane %v1226_v60, 4 }
 0x162   :  { %6587 = vst [vmem:[#allocation28_spill] sm:$0xff] %v4463_v56  ;;  %6588 = vst [vmem:[#allocation29_spill] sm:$0xff] %v4465_v62  ;;  %v1239_v62 = vrot.slane %v1225_v52, 4  ;;  %v1276_v4 = vrot.slane %v1263_v42, 4 }
 0x163   :  { %1136 = vrot.lane.b32.xlu1 %v1129_v3, %s4033_s9  ;;  %1203 = vrot.lane.b32.xlu0 %v1195_v14, %s4028_s25  ;;  %v1233_v3 = vrot.slane %v1221_v26, 4  ;;  %v1261_v26 = vmul.f32 %v4475_v25, %v1260_v51 }
 0x165   :  { %v4478_v31 = vpop.permute.xlu1 %510  ;;  %v4480_v24 = vpop.permute.xlu0 %544 }
 0x166   :  { %6589 = vst [vmem:[#allocation30_spill] sm:$0xff] %v4478_v31  ;;  %6590 = vst [vmem:[#allocation31_spill] sm:$0xff] %v4480_v24  ;;  %v1235_v24 = vsel %vm1160_vm6, %v1233_v3, %v1234_v39  ;;  %v1238_v31 = vrot.slane %v1224_v57, 4  ;;  %v1264_v3 = vmul.f32 %v4457_v55, %v1260_v51  ;;  %v1242_v39 = vsel %vm1160_vm6, %v1239_v62, %v1241_v27  ;;  %v4529_v27 = vld [vmem:[#allocation2 + $0x10] sm:$0x3f] }
 0x167   :  { %1205 = vrot.lane.b32.xlu1 %v1197_v40, %s4028_s25  ;;  %1207 = vrot.lane.b32.xlu0 %v1200_v43, %s4028_s25  ;;  %v1262_v40 = vmul.f32 %v4470_v15, %v1260_v51 }
 0x168   :  { %v1240_v57 = vsel %vm1160_vm6, %v1238_v31, %v1239_v62  ;;  %v1300_v31 = vstv %s3841_s6  ;;  %s3816_s6 = sld [smem:[#allocation8 + $0x7]] }
 0x169   :  { %v4491_v14 = vpop.permute.xlu1 %546  ;;  %v4493_v46 = vpop.permute.xlu0 %548  ;;  %v1274_v52 = vrot.slane %v1262_v40, 4  ;;  %v1278_v40 = vrot.slane %v1264_v3, 4  ;;  %v1303_v42 = vmul.f32 %v4529_v27, %v1300_v31 }
 0x16a   :  { %6591 = vst [vmem:[#allocation32_spill] sm:$0xff] %v4491_v14  ;;  %6592 = vst [vmem:[#allocation33_spill] sm:$0xff] %v4493_v46 }
 0x16b   :  { %1209 = vrot.lane.b32.xlu1 %v1202_v61, %s4028_s25  ;;  %1243 = vrot.lane.b32.xlu0 %v1235_v24, %s4029_s27  ;;  %v1265_v61 = vmul.f32 %v4486_v63, %v1260_v51  ;;  %v1273_v24 = vrot.slane %v1261_v26, 4  ;;  %v1301_v26 = vmul.f32 %v4475_v25, %v1300_v31  ;;  %v1277_v30 = vsel %vm1160_vm6, %v1274_v52, %v1276_v4 }
 0x16c   :  { %v1281_v51 = vrot.slane %v1266_v22, 4  ;;  %v1316_v22 = vrot.slane %v1303_v42, 4 }
 0x16d   :  { %v4502_v43 = vpop.permute.xlu1 %550  ;;  %v4504_v20 = vpop.permute.xlu0 %584  ;;  %v1275_v60 = vsel %vm1160_vm6, %v1273_v24, %v1274_v52  ;;  %v1279_v46 = vrot.slane %v1265_v61, 4  ;;  %v1304_v24 = vmul.f32 %v4457_v55, %v1300_v31 }
 0x16e   :  { %6593 = vst [vmem:[#allocation34_spill] sm:$0xff] %v4502_v43  ;;  %6594 = vst [vmem:[#allocation35_spill] sm:$0xff] %v4504_v20 }
 0x16f   :  { %1245 = vrot.lane.b32.xlu1 %v1237_v5, %s4029_s27  ;;  %1247 = vrot.lane.b32.xlu0 %v1240_v57, %s4029_s27  ;;  %v1302_v5 = vmul.f32 %v4470_v15, %v1300_v31  ;;  %v1280_v3 = vsel %vm1160_vm6, %v1278_v40, %v1279_v46  ;;  %v1282_v4 = vsel %vm1160_vm6, %v1279_v46, %v1281_v51 }
 0x171   :  { %v4513_v43 = vpop.permute.xlu1 %586  ;;  %v4515_v20 = vpop.permute.xlu0 %588  ;;  %v1314_v61 = vrot.slane %v1302_v5, 4  ;;  %v1340_v5 = vstv %s3842_s8  ;;  %s3823_s8 = sld [smem:[#allocation8 + $0xe]] }
 0x172   :  { %6595 = vst [vmem:[#allocation36_spill] sm:$0xff] %v4513_v43  ;;  %6596 = vst [vmem:[#allocation37_spill] sm:$0xff] %v4515_v20  ;;  %v1318_v43 = vrot.slane %v1304_v24, 4 }
 0x173   :  { %1249 = vrot.lane.b32.xlu1 %v1242_v39, %s4029_s27  ;;  %1283 = vrot.lane.b32.xlu0 %v1275_v60, %s4030_s29  ;;  %v1305_v39 = vmul.f32 %v4486_v63, %v1300_v31  ;;  %v1313_v60 = vrot.slane %v1301_v26, 4  ;;  %v1341_v26 = vmul.f32 %v4475_v25, %v1340_v5 }
 0x175   :  { %v4524_v57 = vpop.permute.xlu1 %590  ;;  %v4526_v62 = vpop.permute.xlu0 %657  ;;  %v1315_v20 = vsel %vm1160_vm6, %v1313_v60, %v1314_v61  ;;  %v1344_v60 = vmul.f32 %v4457_v55, %v1340_v5 }
 0x176   :  { %6597 = vst [vmem:[#allocation38_spill] sm:$0xff] %v4524_v57  ;;  %6598 = vst [vmem:[#allocation39_spill] sm:$0xff] %v4526_v62  ;;  %v4542_v57 = vld [vmem:[#allocation2 + $0x28] sm:$0x3f] }
 0x177   :  { %1285 = vrot.lane.b32.xlu1 %v1277_v30, %s4030_s29  ;;  %1287 = vrot.lane.b32.xlu0 %v1280_v3, %s4030_s29  ;;  %v1306_v40 = vmul.f32 %v4542_v57, %v1300_v31  ;;  %v1319_v30 = vrot.slane %v1305_v39, 4  ;;  %v1342_v3 = vmul.f32 %v4470_v15, %v1340_v5  ;;  %v1317_v31 = vsel %vm1160_vm6, %v1314_v61, %v1316_v22 }
 0x179   :  { %v4537_v62 = vpop.permute.xlu1 %659  ;;  %v4539_v52 = vpop.permute.xlu0 %661  ;;  %v1321_v42 = vrot.slane %v1306_v40, 4  ;;  %v1320_v24 = vsel %vm1160_vm6, %v1318_v43, %v1319_v30  ;;  %v1354_v39 = vrot.slane %v1342_v3, 4  ;;  %v1346_v40 = vmul.f32 %v4542_v57, %v1340_v5 }
 0x17a   :  { %6599 = vst [vmem:[#allocation40_spill] sm:$0xff] %v4537_v62  ;;  %6600 = vst [vmem:[#allocation41_spill] sm:$0xff] %v4539_v52  ;;  %v1343_v52 = vmul.f32 %v4529_v27, %v1340_v5  ;;  %v1380_v43 = vstv %s3843_s10  ;;  %v1358_v62 = vrot.slane %v1344_v60, 4  ;;  %s4926_s10 = sld [smem:[#allocation8 + $0x15]] }
 0x17b   :  { %1289 = vrot.lane.b32.xlu1 %v1282_v4, %s4030_s29  ;;  %1323 = vrot.lane.b32.xlu0 %v1315_v20, %s4031_s4  ;;  %v1345_v4 = vmul.f32 %v4486_v63, %v1340_v5  ;;  %v1353_v20 = vrot.slane %v1341_v26, 4  ;;  %v1322_v61 = vsel %vm1160_vm6, %v1319_v30, %v1321_v42  ;;  %v1381_v26 = vmul.f32 %v4475_v25, %v1380_v43 }
 0x17c   :  { %v1356_v22 = vrot.slane %v1343_v52, 4  ;;  %v1361_v5 = vrot.slane %v1346_v40, 4  ;;  %v1383_v42 = vmul.f32 %v4529_v27, %v1380_v43  ;;  %v1386_v40 = vmul.f32 %v4542_v57, %v1380_v43 }
 0x17d   :  { %v4550_v46 = vpop.permute.xlu1 %663  ;;  %v4552_v51 = vpop.permute.xlu0 %697  ;;  %v1355_v3 = vsel %vm1160_vm6, %v1353_v20, %v1354_v39  ;;  %v1359_v14 = vrot.slane %v1345_v4, 4  ;;  %v1384_v20 = vmul.f32 %v4457_v55, %v1380_v43 }
 0x17e   :  { %6601 = vst [vmem:[#allocation42_spill] sm:$0xff] %v4550_v46  ;;  %6602 = vst [vmem:[#allocation43_spill] sm:$0xff] %v4552_v51  ;;  %v1357_v52 = vsel %vm1160_vm6, %v1354_v39, %v1356_v22  ;;  %v1396_v22 = vrot.slane %v1383_v42, 4 }
 0x17f   :  { %1325 = vrot.lane.b32.xlu1 %v1317_v31, %s4031_s4  ;;  %1327 = vrot.lane.b32.xlu0 %v1320_v24, %s4031_s4  ;;  %v1382_v31 = vmul.f32 %v4470_v15, %v1380_v43  ;;  %v1360_v60 = vsel %vm1160_vm6, %v1358_v62, %v1359_v14  ;;  %v1362_v39 = vsel %vm1160_vm6, %v1359_v14, %v1361_v5  ;;  %v1453_v62 = vstv %s3845_s11  ;;  %s5616_s11 = sld [smem:[#allocation8 + $0x49]] }
 0x180   :  { %v1401_v5 = vrot.slane %v1386_v40, 4  ;;  %v1456_v42 = vmul.f32 %v4529_v27, %v1453_v62  ;;  %v1493_v40 = vstv %s3846_s12  ;;  %v4978_v12 = vstv %s4926_s10  ;;  %s5554_s10 = sld [smem:[#allocation8 + $0x38]] }
 0x181   :  { %v4561_v46 = vpop.permute.xlu1 %699  ;;  %v4563_v51 = vpop.permute.xlu0 %701  ;;  %v1394_v4 = vrot.slane %v1382_v31, 4  ;;  %s5632_s12 = sld [smem:[#allocation8 + $0x4a]] }
 0x182   :  { %6603 = vst [vmem:[#allocation44_spill] sm:$0xff] %v4561_v46  ;;  %6604 = vst [vmem:[#allocation45_spill] sm:$0xff] %v4563_v51  ;;  %v1398_v51 = vrot.slane %v1384_v20, 4 }
 0x183   :  { %1329 = vrot.lane.b32.xlu1 %v1322_v61, %s4031_s4  ;;  %1363 = vrot.lane.b32.xlu0 %v1355_v3, %s4032_s7  ;;  %v1385_v61 = vmul.f32 %v4486_v63, %v1380_v43  ;;  %v1393_v3 = vrot.slane %v1381_v26, 4  ;;  %v1454_v26 = vmul.f32 %v4475_v25, %v1453_v62  ;;  %v1397_v43 = vsel %vm1160_vm6, %v1394_v4, %v1396_v22 }
 0x184   :  { %v1469_v22 = vrot.slane %v1456_v42, 5  ;;  %v1496_v42 = vmul.f32 %v4529_v27, %v1493_v40 }
 0x185   :  { %v4572_v24 = vpop.permute.xlu1 %703  ;;  %v4574_v30 = vpop.permute.xlu0 %737  ;;  %v1395_v31 = vsel %vm1160_vm6, %v1393_v3, %v1394_v4  ;;  %v1399_v46 = vrot.slane %v1385_v61, 4  ;;  %v1457_v3 = vmul.f32 %v4457_v55, %v1453_v62 }
 0x186   :  { %6605 = vst [vmem:[#allocation46_spill] sm:$0xff] %v4572_v24  ;;  %6606 = vst [vmem:[#allocation47_spill] sm:$0xff] %v4574_v30 }
 0x187   :  { %1365 = vrot.lane.b32.xlu1 %v1357_v52, %s4032_s7  ;;  %1367 = vrot.lane.b32.xlu0 %v1360_v60, %s4032_s7  ;;  %v1455_v52 = vmul.f32 %v4470_v15, %v1453_v62  ;;  %v1400_v20 = vsel %vm1160_vm6, %v1398_v51, %v1399_v46  ;;  %v1402_v4 = vsel %vm1160_vm6, %v1399_v46, %v1401_v5 }
 0x188   :  { %v1459_v51 = vmul.f32 %v4542_v57, %v1453_v62 }
 0x189   :  { %v4583_v24 = vpop.permute.xlu1 %739  ;;  %v4585_v30 = vpop.permute.xlu0 %741  ;;  %v1467_v61 = vrot.slane %v1455_v52, 5 }
 0x18a   :  { %6607 = vst [vmem:[#allocation48_spill] sm:$0xff] %v4583_v24  ;;  %6608 = vst [vmem:[#allocation49_spill] sm:$0xff] %v4585_v30  ;;  %v1471_v30 = vrot.slane %v1457_v3, 5  ;;  %v1474_v5 = vrot.slane %v1459_v51, 5  ;;  %v1499_v51 = vmul.f32 %v4542_v57, %v1493_v40 }
 0x18b   :  { %1369 = vrot.lane.b32.xlu1 %v1362_v39, %s4032_s7  ;;  %1403 = vrot.lane.b32.xlu0 %v1395_v31, %s4033_s9  ;;  %v1458_v39 = vmul.f32 %v4486_v63, %v1453_v62  ;;  %v1466_v31 = vrot.slane %v1454_v26, 5  ;;  %v1494_v26 = vmul.f32 %v4475_v25, %v1493_v40  ;;  %v1470_v62 = vsel %vm1433_vm7, %v1467_v61, %v1469_v22 }
 0x18c   :  { %v1509_v22 = vrot.slane %v1496_v42, 5 }
 0x18d   :  { %v4594_v60 = vpop.permute.xlu1 %743  ;;  %v4596_v14 = vpop.permute.xlu0 %777  ;;  %v1468_v52 = vsel %vm1433_vm7, %v1466_v31, %v1467_v61  ;;  %v1472_v24 = vrot.slane %v1458_v39, 5  ;;  %v1497_v31 = vmul.f32 %v4457_v55, %v1493_v40 }
 0x18e   :  { %6609 = vst [vmem:[#allocation50_spill] sm:$0xff] %v4594_v60  ;;  %6610 = vst [vmem:[#allocation51_spill] sm:$0xff] %v4596_v14 }
 0x18f   :  { %1405 = vrot.lane.b32.xlu1 %v1397_v43, %s4033_s9  ;;  %1407 = vrot.lane.b32.xlu0 %v1400_v20, %s4033_s9  ;;  %v1495_v43 = vmul.f32 %v4470_v15, %v1493_v40  ;;  %v1473_v3 = vsel %vm1433_vm7, %v1471_v30, %v1472_v24  ;;  %v1475_v61 = vsel %vm1433_vm7, %v1472_v24, %v1474_v5  ;;  %v1533_v30 = vstv %s3847_s13  ;;  %s4946_s13 = sld [smem:[#allocation8 + $0x37]] }
 0x190   :  { %v1514_v5 = vrot.slane %v1499_v51, 5  ;;  %v1536_v42 = vmul.f32 %v4529_v27, %v1533_v30  ;;  %v1539_v51 = vmul.f32 %v4542_v57, %v1533_v30 }
 0x191   :  { %v4605_v60 = vpop.permute.xlu1 %779  ;;  %v4607_v14 = vpop.permute.xlu0 %781  ;;  %v1507_v39 = vrot.slane %v1495_v43, 5 }
 0x192   :  { %6611 = vst [vmem:[#allocation52_spill] sm:$0xff] %v4605_v60  ;;  %6612 = vst [vmem:[#allocation53_spill] sm:$0xff] %v4607_v14  ;;  %v1511_v14 = vrot.slane %v1497_v31, 5 }
 0x193   :  { %1409 = vrot.lane.b32.xlu1 %v1402_v4, %s4033_s9  ;;  %1476 = vrot.lane.b32.xlu0 %v1468_v52, %s4028_s25  ;;  %v1498_v4 = vmul.f32 %v4486_v63, %v1493_v40  ;;  %v1506_v52 = vrot.slane %v1494_v26, 5  ;;  %v1534_v26 = vmul.f32 %v4475_v25, %v1533_v30  ;;  %v1510_v40 = vsel %vm1433_vm7, %v1507_v39, %v1509_v22 }
 0x194   :  { %v1549_v22 = vrot.slane %v1536_v42, 5 }
 0x195   :  { %v4616_v20 = vpop.permute.xlu1 %783  ;;  %v4618_v46 = vpop.permute.xlu0 %817  ;;  %v1508_v43 = vsel %vm1433_vm7, %v1506_v52, %v1507_v39  ;;  %v1512_v60 = vrot.slane %v1498_v4, 5  ;;  %v1537_v52 = vmul.f32 %v4457_v55, %v1533_v30  ;;  %v2106_v9 = vstv %s4946_s13  ;;  %s5683_s13 = sld [smem:[#allocation8 + $0x4b]] }
 0x196   :  { %6613 = vst [vmem:[#allocation54_spill] sm:$0xff] %v4616_v20  ;;  %6614 = vst [vmem:[#allocation55_spill] sm:$0xff] %v4618_v46 }
 0x197   :  { %1478 = vrot.lane.b32.xlu1 %v1470_v62, %s4028_s25  ;;  %1480 = vrot.lane.b32.xlu0 %v1473_v3, %s4028_s25  ;;  %v1535_v62 = vmul.f32 %v4470_v15, %v1533_v30  ;;  %v1513_v31 = vsel %vm1433_vm7, %v1511_v14, %v1512_v60  ;;  %v1515_v39 = vsel %vm1433_vm7, %v1512_v60, %v1514_v5  ;;  %v1573_v14 = vstv %s3848_s14  ;;  %s4996_s14 = sld [smem:[#allocation8 + $0x3a]] }
 0x198   :  { %v1554_v5 = vrot.slane %v1539_v51, 5  ;;  %v1576_v42 = vmul.f32 %v4529_v27, %v1573_v14  ;;  %v1579_v51 = vmul.f32 %v4542_v57, %v1573_v14 }
 0x199   :  { %v4627_v20 = vpop.permute.xlu1 %819  ;;  %v4629_v46 = vpop.permute.xlu0 %821  ;;  %v1547_v4 = vrot.slane %v1535_v62, 5 }
 0x19a   :  { %6615 = vst [vmem:[#allocation56_spill] sm:$0xff] %v4627_v20  ;;  %6616 = vst [vmem:[#allocation57_spill] sm:$0xff] %v4629_v46  ;;  %v1551_v20 = vrot.slane %v1537_v52, 5 }
 0x19b   :  { %1482 = vrot.lane.b32.xlu1 %v1475_v61, %s4028_s25  ;;  %1516 = vrot.lane.b32.xlu0 %v1508_v43, %s4029_s27  ;;  %v1538_v61 = vmul.f32 %v4486_v63, %v1533_v30  ;;  %v1546_v43 = vrot.slane %v1534_v26, 5  ;;  %v1574_v26 = vmul.f32 %v4475_v25, %v1573_v14  ;;  %v1550_v30 = vsel %vm1433_vm7, %v1547_v4, %v1549_v22 }
 0x19c   :  { %v1589_v22 = vrot.slane %v1576_v42, 5 }
 0x19d   :  { %v4638_v3 = vpop.permute.xlu1 %823  ;;  %v4640_v24 = vpop.permute.xlu0 %857  ;;  %v1548_v62 = vsel %vm1433_vm7, %v1546_v43, %v1547_v4  ;;  %v1577_v43 = vmul.f32 %v4457_v55, %v1573_v14 }
 0x19e   :  { %6617 = vst [vmem:[#allocation58_spill] sm:$0xff] %v4638_v3  ;;  %6618 = vst [vmem:[#allocation59_spill] sm:$0xff] %v4640_v24  ;;  %v1552_v24 = vrot.slane %v1538_v61, 5 }
 0x19f   :  { %1518 = vrot.lane.b32.xlu1 %v1510_v40, %s4029_s27  ;;  %1520 = vrot.lane.b32.xlu0 %v1513_v31, %s4029_s27  ;;  %v1575_v40 = vmul.f32 %v4470_v15, %v1573_v14 }
 0x1a0   :  { %v1553_v52 = vsel %vm1433_vm7, %v1551_v20, %v1552_v24  ;;  %v1555_v4 = vsel %vm1433_vm7, %v1552_v24, %v1554_v5  ;;  %v1613_v20 = vstv %s3849_s15  ;;  %v1594_v5 = vrot.slane %v1579_v51, 5  ;;  %s5057_s15 = sld [smem:[#allocation8 + $0x3b]] }
 0x1a1   :  { %v4649_v3 = vpop.permute.xlu1 %859  ;;  %v4651_v46 = vpop.permute.xlu0 %861  ;;  %v1587_v61 = vrot.slane %v1575_v40, 5  ;;  %v1616_v42 = vmul.f32 %v4529_v27, %v1613_v20  ;;  %v1619_v51 = vmul.f32 %v4542_v57, %v1613_v20 }
 0x1a2   :  { %6619 = vst [vmem:[#allocation60_spill] sm:$0xff] %v4649_v3  ;;  %6620 = vst [vmem:[#allocation61_spill] sm:$0xff] %v4651_v46  ;;  %v1591_v46 = vrot.slane %v1577_v43, 5 }
 0x1a3   :  { %1522 = vrot.lane.b32.xlu1 %v1515_v39, %s4029_s27  ;;  %1556 = vrot.lane.b32.xlu0 %v1548_v62, %s4030_s29  ;;  %v1578_v39 = vmul.f32 %v4486_v63, %v1573_v14  ;;  %v1586_v62 = vrot.slane %v1574_v26, 5  ;;  %v1614_v26 = vmul.f32 %v4475_v25, %v1613_v20  ;;  %v1590_v14 = vsel %vm1433_vm7, %v1587_v61, %v1589_v22 }
 0x1a4   :  { %v1629_v22 = vrot.slane %v1616_v42, 5 }
 0x1a5   :  { %v4660_v31 = vpop.permute.xlu1 %863  ;;  %v4662_v60 = vpop.permute.xlu0 %930  ;;  %v1588_v40 = vsel %vm1433_vm7, %v1586_v62, %v1587_v61  ;;  %v1592_v3 = vrot.slane %v1578_v39, 5  ;;  %v1617_v62 = vmul.f32 %v4457_v55, %v1613_v20 }
 0x1a6   :  { %6621 = vst [vmem:[#allocation62_spill] sm:$0xff] %v4660_v31  ;;  %6622 = vst [vmem:[#allocation63_spill] sm:$0xff] %v4662_v60 }
 0x1a7   :  { %1558 = vrot.lane.b32.xlu1 %v1550_v30, %s4030_s29  ;;  %1560 = vrot.lane.b32.xlu0 %v1553_v52, %s4030_s29  ;;  %v1615_v30 = vmul.f32 %v4470_v15, %v1613_v20  ;;  %v1593_v43 = vsel %vm1433_vm7, %v1591_v46, %v1592_v3  ;;  %v1595_v61 = vsel %vm1433_vm7, %v1592_v3, %v1594_v5  ;;  %v1653_v46 = vstv %s3850_s16  ;;  %s5071_s16 = sld [smem:[#allocation8 + $0x1c]] }
 0x1a8   :  { %v1634_v5 = vrot.slane %v1619_v51, 5  ;;  %v1656_v42 = vmul.f32 %v4529_v27, %v1653_v46  ;;  %v1659_v51 = vmul.f32 %v4542_v57, %v1653_v46 }
 0x1a9   :  { %v4671_v31 = vpop.permute.xlu1 %932  ;;  %v4673_v60 = vpop.permute.xlu0 %934  ;;  %v1627_v39 = vrot.slane %v1615_v30, 5 }
 0x1aa   :  { %6623 = vst [vmem:[#allocation64_spill] sm:$0xff] %v4671_v31  ;;  %6624 = vst [vmem:[#allocation65_spill] sm:$0xff] %v4673_v60  ;;  %v1631_v60 = vrot.slane %v1617_v62, 5 }
 0x1ab   :  { %1562 = vrot.lane.b32.xlu1 %v1555_v4, %s4030_s29  ;;  %1596 = vrot.lane.b32.xlu0 %v1588_v40, %s4031_s4  ;;  %v1618_v4 = vmul.f32 %v4486_v63, %v1613_v20  ;;  %v1626_v40 = vrot.slane %v1614_v26, 5  ;;  %v1654_v26 = vmul.f32 %v4475_v25, %v1653_v46  ;;  %v1630_v20 = vsel %vm1433_vm7, %v1627_v39, %v1629_v22 }
 0x1ac   :  { %v1669_v22 = vrot.slane %v1656_v42, 5 }
 0x1ad   :  { %v4682_v52 = vpop.permute.xlu1 %936  ;;  %v4684_v24 = vpop.permute.xlu0 %970  ;;  %v1628_v30 = vsel %vm1433_vm7, %v1626_v40, %v1627_v39  ;;  %v1632_v31 = vrot.slane %v1618_v4, 5  ;;  %v1657_v40 = vmul.f32 %v4457_v55, %v1653_v46 }
 0x1ae   :  { %6625 = vst [vmem:[#allocation66_spill] sm:$0xff] %v4682_v52  ;;  %6626 = vst [vmem:[#allocation67_spill] sm:$0xff] %v4684_v24 }
 0x1af   :  { %1598 = vrot.lane.b32.xlu1 %v1590_v14, %s4031_s4  ;;  %1600 = vrot.lane.b32.xlu0 %v1593_v43, %s4031_s4  ;;  %v1655_v14 = vmul.f32 %v4470_v15, %v1653_v46  ;;  %v1633_v62 = vsel %vm1433_vm7, %v1631_v60, %v1632_v31  ;;  %v1635_v39 = vsel %vm1433_vm7, %v1632_v31, %v1634_v5  ;;  %v1726_v60 = vstv %s3852_s17  ;;  %s5126_s17 = sld [smem:[#allocation8 + $0x3c]] }
 0x1b0   :  { %v1674_v5 = vrot.slane %v1659_v51, 5  ;;  %v1729_v42 = vmul.f32 %v4529_v27, %v1726_v60  ;;  %v1766_v51 = vstv %s3853_s20  ;;  %s5173_s20 = sld [smem:[#allocation8 + $0x3d]] }
 0x1b1   :  { %v4693_v52 = vpop.permute.xlu1 %972  ;;  %v4695_v24 = vpop.permute.xlu0 %974  ;;  %v1667_v4 = vrot.slane %v1655_v14, 5 }
 0x1b2   :  { %6627 = vst [vmem:[#allocation68_spill] sm:$0xff] %v4693_v52  ;;  %6628 = vst [vmem:[#allocation69_spill] sm:$0xff] %v4695_v24  ;;  %v1671_v24 = vrot.slane %v1657_v40, 5 }
 0x1b3   :  { %1602 = vrot.lane.b32.xlu1 %v1595_v61, %s4031_s4  ;;  %1636 = vrot.lane.b32.xlu0 %v1628_v30, %s4032_s7  ;;  %v1658_v61 = vmul.f32 %v4486_v63, %v1653_v46  ;;  %v1666_v30 = vrot.slane %v1654_v26, 5  ;;  %v1727_v26 = vmul.f32 %v4475_v25, %v1726_v60  ;;  %v1670_v46 = vsel %vm1433_vm7, %v1667_v4, %v1669_v22 }
 0x1b4   :  { %v1742_v22 = vrot.slane %v1729_v42, 6  ;;  %v1769_v42 = vmul.f32 %v4529_v27, %v1766_v51 }
 0x1b5   :  { %v4704_v43 = vpop.permute.xlu1 %976  ;;  %v4706_v3 = vpop.permute.xlu0 %1010  ;;  %v1668_v14 = vsel %vm1433_vm7, %v1666_v30, %v1667_v4  ;;  %v1672_v52 = vrot.slane %v1658_v61, 5  ;;  %v1730_v30 = vmul.f32 %v4457_v55, %v1726_v60 }
 0x1b6   :  { %6629 = vst [vmem:[#allocation70_spill] sm:$0xff] %v4704_v43  ;;  %6630 = vst [vmem:[#allocation71_spill] sm:$0xff] %v4706_v3 }
 0x1b7   :  { %1638 = vrot.lane.b32.xlu1 %v1630_v20, %s4032_s7  ;;  %1640 = vrot.lane.b32.xlu0 %v1633_v62, %s4032_s7  ;;  %v1728_v20 = vmul.f32 %v4470_v15, %v1726_v60  ;;  %v1673_v40 = vsel %vm1433_vm7, %v1671_v24, %v1672_v52  ;;  %v1675_v4 = vsel %vm1433_vm7, %v1672_v52, %v1674_v5 }
 0x1b8   :  { %v1732_v24 = vmul.f32 %v4542_v57, %v1726_v60 }
 0x1b9   :  { %v4715_v43 = vpop.permute.xlu1 %1012  ;;  %v4717_v3 = vpop.permute.xlu0 %1014  ;;  %v1740_v61 = vrot.slane %v1728_v20, 6 }
 0x1ba   :  { %6631 = vst [vmem:[#allocation72_spill] sm:$0xff] %v4715_v43  ;;  %6632 = vst [vmem:[#allocation73_spill] sm:$0xff] %v4717_v3  ;;  %v1744_v43 = vrot.slane %v1730_v30, 6  ;;  %v1747_v5 = vrot.slane %v1732_v24, 6  ;;  %v1772_v24 = vmul.f32 %v4542_v57, %v1766_v51 }
 0x1bb   :  { %1642 = vrot.lane.b32.xlu1 %v1635_v39, %s4032_s7  ;;  %1676 = vrot.lane.b32.xlu0 %v1668_v14, %s4033_s9  ;;  %v1731_v39 = vmul.f32 %v4486_v63, %v1726_v60  ;;  %v1739_v14 = vrot.slane %v1727_v26, 6  ;;  %v1767_v26 = vmul.f32 %v4475_v25, %v1766_v51  ;;  %v1743_v60 = vsel %vm1706_vm8, %v1740_v61, %v1742_v22 }
 0x1bc   :  { %v1782_v22 = vrot.slane %v1769_v42, 6 }
 0x1bd   :  { %v4726_v62 = vpop.permute.xlu1 %1016  ;;  %v4728_v31 = vpop.permute.xlu0 %1050  ;;  %v1741_v20 = vsel %vm1706_vm8, %v1739_v14, %v1740_v61  ;;  %v1745_v3 = vrot.slane %v1731_v39, 6  ;;  %v1770_v14 = vmul.f32 %v4457_v55, %v1766_v51 }
 0x1be   :  { %6633 = vst [vmem:[#allocation74_spill] sm:$0xff] %v4726_v62  ;;  %6634 = vst [vmem:[#allocation75_spill] sm:$0xff] %v4728_v31 }
 0x1bf   :  { %1678 = vrot.lane.b32.xlu1 %v1670_v46, %s4033_s9  ;;  %1680 = vrot.lane.b32.xlu0 %v1673_v40, %s4033_s9  ;;  %v1768_v46 = vmul.f32 %v4470_v15, %v1766_v51  ;;  %v1746_v30 = vsel %vm1706_vm8, %v1744_v43, %v1745_v3  ;;  %v1748_v61 = vsel %vm1706_vm8, %v1745_v3, %v1747_v5  ;;  %v1806_v43 = vstv %s3854_s21  ;;  %s5213_s21 = sld [smem:[#allocation8 + $0x3e]] }
 0x1c0   :  { %v1787_v5 = vrot.slane %v1772_v24, 6  ;;  %v1809_v42 = vmul.f32 %v4529_v27, %v1806_v43  ;;  %v1812_v24 = vmul.f32 %v4542_v57, %v1806_v43 }
 0x1c1   :  { %v4737_v62 = vpop.permute.xlu1 %1052  ;;  %v4739_v31 = vpop.permute.xlu0 %1054  ;;  %v1780_v39 = vrot.slane %v1768_v46, 6 }
 0x1c2   :  { %6635 = vst [vmem:[#allocation76_spill] sm:$0xff] %v4737_v62  ;;  %6636 = vst [vmem:[#allocation77_spill] sm:$0xff] %v4739_v31 }
 0x1c3   :  { %1682 = vrot.lane.b32.xlu1 %v1675_v4, %s4033_s9  ;;  %1749 = vrot.lane.b32.xlu0 %v1741_v20, %s4028_s25  ;;  %v1771_v4 = vmul.f32 %v4486_v63, %v1766_v51  ;;  %v1779_v20 = vrot.slane %v1767_v26, 6  ;;  %v1807_v26 = vmul.f32 %v4475_v25, %v1806_v43  ;;  %v1783_v51 = vsel %vm1706_vm8, %v1780_v39, %v1782_v22 }
 0x1c4   :  { %v1822_v22 = vrot.slane %v1809_v42, 6 }
 0x1c5   :  { %v4748_v40 = vpop.permute.xlu1 %1056  ;;  %v4750_v52 = vpop.permute.xlu0 %1090  ;;  %v1781_v46 = vsel %vm1706_vm8, %v1779_v20, %v1780_v39  ;;  %v1785_v31 = vrot.slane %v1771_v4, 6  ;;  %v1810_v20 = vmul.f32 %v4457_v55, %v1806_v43 }
 0x1c6   :  { %6637 = vst [vmem:[#allocation78_spill] sm:$0xff] %v4748_v40  ;;  %6638 = vst [vmem:[#allocation79_spill] sm:$0xff] %v4750_v52  ;;  %v1784_v40 = vrot.slane %v1770_v14, 6 }
 0x1c7   :  { %1751 = vrot.lane.b32.xlu1 %v1743_v60, %s4028_s25  ;;  %1753 = vrot.lane.b32.xlu0 %v1746_v30, %s4028_s25  ;;  %v1808_v60 = vmul.f32 %v4470_v15, %v1806_v43  ;;  %v1788_v39 = vsel %vm1706_vm8, %v1785_v31, %v1787_v5  ;;  %v1827_v5 = vrot.slane %v1812_v24, 6 }
 0x1c8   :  { %v1786_v14 = vsel %vm1706_vm8, %v1784_v40, %v1785_v31  ;;  %v1846_v40 = vstv %s3855_s22  ;;  %s5225_s22 = sld [smem:[#allocation8 + $0x23]] }
 0x1c9   :  { %v4759_v62 = vpop.permute.xlu1 %1092  ;;  %v4761_v52 = vpop.permute.xlu0 %1094  ;;  %v1820_v4 = vrot.slane %v1808_v60, 6  ;;  %v1849_v42 = vmul.f32 %v4529_v27, %v1846_v40  ;;  %v1852_v24 = vmul.f32 %v4542_v57, %v1846_v40 }
 0x1ca   :  { %6639 = vst [vmem:[#allocation80_spill] sm:$0xff] %v4759_v62  ;;  %6640 = vst [vmem:[#allocation81_spill] sm:$0xff] %v4761_v52 }
 0x1cb   :  { %1755 = vrot.lane.b32.xlu1 %v1748_v61, %s4028_s25  ;;  %1789 = vrot.lane.b32.xlu0 %v1781_v46, %s4029_s27  ;;  %v1811_v61 = vmul.f32 %v4486_v63, %v1806_v43  ;;  %v1819_v46 = vrot.slane %v1807_v26, 6  ;;  %v1847_v26 = vmul.f32 %v4475_v25, %v1846_v40  ;;  %v1823_v43 = vsel %vm1706_vm8, %v1820_v4, %v1822_v22 }
 0x1cc   :  { %v1862_v22 = vrot.slane %v1849_v42, 6 }
 0x1cd   :  { %v4770_v30 = vpop.permute.xlu1 %1096  ;;  %v4772_v3 = vpop.permute.xlu0 %1130  ;;  %v1821_v60 = vsel %vm1706_vm8, %v1819_v46, %v1820_v4  ;;  %v1825_v52 = vrot.slane %v1811_v61, 6  ;;  %v1850_v46 = vmul.f32 %v4457_v55, %v1846_v40 }
 0x1ce   :  { %6641 = vst [vmem:[#allocation82_spill] sm:$0xff] %v4770_v30  ;;  %6642 = vst [vmem:[#allocation83_spill] sm:$0xff] %v4772_v3  ;;  %v1824_v30 = vrot.slane %v1810_v20, 6 }
 0x1cf   :  { %1791 = vrot.lane.b32.xlu1 %v1783_v51, %s4029_s27  ;;  %1793 = vrot.lane.b32.xlu0 %v1786_v14, %s4029_s27  ;;  %v1848_v51 = vmul.f32 %v4470_v15, %v1846_v40  ;;  %v1828_v4 = vsel %vm1706_vm8, %v1825_v52, %v1827_v5  ;;  %v1867_v5 = vrot.slane %v1852_v24, 6 }
 0x1d0   :  { %v1826_v20 = vsel %vm1706_vm8, %v1824_v30, %v1825_v52  ;;  %v1886_v30 = vstv %s3856_s1  ;;  %s5259_s1 = sld [smem:[#allocation8 + $0x40]] }
 0x1d1   :  { %v4781_v62 = vpop.permute.xlu1 %1132  ;;  %v4783_v3 = vpop.permute.xlu0 %1134  ;;  %v1860_v61 = vrot.slane %v1848_v51, 6  ;;  %v1889_v42 = vmul.f32 %v4529_v27, %v1886_v30  ;;  %v1892_v24 = vmul.f32 %v4542_v57, %v1886_v30 }
 0x1d2   :  { %6643 = vst [vmem:[#allocation84_spill] sm:$0xff] %v4781_v62  ;;  %6644 = vst [vmem:[#allocation85_spill] sm:$0xff] %v4783_v3 }
 0x1d3   :  { %1795 = vrot.lane.b32.xlu1 %v1788_v39, %s4029_s27  ;;  %1829 = vrot.lane.b32.xlu0 %v1821_v60, %s4030_s29  ;;  %v1851_v39 = vmul.f32 %v4486_v63, %v1846_v40  ;;  %v1859_v60 = vrot.slane %v1847_v26, 6  ;;  %v1887_v26 = vmul.f32 %v4475_v25, %v1886_v30  ;;  %v1863_v40 = vsel %vm1706_vm8, %v1860_v61, %v1862_v22 }
 0x1d4   :  { %v1902_v22 = vrot.slane %v1889_v42, 6 }
 0x1d5   :  { %v4792_v14 = vpop.permute.xlu1 %1136  ;;  %v4794_v31 = vpop.permute.xlu0 %1203  ;;  %v1861_v51 = vsel %vm1706_vm8, %v1859_v60, %v1860_v61  ;;  %v1865_v3 = vrot.slane %v1851_v39, 6  ;;  %v1890_v60 = vmul.f32 %v4457_v55, %v1886_v30 }
 0x1d6   :  { %6645 = vst [vmem:[#allocation86_spill] sm:$0xff] %v4792_v14  ;;  %6646 = vst [vmem:[#allocation87_spill] sm:$0xff] %v4794_v31  ;;  %v1864_v14 = vrot.slane %v1850_v46, 6 }
 0x1d7   :  { %1831 = vrot.lane.b32.xlu1 %v1823_v43, %s4030_s29  ;;  %1833 = vrot.lane.b32.xlu0 %v1826_v20, %s4030_s29  ;;  %v1888_v43 = vmul.f32 %v4470_v15, %v1886_v30  ;;  %v1868_v61 = vsel %vm1706_vm8, %v1865_v3, %v1867_v5 }
 0x1d8   :  { %v1866_v46 = vsel %vm1706_vm8, %v1864_v14, %v1865_v3  ;;  %v1926_v14 = vstv %s3857_s0  ;;  %s5291_s0 = sld [smem:[#allocation8 + $0x2a]] }
 0x1d9   :  { %v4803_v62 = vpop.permute.xlu1 %1205  ;;  %v4805_v31 = vpop.permute.xlu0 %1207  ;;  %v1900_v39 = vrot.slane %v1888_v43, 6  ;;  %v1928_v56 = vmul.f32 %v4470_v15, %v1926_v14  ;;  %v1929_v5 = vmul.f32 %v4529_v27, %v1926_v14  ;;  %v1930_v15 = vmul.f32 %v4457_v55, %v1926_v14 }
 0x1da   :  { %6647 = vst [vmem:[#allocation88_spill] sm:$0xff] %v4803_v62  ;;  %6648 = vst [vmem:[#allocation89_spill] sm:$0xff] %v4805_v31 }
 0x1db   :  { %1835 = vrot.lane.b32.xlu1 %v1828_v4, %s4030_s29  ;;  %1869 = vrot.lane.b32.xlu0 %v1861_v51, %s4031_s4  ;;  %v1891_v4 = vmul.f32 %v4486_v63, %v1886_v30  ;;  %v1899_v51 = vrot.slane %v1887_v26, 6  ;;  %v1927_v26 = vmul.f32 %v4475_v25, %v1926_v14  ;;  %v1903_v3 = vsel %vm1706_vm8, %v1900_v39, %v1902_v22 }
 0x1dc   :  { %v1907_v30 = vrot.slane %v1892_v24, 6  ;;  %v1932_v22 = vmul.f32 %v4542_v57, %v1926_v14  ;;  %v1944_v55 = vrot.slane %v1930_v15, 6 }
 0x1dd   :  { %v4814_v20 = vpop.permute.xlu1 %1209  ;;  %v4816_v52 = vpop.permute.xlu0 %1243  ;;  %v1901_v43 = vsel %vm1706_vm8, %v1899_v51, %v1900_v39  ;;  %v1905_v31 = vrot.slane %v1891_v4, 6  ;;  %v1931_v4 = vmul.f32 %v4486_v63, %v1926_v14  ;;  %v1939_v51 = vrot.slane %v1927_v26, 6 }
 0x1de   :  { %6649 = vst [vmem:[#allocation90_spill] sm:$0xff] %v4814_v20  ;;  %6650 = vst [vmem:[#allocation91_spill] sm:$0xff] %v4816_v52  ;;  %v1904_v20 = vrot.slane %v1890_v60, 6  ;;  %v1940_v60 = vrot.slane %v1928_v56, 6  ;;  %v1947_v14 = vrot.slane %v1932_v22, 6 }
 0x1df   :  { %1871 = vrot.lane.b32.xlu1 %v1863_v40, %s4031_s4  ;;  %1873 = vrot.lane.b32.xlu0 %v1866_v46, %s4031_s4  ;;  %v1908_v39 = vsel %vm1706_vm8, %v1905_v31, %v1907_v30  ;;  %v1945_v24 = vrot.slane %v1931_v4, 6  ;;  %v1976_v30 = vstv %s3859_s23  ;;  %s5309_s23 = sld [smem:[#allocation8 + $0x41]] }
 0x1e0   :  { %v1906_v42 = vsel %vm1706_vm8, %v1904_v20, %v1905_v31  ;;  %v1941_v56 = vsel %vm1706_vm8, %v1939_v51, %v1940_v60  ;;  %v1942_v20 = vrot.slane %v1929_v5, 6  ;;  %v4871_v51 = vld [vmem:[#allocation2 + $0x38] sm:$0xff] }
 0x1e1   :  { %v4825_v62 = vpop.permute.xlu1 %1245  ;;  %v4827_v52 = vpop.permute.xlu0 %1247  ;;  %v1946_v31 = vsel %vm1706_vm8, %v1944_v55, %v1945_v24 }
 0x1e2   :  { %6651 = vst [vmem:[#allocation92_spill] sm:$0xff] %v4825_v62  ;;  %6652 = vst [vmem:[#allocation93_spill] sm:$0xff] %v4827_v52 }
 0x1e3   :  { %1875 = vrot.lane.b32.xlu1 %v1868_v61, %s4031_s4  ;;  %1909 = vrot.lane.b32.xlu0 %v1901_v43, %s4032_s7 }
 0x1e5   :  { %v4836_v40 = vpop.permute.xlu1 %1249  ;;  %v4838_v46 = vpop.permute.xlu0 %1283 }
 0x1e6   :  { %6653 = vst [vmem:[#allocation94_spill] sm:$0xff] %v4836_v40  ;;  %6654 = vst [vmem:[#allocation95_spill] sm:$0xff] %v4838_v46 }
 0x1e7   :  { %1911 = vrot.lane.b32.xlu1 %v1903_v3, %s4032_s7  ;;  %1913 = vrot.lane.b32.xlu0 %v1906_v42, %s4032_s7  ;;  %v4860_v3 = vld [vmem:[#allocation2 + $0x30] sm:$0xff]  ;;  %v1943_v42 = vsel %vm1706_vm8, %v1940_v60, %v1942_v20  ;;  %v1948_v60 = vsel %vm1706_vm8, %v1945_v24, %v1947_v14  ;;  %v1978_v20 = vmul.f32 %v1976_v30, %v4871_v51 }
 0x1e8   :  { %v1977_v4 = vmul.f32 %v1976_v30, %v4860_v3 }
 0x1e9   :  { %v4847_v61 = vpop.permute.xlu1 %1285  ;;  %v4849_v43 = vpop.permute.xlu0 %1287 }
 0x1ea   :  { %6655 = vst [vmem:[#allocation96_spill] sm:$0xff] %v4847_v61  ;;  %6656 = vst [vmem:[#allocation97_spill] sm:$0xff] %v4849_v43  ;;  %v2054_v61 = vstv %s3862_s28  ;;  %s5430_s28 = sld [smem:[#allocation8 + $0x31]] }
 0x1eb   :  { %1915 = vrot.lane.b32.xlu1 %v1908_v39, %s4032_s7  ;;  %1949 = vrot.lane.b32.xlu0 %v1941_v56, %s4033_s9  ;;  %v4873_v39 = vld [vmem:[#allocation2 + $0x48] sm:$0xff] }
 0x1ec   :  { %v1979_v55 = vmul.f32 %v1976_v30, %v4873_v39 }
 0x1ed   :  { %v4856_v63 = vpop.permute.xlu1 %1289  ;;  %v4858_v26 = vpop.permute.xlu0 %1323 }
 0x1ee   :  { %6657 = vst [vmem:[#allocation98_spill] sm:$0xff] %v4856_v63  ;;  %6658 = vst [vmem:[#allocation99_spill] sm:$0xff] %v4858_v26  ;;  %v328_v26 = vstv %s3816_s6  ;;  %s5518_s6 = sld [smem:[#allocation8 + $0x47]] }
 0x1ef   :  { %1951 = vrot.lane.b32.xlu1 %v1943_v42, %s4033_s9  ;;  %1953 = vrot.lane.b32.xlu0 %v1946_v31, %s4033_s9  ;;  %v4884_v42 = vld [vmem:[#allocation2 + $0x50] sm:$0xff]  ;;  %v2002_v31 = vstv %s3860_s24  ;;  %v331_v40 = vmul.f32 %v4529_v27, %v328_v26  ;;  %v334_v13 = vmul.f32 %v4542_v57, %v328_v26  ;;  %s5353_s24 = sld [smem:[#allocation8 + $0x42]] }
 0x1f1   :  { %v4866_v5 = vpop.permute.xlu1 %1325  ;;  %v4868_v15 = vpop.permute.xlu0 %1327  ;;  %v350_v8 = vrot.slane %v334_v13, 1 }
 0x1f2   :  { %6659 = vst [vmem:[#allocation100_spill] sm:$0xff] %v4866_v5  ;;  %6660 = vst [vmem:[#allocation101_spill] sm:$0xff] %v4868_v15  ;;  %v601_v15 = vstv %s3823_s8  ;;  %s5547_s8 = sld [smem:[#allocation8 + $0x48]] }
 0x1f3   :  { %1955 = vrot.lane.b32.xlu1 %v1948_v60, %s4033_s9  ;;  %1985 = vrot.lane.b32.xlu0 %v1977_v4, %s4028_s25  ;;  %v1980_v4 = vmul.f32 %v1976_v30, %v4884_v42  ;;  %v2003_v60 = vmul.f32 %v2002_v31, %v4860_v3  ;;  %v602_v29 = vmul.f32 %v4969_v41, %v601_v15 }
 0x1f5   :  { %v4878_v22 = vpop.permute.xlu1 %1329  ;;  %v4880_v56 = vpop.permute.xlu0 %1363  ;;  %v615_v13 = vrot.slane %v602_v29, 2 }
 0x1f6   :  { %6661 = vst [vmem:[#allocation102_spill] sm:$0xff] %v4878_v22  ;;  %6662 = vst [vmem:[#allocation103_spill] sm:$0xff] %v4880_v56  ;;  %v2028_v22 = vstv %s3861_s26  ;;  %s5390_s26 = sld [smem:[#allocation8 + $0x43]] }
 0x1f7   :  { %1987 = vrot.lane.b32.xlu1 %v1978_v20, %s4028_s25  ;;  %1989 = vrot.lane.b32.xlu0 %v1979_v55, %s4028_s25  ;;  %v2004_v20 = vmul.f32 %v2002_v31, %v4871_v51  ;;  %v2005_v55 = vmul.f32 %v2002_v31, %v4873_v39 }
 0x1f9   :  { %v4888_v24 = vpop.permute.xlu1 %1365  ;;  %v4890_v14 = vpop.permute.xlu0 %1367 }
 0x1fa   :  { %6663 = vst [vmem:[#allocation104_spill] sm:$0xff] %v4888_v24  ;;  %6664 = vst [vmem:[#allocation105_spill] sm:$0xff] %v4890_v14  ;;  %v2029_v24 = vmul.f32 %v2028_v22, %v4860_v3  ;;  %v4943_v14 = vld [vmem:[#allocation2 + $0x18] sm:$0xff] }
 0x1fb   :  { %1991 = vrot.lane.b32.xlu1 %v1980_v4, %s4028_s25  ;;  %2011 = vrot.lane.b32.xlu0 %v2003_v60, %s4029_s27  ;;  %v2006_v60 = vmul.f32 %v2002_v31, %v4884_v42  ;;  %v162_v31 = vstv %s161_s30  ;;  %v332_v38 = vmul.f32 %v4943_v14, %v328_v26  ;;  %v605_v54 = vmul.f32 %v4943_v14, %v601_v15  ;;  %s5442_s30 = sld [smem:[#allocation8 + $0x44]] }
 0x1fd   :  { %v4896_v5 = vpop.permute.xlu1 %1369  ;;  %v4898_v56 = vpop.permute.xlu0 %1403  ;;  %v620_v50 = vrot.slane %v605_v54, 2 }
 0x1fe   :  { %6665 = vst [vmem:[#allocation106_spill] sm:$0xff] %v4896_v5  ;;  %6666 = vst [vmem:[#allocation107_spill] sm:$0xff] %v4898_v56 }
 0x1ff   :  { %2013 = vrot.lane.b32.xlu1 %v2004_v20, %s4029_s27  ;;  %2015 = vrot.lane.b32.xlu0 %v2005_v55, %s4029_s27  ;;  %v2030_v20 = vmul.f32 %v2028_v22, %v4871_v51  ;;  %v2031_v55 = vmul.f32 %v2028_v22, %v4873_v39 }
 0x201   :  { %v4904_v30 = vpop.permute.xlu1 %1405  ;;  %v4906_v4 = vpop.permute.xlu0 %1407 }
 0x202   :  { %6667 = vst [vmem:[#allocation108_spill] sm:$0xff] %v4904_v30  ;;  %6668 = vst [vmem:[#allocation109_spill] sm:$0xff] %v4906_v4  ;;  %v2032_v30 = vmul.f32 %v2028_v22, %v4884_v42  ;;  %v2056_v4 = vmul.f32 %v2054_v61, %v4871_v51 }
 0x203   :  { %2017 = vrot.lane.b32.xlu1 %v2006_v60, %s4029_s27  ;;  %2037 = vrot.lane.b32.xlu0 %v2029_v24, %s4030_s29 }
 0x205   :  { %v4912_v56 = vpop.permute.xlu1 %1409  ;;  %v4914_v5 = vpop.permute.xlu0 %1476 }
 0x206   :  { %6669 = vst [vmem:[#allocation110_spill] sm:$0xff] %v4912_v56  ;;  %6670 = vst [vmem:[#allocation111_spill] sm:$0xff] %v4914_v5  ;;  %v2055_v5 = vmul.f32 %v2054_v61, %v4860_v3  ;;  %v4934_v56 = vld [vmem:[#allocation2 + $0x8] sm:$0xff] }
 0x207   :  { %2039 = vrot.lane.b32.xlu1 %v2030_v20, %s4030_s29  ;;  %2041 = vrot.lane.b32.xlu0 %v2031_v55, %s4030_s29  ;;  %v163_v20 = vmul.f32 %v4475_v25, %v162_v31  ;;  %v159_v55 = vstv %s6570_s2  ;;  %v165_v25 = vmul.f32 %v4943_v14, %v162_v31  ;;  %s4950_s2 = sld [smem:[#allocation8 + $0x39]]  ;;  %v330_v62 = vmul.f32 %v4934_v56, %v328_v26 }
 0x209   :  { %v4920_v60 = vpop.permute.xlu1 %1478  ;;  %v4922_v24 = vpop.permute.xlu0 %1480  ;;  %v4967_v52 = vadd.f32 %v165_v25, %v159_v55  ;;  %v343_v25 = vrot.slane %v330_v62, 1 }
 0x20a   :  { %6671 = vst [vmem:[#allocation112_spill] sm:$0xff] %v4920_v60  ;;  %6672 = vst [vmem:[#allocation113_spill] sm:$0xff] %v4922_v24  ;;  %v164_v60 = vmul.f32 %v4934_v56, %v162_v31 }
 0x20b   :  { %2043 = vrot.lane.b32.xlu1 %v2032_v30, %s4030_s29  ;;  %2063 = vrot.lane.b32.xlu0 %v2055_v5, %s4031_s4  ;;  %v2057_v30 = vmul.f32 %v2054_v61, %v4873_v39  ;;  %v2080_v5 = vstv %s3863_s5  ;;  %s5485_s5 = sld [smem:[#allocation8 + $0x45]] }
 0x20c   :  { %v4958_v46 = vadd.f32 %v164_v60, %v159_v55 }
 0x20d   :  { %v4937_v24 = vpop.permute.xlu1 %1482  ;;  %v4939_v22 = vpop.permute.xlu0 %1516 }
 0x20e   :  { %6673 = vst [vmem:[#allocation114_spill] sm:$0xff] %v4937_v24  ;;  %6674 = vst [vmem:[#allocation115_spill] sm:$0xff] %v4939_v22  ;;  %v4952_v24 = vadd.f32 %v163_v20, %v159_v55  ;;  %v4954_v22 = vld [vmem:[#allocation2 + $0x20] sm:$0xff]  ;;  %v2081_v20 = vmul.f32 %v2080_v5, %v4860_v3 }
 0x20f   :  { %2065 = vrot.lane.b32.xlu1 %v2056_v4, %s4031_s4  ;;  %2067 = vrot.lane.b32.xlu0 %v2057_v30, %s4031_s4  ;;  %v166_v63 = vmul.f32 %v4954_v22, %v162_v31  ;;  %v2058_v30 = vmul.f32 %v2054_v61, %v4884_v42  ;;  %v329_v31 = vmul.f32 %v4969_v41, %v328_v26 }
 0x210   :  { %v333_v60 = vmul.f32 %v4954_v22, %v328_v26  ;;  %v4986_v47 = vmul.f32 %v4954_v22, %v601_v15  ;;  %v345_v26 = vrot.slane %v331_v40, 1 }
 0x211   :  { %v4961_v43 = vpop.permute.xlu1 %1518  ;;  %v4963_v4 = vpop.permute.xlu0 %1520  ;;  %v4982_v61 = vadd.f32 %v166_v63, %v159_v55  ;;  %v342_v63 = vrot.slane %v329_v31, 1  ;;  %v347_v55 = vrot.slane %v332_v38, 1  ;;  %v607_v38 = vmul.f32 %v4542_v57, %v601_v15  ;;  %v5006_v31 = vld [vmem:[#allocation2 + $0x40] sm:$0x3f] }
 0x212   :  { %6675 = vst [vmem:[#allocation116_spill] sm:$0xff] %v4961_v43  ;;  %6676 = vst [vmem:[#allocation117_spill] sm:$0xff] %v4963_v4  ;;  %v603_v43 = vmul.f32 %v4934_v56, %v601_v15  ;;  %v604_v4 = vmul.f32 %v4529_v27, %v601_v15  ;;  %v348_v62 = vrot.slane %v333_v60, 1  ;;  %v621_v37 = vrot.slane %v4986_v47, 2 }
 0x213   :  { %2069 = vrot.lane.b32.xlu1 %v2058_v30, %s4031_s4  ;;  %2089 = vrot.lane.b32.xlu0 %v2081_v20, %s4032_s7  ;;  %v2082_v30 = vmul.f32 %v2080_v5, %v4871_v51  ;;  %v2083_v20 = vmul.f32 %v2080_v5, %v4873_v39  ;;  %v5009_v60 = vsel %vm341_vm3, %v343_v25, %v345_v26 }
 0x214   :  { %v616_v53 = vrot.slane %v603_v43, 2  ;;  %v618_v40 = vrot.slane %v604_v4, 2  ;;  %6680 = vst [vmem:[#allocation121_spill] sm:$0xff] %v5009_v60  ;;  %v5018_v54 = vsel %vm341_vm3, %v347_v55, %v348_v62  ;;  %v5022_v47 = vmul.f32 %v4934_v56, %v4978_v12 }
 0x215   :  { %v4989_v27 = vpop.permute.xlu1 %1522  ;;  %v4991_v28 = vpop.permute.xlu0 %1556  ;;  %6683 = vst [vmem:[#allocation124_spill] sm:$0xff] %v5018_v54  ;;  %v5027_v29 = vsel %vm341_vm3, %v348_v62, %v350_v8  ;;  %v5038_v26 = vsel %vm614_vm4, %v620_v50, %v621_v37  ;;  %v875_v55 = vmul.f32 %v4969_v41, %v4978_v12  ;;  %v5043_v62 = vld [vmem:[#allocation2 + $0x58] sm:$0x3f] }
 0x216   :  { %6677 = vst [vmem:[#allocation118_spill] sm:$0xff] %v4989_v27  ;;  %6678 = vst [vmem:[#allocation119_spill] sm:$0xff] %v4991_v28  ;;  %v2164_v27 = vstv %s4950_s2  ;;  %v5002_v28 = vsel %vm341_vm3, %v342_v63, %v343_v25  ;;  %v5030_v25 = vsel %vm614_vm4, %v615_v13, %v616_v53  ;;  %v623_v63 = vrot.slane %v607_v38, 2  ;;  %s5708_s2 = sld [smem:[#allocation8 + $0x4c]] }
 0x217   :  { %2091 = vrot.lane.b32.xlu1 %v2082_v30, %s4032_s7  ;;  %2093 = vrot.lane.b32.xlu0 %v2083_v20, %s4032_s7  ;;  %6679 = vst [vmem:[#allocation120_spill] sm:$0xff] %v5002_v28  ;;  %v2084_v30 = vmul.f32 %v2080_v5, %v4884_v42  ;;  %v2107_v20 = vmul.f32 %v2106_v9, %v4860_v3  ;;  %6684 = vst [vmem:[#allocation125_spill] sm:$0xff] %v5027_v29  ;;  %v889_v38 = vrot.slane %v5022_v47, 3 }
 0x218   :  { %v2165_v57 = vmul.f32 %v2164_v27, %v4860_v3  ;;  %v2166_v15 = vmul.f32 %v2164_v27, %v4871_v51  ;;  %6685 = vst [vmem:[#allocation126_spill] sm:$0xff] %v5030_v25  ;;  %v5033_v5 = vsel %vm614_vm4, %v616_v53, %v618_v40  ;;  %6687 = vst [vmem:[#allocation128_spill] sm:$0xff] %v5038_v26  ;;  %v2204_v26 = vstv %s4996_s14  ;;  %s5763_s14 = sld [smem:[#allocation8 + $0x4e]] }
 0x219   :  { %v5011_v43 = vpop.permute.xlu1 %1558  ;;  %v5013_v4 = vpop.permute.xlu0 %1560  ;;  %6686 = vst [vmem:[#allocation127_spill] sm:$0xff] %v5033_v5  ;;  %v2167_v8 = vmul.f32 %v2164_v27, %v5006_v31  ;;  %v2108_v40 = vmul.f32 %v2106_v9, %v4871_v51  ;;  %v5053_v50 = vmul.f32 %v2164_v27, %v4884_v42  ;;  %v5059_v5 = vld [vmem:[#allocation2 + $0x10] sm:$0x3f]  ;;  %v5067_v25 = vmul.f32 %v4954_v22, %v4978_v12 }
 0x21a   :  { %6681 = vst [vmem:[#allocation122_spill] sm:$0xff] %v5011_v43  ;;  %6682 = vst [vmem:[#allocation123_spill] sm:$0xff] %v5013_v4  ;;  %v2177_v43 = vrot.slane %v2165_v57, 1  ;;  %v2178_v4 = vrot.slane %v2166_v15, 1  ;;  %v888_v47 = vrot.slane %v875_v55, 3  ;;  %v2110_v57 = vmul.f32 %v2106_v9, %v4884_v42 }
 0x21b   :  { %2095 = vrot.lane.b32.xlu1 %v2084_v30, %s4032_s7  ;;  %2115 = vrot.lane.b32.xlu0 %v2107_v20, %s4033_s9  ;;  %v2109_v30 = vmul.f32 %v2106_v9, %v4873_v39  ;;  %v2168_v20 = vmul.f32 %v2164_v27, %v4873_v39  ;;  %v2180_v15 = vrot.slane %v2167_v8, 1  ;;  %v2170_v29 = vmul.f32 %v2164_v27, %v5043_v62 }
 0x21c   :  { %v2183_v32 = vrot.slane %v5053_v50, 1  ;;  %v2205_v17 = vmul.f32 %v2204_v26, %v4860_v3  ;;  %v193_v55 = vadd.f32 %v4254_v1, %v4952_v24  ;;  %v5087_v9 = vsel %vm614_vm4, %v621_v37, %v623_v63 }
 0x21d   :  { %v5045_v13 = vpop.permute.xlu1 %1562  ;;  %v5047_v53 = vpop.permute.xlu0 %1596  ;;  %v2182_v28 = vrot.slane %v2168_v20, 1  ;;  %v5090_v27 = vsel %vm887_vm5, %v888_v47, %v889_v38  ;;  %v2179_v8 = vsel %vm341_vm3, %v2177_v43, %v2178_v4  ;;  %v894_v50 = vrot.slane %v5067_v25, 3 }
 0x21e   :  { %6688 = vst [vmem:[#allocation129_spill] sm:$0xff] %v5045_v13  ;;  %6689 = vst [vmem:[#allocation130_spill] sm:$0xff] %v5047_v53  ;;  %v877_v53 = vmul.f32 %v5059_v5, %v4978_v12  ;;  %v878_v13 = vmul.f32 %v4943_v14, %v4978_v12  ;;  %v194_v1 = vadd.f32 %v4263_v10, %v4958_v46  ;;  %v2185_v43 = vrot.slane %v2170_v29, 1 }
 0x21f   :  { %2117 = vrot.lane.b32.xlu1 %v2108_v40, %s4033_s9  ;;  %2119 = vrot.lane.b32.xlu0 %v2109_v30, %s4033_s9  ;;  %v5082_v40 = vmul.f32 %v2204_v26, %v4871_v51  ;;  %v195_v37 = vadd.f32 %v4265_v11, %v4967_v52  ;;  %v196_v24 = vadd.f32 %v4274_v21, %v4982_v61  ;;  %v2244_v21 = vstv %s5057_s15  ;;  %s5771_s15 = sld [smem:[#allocation8 + $0x4f]] }
 0x220   :  { %v891_v30 = vrot.slane %v877_v53, 3  ;;  %v893_v20 = vrot.slane %v878_v13, 3  ;;  %v2184_v13 = vsel %vm341_vm3, %v2182_v28, %v2183_v32  ;;  %v2217_v53 = vrot.slane %v2205_v17, 1 }
 0x221   :  { %v5075_v54 = vpop.permute.xlu1 %1598  ;;  %v5077_v60 = vpop.permute.xlu0 %1600  ;;  %v2218_v47 = vrot.slane %v5082_v40, 1  ;;  %v2207_v10 = vmul.f32 %v2204_v26, %v5006_v31  ;;  %v2208_v11 = vmul.f32 %v2204_v26, %v4873_v39  ;;  %v2209_v52 = vmul.f32 %v2204_v26, %v4884_v42 }
 0x222   :  { %6690 = vst [vmem:[#allocation131_spill] sm:$0xff] %v5075_v54  ;;  %6691 = vst [vmem:[#allocation132_spill] sm:$0xff] %v5077_v60  ;;  %v5094_v54 = vld [vmem:[#allocation2 + $0x28] sm:$0x3f]  ;;  %v219_v46 = vadd.f32 %v4276_v23, %v193_v55  ;;  %v5119_v61 = vsel %vm887_vm5, %v889_v38, %v891_v30  ;;  %v220_v17 = vadd.f32 %v4285_v34, %v194_v1  ;;  %v5132_v23 = vstv %s5071_s16  ;;  %s5779_s16 = sld [smem:[#allocation8 + $0x3f]] }
 0x223   :  { %v880_v60 = vmul.f32 %v5094_v54, %v4978_v12  ;;  %2121 = vrot.lane.b32.xlu1 %v2110_v57, %s4033_s9  ;;  %2187 = vrot.lane.b32.xlu0 %v2179_v8, %s4028_s25  ;;  %v2181_v12 = vsel %vm341_vm3, %v2178_v4, %v2180_v15  ;;  %v5122_v4 = vsel %vm887_vm5, %v893_v20, %v894_v50  ;;  %v2220_v30 = vrot.slane %v2207_v10, 1 }
 0x224   :  { %v221_v29 = vadd.f32 %v4287_v35, %v195_v37  ;;  %v222_v57 = vadd.f32 %v4296_v44, %v196_v24  ;;  %v2210_v40 = vmul.f32 %v2204_v26, %v5043_v62  ;;  %v2245_v55 = vmul.f32 %v2244_v21, %v4860_v3 }
 0x225   :  { %v5106_v25 = vpop.permute.xlu1 %1602  ;;  %v5108_v63 = vpop.permute.xlu0 %1636  ;;  %v896_v28 = vrot.slane %v880_v60, 3  ;;  %v2186_v60 = vsel %vm341_vm3, %v2183_v32, %v2185_v43  ;;  %v2246_v8 = vmul.f32 %v2244_v21, %v4871_v51  ;;  %v2219_v34 = vsel %vm341_vm3, %v2217_v53, %v2218_v47 }
 0x226   :  { %v2222_v35 = vrot.slane %v2208_v11, 1  ;;  %v2223_v20 = vrot.slane %v2209_v52, 1  ;;  %v245_v44 = vadd.f32 %v4298_v45, %v219_v46  ;;  %v246_v1 = vadd.f32 %v4307_v58, %v220_v17 }
 0x227   :  { %2189 = vrot.lane.b32.xlu1 %v2181_v12, %s4028_s25  ;;  %2191 = vrot.lane.b32.xlu0 %v2184_v13, %s4028_s25  ;;  %v5146_v37 = vsel %vm887_vm5, %v894_v50, %v896_v28  ;;  %v247_v32 = vadd.f32 %v4309_v59, %v221_v29  ;;  %v248_v26 = vadd.f32 %v4318_v6, %v222_v57  ;;  %v2225_v50 = vrot.slane %v2210_v40, 1 }
 0x228   :  { %v1148_v24 = vmul.f32 %v4969_v41, %v5132_v23  ;;  %v5156_v43 = vmul.f32 %v4934_v56, %v5132_v23  ;;  %v2257_v12 = vrot.slane %v2245_v55, 1  ;;  %v2258_v13 = vrot.slane %v2246_v8, 1 }
 0x229   :  { %v5134_v38 = vpop.permute.xlu1 %1638  ;;  %v5136_v15 = vpop.permute.xlu0 %1640  ;;  %v2247_v53 = vmul.f32 %v2244_v21, %v5006_v31  ;;  %v2221_v59 = vsel %vm341_vm3, %v2218_v47, %v2220_v30  ;;  %v2224_v6 = vsel %vm341_vm3, %v2222_v35, %v2223_v20  ;;  %v2248_v10 = vmul.f32 %v2244_v21, %v4873_v39 }
 0x22a   :  { %v2249_v11 = vmul.f32 %v2244_v21, %v4884_v42  ;;  %v271_v52 = vadd.f32 %v4320_v7, %v245_v44  ;;  %v272_v46 = vadd.f32 %v4329_v18, %v246_v1  ;;  %v273_v28 = vadd.f32 %v4331_v19, %v247_v32 }
 0x22b   :  { %2193 = vrot.lane.b32.xlu1 %v2186_v60, %s4028_s25  ;;  %2227 = vrot.lane.b32.xlu0 %v2219_v34, %s4029_s27  ;;  %v2284_v17 = vstv %s5126_s17  ;;  %v274_v47 = vadd.f32 %v4340_v33, %v248_v26  ;;  %v1161_v29 = vrot.slane %v1148_v24, 4  ;;  %v1162_v57 = vrot.slane %v5156_v43, 4  ;;  %s5874_s17 = sld [smem:[#allocation8 + $0x50]] }
 0x22c   :  { %v1150_v60 = vmul.f32 %v5059_v5, %v5132_v23  ;;  %v2226_v19 = vsel %vm341_vm3, %v2223_v20, %v2225_v50  ;;  %v2259_v40 = vsel %vm341_vm3, %v2257_v12, %v2258_v13  ;;  %v2260_v55 = vrot.slane %v2247_v53, 1 }
 0x22d   :  { %v5158_v45 = vpop.permute.xlu1 %1642  ;;  %v5160_v58 = vpop.permute.xlu0 %1676  ;;  %v2250_v8 = vmul.f32 %v2244_v21, %v5043_v62  ;;  %v2262_v34 = vrot.slane %v2248_v10, 1  ;;  %v2263_v30 = vrot.slane %v2249_v11, 1  ;;  %v2285_v33 = vmul.f32 %v2284_v17, %v4860_v3 }
 0x22e   :  { %v2286_v35 = vmul.f32 %v2284_v17, %v4871_v51  ;;  %v297_v44 = vadd.f32 %v4342_v36, %v271_v52  ;;  %v1151_v1 = vmul.f32 %v4943_v14, %v5132_v23  ;;  %v5193_v32 = vmul.f32 %v4954_v22, %v5132_v23 }
 0x22f   :  { %2229 = vrot.lane.b32.xlu1 %v2221_v59, %s4029_s27  ;;  %2231 = vrot.lane.b32.xlu0 %v2224_v6, %s4029_s27  ;;  %v298_v21 = vadd.f32 %v4351_v48, %v272_v46  ;;  %v299_v20 = vadd.f32 %v4353_v49, %v273_v28  ;;  %v5200_v26 = vsel %vm1160_vm6, %v1161_v29, %v1162_v57  ;;  %v1164_v24 = vrot.slane %v1150_v60, 4 }
 0x230   :  { %v2261_v50 = vsel %vm341_vm3, %v2258_v13, %v2260_v55  ;;  %v2265_v12 = vrot.slane %v2250_v8, 1  ;;  %v2287_v53 = vmul.f32 %v2284_v17, %v5006_v31  ;;  %v2288_v59 = vmul.f32 %v2284_v17, %v4873_v39 }
 0x231   :  { %v5179_v7 = vpop.permute.xlu1 %1678  ;;  %v5181_v18 = vpop.permute.xlu0 %1680  ;;  %v2264_v48 = vsel %vm341_vm3, %v2262_v34, %v2263_v30  ;;  %v2297_v6 = vrot.slane %v2285_v33, 1  ;;  %v2298_v49 = vrot.slane %v2286_v35, 1  ;;  %v5211_v10 = vmul.f32 %v2284_v17, %v4884_v42 }
 0x232   :  { %v1166_v11 = vrot.slane %v1151_v1, 4  ;;  %v1167_v52 = vrot.slane %v5193_v32, 4  ;;  %v1153_v13 = vmul.f32 %v5094_v54, %v5132_v23  ;;  %v2324_v46 = vstv %s5173_s20  ;;  %s5954_s20 = sld [smem:[#allocation8 + $0x51]] }
 0x233   :  { %2233 = vrot.lane.b32.xlu1 %v2226_v19, %s4029_s27  ;;  %2267 = vrot.lane.b32.xlu0 %v2259_v40, %s4030_s29  ;;  %v300_v28 = vadd.f32 %v4362_v0, %v274_v47  ;;  %v323_v29 = vadd.f32 %v4364_v2, %v297_v44  ;;  %v324_v60 = vadd.f32 %v4373_v16, %v298_v21  ;;  %v6693_v19 = vld [vmem:[#allocation13_spill] sm:$0xff]  ;;  %v2300_v34 = vrot.slane %v2287_v53, 1  ;;  %v6696_v44 = vld [vmem:[#allocation14_spill] sm:$0xff]  ;;  %v6699_v53 = vld [vmem:[#allocation124_spill] sm:$0xff] }
 0x234   :  { %v325_v40 = vadd.f32 %v6693_v19, %v299_v20  ;;  %v2266_v23 = vsel %vm341_vm3, %v2263_v30, %v2265_v12  ;;  %v2302_v33 = vrot.slane %v2288_v59, 1  ;;  %v2290_v35 = vmul.f32 %v2284_v17, %v5043_v62  ;;  %v6697_v17 = vld [vmem:[#allocation120_spill] sm:$0xff] }
 0x235   :  { %v5202_v36 = vpop.permute.xlu1 %1682  ;;  %v5204_v43 = vpop.permute.xlu0 %1749  ;;  %v2299_v0 = vsel %vm341_vm3, %v2297_v6, %v2298_v49  ;;  %v2303_v2 = vrot.slane %v5211_v10, 1  ;;  %v2325_v16 = vmul.f32 %v2324_v46, %v4860_v3  ;;  %v2326_v47 = vmul.f32 %v2324_v46, %v4871_v51 }
 0x236   :  { %6692 = vst [vmem:[#allocation133_spill] sm:$0xff] %v5204_v43  ;;  %v326_v1 = vadd.f32 %v6696_v44, %v300_v28  ;;  %v5239_v32 = vsel %vm1160_vm6, %v1162_v57, %v1164_v24  ;;  %v5242_v21 = vsel %vm1160_vm6, %v1166_v11, %v1167_v52  ;;  %v1169_v30 = vrot.slane %v1153_v13, 4 }
 0x237   :  { %2269 = vrot.lane.b32.xlu1 %v2261_v50, %s4030_s29  ;;  %2271 = vrot.lane.b32.xlu0 %v2264_v48, %s4030_s29  ;;  %v356_v20 = vadd.f32 %v6697_v17, %v323_v29  ;;  %v6698_v50 = vld [vmem:[#allocation121_spill] sm:$0xff]  ;;  %v358_v59 = vadd.f32 %v6699_v53, %v325_v40  ;;  %v2327_v48 = vmul.f32 %v2324_v46, %v5006_v31  ;;  %v2305_v10 = vrot.slane %v2290_v35, 1  ;;  %v6704_v17 = vld [vmem:[#allocation16_spill] sm:$0xff] }
 0x238   :  { %v357_v12 = vadd.f32 %v6698_v50, %v324_v60  ;;  %v2301_v24 = vsel %vm341_vm3, %v2298_v49, %v2300_v34  ;;  %v2328_v11 = vmul.f32 %v2324_v46, %v4873_v39  ;;  %v2329_v13 = vmul.f32 %v2324_v46, %v4884_v42  ;;  %v6702_v40 = vld [vmem:[#allocation125_spill] sm:$0xff] }
 0x239   :  { %v5227_v55 = vpop.permute.xlu1 %1751  ;;  %v5229_v8 = vpop.permute.xlu0 %1753  ;;  %v2304_v28 = vsel %vm341_vm3, %v2302_v33, %v2303_v2  ;;  %v2337_v29 = vrot.slane %v2325_v16, 1  ;;  %v2338_v60 = vrot.slane %v2326_v47, 1  ;;  %v2364_v19 = vstv %s5213_s21  ;;  %v6705_v49 = vld [vmem:[#allocation17_spill] sm:$0xff]  ;;  %s5981_s21 = sld [smem:[#allocation8 + $0x52]] }
 0x23a   :  { %6694 = vst [vmem:[#allocation13_spill] sm:$0xff] %v5227_v55  ;;  %6695 = vst [vmem:[#allocation134_spill] sm:$0xff] %v5229_v8  ;;  %v397_v50 = vadd.f32 %v6704_v17, %v357_v12  ;;  %v398_v34 = vadd.f32 %v6705_v49, %v358_v59  ;;  %v1420_v35 = vstv %s5225_s22  ;;  %v2340_v53 = vrot.slane %v2327_v48, 1  ;;  %v6709_v48 = vld [vmem:[#allocation19_spill] sm:$0xff]  ;;  %v6710_v17 = vld [vmem:[#allocation20_spill] sm:$0xff]  ;;  %s6020_s22 = sld [smem:[#allocation8 + $0x53]] }
 0x23b   :  { %2273 = vrot.lane.b32.xlu1 %v2266_v23, %s4030_s29  ;;  %2307 = vrot.lane.b32.xlu0 %v2299_v0, %s4031_s4  ;;  %v359_v23 = vadd.f32 %v6702_v40, %v326_v1  ;;  %v6703_v0 = vld [vmem:[#allocation15_spill] sm:$0xff]  ;;  %v2330_v33 = vmul.f32 %v2324_v46, %v5043_v62  ;;  %v2342_v55 = vrot.slane %v2328_v11, 1  ;;  %v2343_v1 = vrot.slane %v2329_v13, 1  ;;  %v6711_v11 = vld [vmem:[#allocation21_spill] sm:$0xff] }
 0x23c   :  { %v396_v44 = vadd.f32 %v6703_v0, %v356_v20  ;;  %v2365_v20 = vmul.f32 %v2364_v19, %v4860_v3  ;;  %v5275_v12 = vmul.f32 %v2364_v19, %v4871_v51  ;;  %v2306_v59 = vsel %vm341_vm3, %v2303_v2, %v2305_v10 }
 0x23d   :  { %v5250_v6 = vpop.permute.xlu1 %1755  ;;  %v5252_v57 = vpop.permute.xlu0 %1789  ;;  %v2339_v46 = vsel %vm341_vm3, %v2337_v29, %v2338_v60  ;;  %v437_v49 = vadd.f32 %v6710_v17, %v397_v50  ;;  %v438_v13 = vadd.f32 %v6711_v11, %v398_v34  ;;  %v2341_v2 = vsel %vm341_vm3, %v2338_v60, %v2340_v53 }
 0x23e   :  { %6700 = vst [vmem:[#allocation14_spill] sm:$0xff] %v5250_v6  ;;  %6701 = vst [vmem:[#allocation120_spill] sm:$0xff] %v5252_v57  ;;  %v436_v0 = vadd.f32 %v6709_v48, %v396_v44  ;;  %v2344_v44 = vsel %vm341_vm3, %v2342_v55, %v2343_v1  ;;  %v2345_v50 = vrot.slane %v2330_v33, 1  ;;  %v2377_v34 = vrot.slane %v2365_v20, 1  ;;  %v6714_v55 = vld [vmem:[#allocation22_spill] sm:$0xff]  ;;  %v6715_v20 = vld [vmem:[#allocation23_spill] sm:$0xff] }
 0x23f   :  { %2309 = vrot.lane.b32.xlu1 %v2301_v24, %s4031_s4  ;;  %2311 = vrot.lane.b32.xlu0 %v2304_v28, %s4031_s4  ;;  %v6708_v24 = vld [vmem:[#allocation18_spill] sm:$0xff]  ;;  %v5279_v28 = vsel %vm1160_vm6, %v1167_v52, %v1169_v30  ;;  %v1422_v52 = vmul.f32 %v4934_v56, %v1420_v35  ;;  %v1423_v30 = vmul.f32 %v5059_v5, %v1420_v35  ;;  %v2436_v17 = vstv %s5259_s1  ;;  %s6045_s1 = sld [smem:[#allocation8 + $0x55]] }
 0x240   :  { %v399_v40 = vadd.f32 %v6708_v24, %v359_v23  ;;  %v1421_v23 = vmul.f32 %v4969_v41, %v1420_v35  ;;  %v2378_v24 = vrot.slane %v5275_v12, 1  ;;  %v2369_v48 = vmul.f32 %v2364_v19, %v4884_v42 }
 0x241   :  { %v5269_v16 = vpop.permute.xlu1 %1791  ;;  %v5271_v47 = vpop.permute.xlu0 %1793  ;;  %v1424_v11 = vmul.f32 %v4943_v14, %v1420_v35  ;;  %v1425_v60 = vmul.f32 %v4954_v22, %v1420_v35  ;;  %v1426_v53 = vmul.f32 %v5094_v54, %v1420_v35  ;;  %v476_v12 = vadd.f32 %v6715_v20, %v436_v0 }
 0x242   :  { %6706 = vst [vmem:[#allocation121_spill] sm:$0xff] %v5269_v16  ;;  %6707 = vst [vmem:[#allocation124_spill] sm:$0xff] %v5271_v47  ;;  %v439_v33 = vadd.f32 %v6714_v55, %v399_v40  ;;  %v1434_v16 = vrot.slane %v1421_v23, 5  ;;  %v2346_v35 = vsel %vm341_vm3, %v2343_v1, %v2345_v50  ;;  %v2379_v47 = vsel %vm341_vm3, %v2377_v34, %v2378_v24  ;;  %v6719_v1 = vld [vmem:[#allocation25_spill] sm:$0xff] }
 0x243   :  { %2313 = vrot.lane.b32.xlu1 %v2306_v59, %s4031_s4  ;;  %2347 = vrot.lane.b32.xlu0 %v2339_v46, %s4032_s7  ;;  %v2367_v59 = vmul.f32 %v2364_v19, %v5006_v31  ;;  %v2368_v46 = vmul.f32 %v2364_v19, %v4873_v39  ;;  %v2383_v0 = vrot.slane %v2369_v48, 1  ;;  %v1437_v23 = vrot.slane %v1423_v30, 5 }
 0x244   :  { %v1439_v20 = vrot.slane %v1424_v11, 5  ;;  %v478_v50 = vadd.f32 %v6719_v1, %v438_v13  ;;  %v5327_v43 = vstv %s5291_s0  ;;  %v2439_v48 = vmul.f32 %v2436_v17, %v5006_v31  ;;  %s6133_s0 = sld [smem:[#allocation8 + $0x56]] }
 0x245   :  { %v5294_v10 = vpop.permute.xlu1 %1795  ;;  %v5296_v29 = vpop.permute.xlu0 %1829  ;;  %v2380_v40 = vrot.slane %v2367_v59, 1  ;;  %v2382_v55 = vrot.slane %v2368_v46, 1  ;;  %v2440_v11 = vmul.f32 %v2436_v17, %v4873_v39  ;;  %v2441_v13 = vmul.f32 %v2436_v17, %v4884_v42 }
 0x246   :  { %6712 = vst [vmem:[#allocation125_spill] sm:$0xff] %v5294_v10  ;;  %6713 = vst [vmem:[#allocation15_spill] sm:$0xff] %v5296_v29  ;;  %v2370_v29 = vmul.f32 %v2364_v19, %v5043_v62  ;;  %v1435_v10 = vrot.slane %v1422_v52, 5  ;;  %v1440_v19 = vrot.slane %v1425_v60, 5  ;;  %v1442_v52 = vrot.slane %v1426_v53, 5 }
 0x247   :  { %2349 = vrot.lane.b32.xlu1 %v2341_v2, %s4032_s7  ;;  %2351 = vrot.lane.b32.xlu0 %v2344_v44, %s4032_s7  ;;  %v2437_v2 = vmul.f32 %v2436_v17, %v4860_v3  ;;  %v2438_v44 = vmul.f32 %v2436_v17, %v4871_v51  ;;  %v2454_v1 = vrot.slane %v2440_v11, 2  ;;  %v6729_v11 = vld [vmem:[#allocation32_spill] sm:$0xff] }
 0x248   :  { %v2385_v8 = vrot.slane %v2370_v29, 1  ;;  %v5342_v29 = vsel %vm1433_vm7, %v1435_v10, %v1437_v23  ;;  %v5345_v60 = vsel %vm1433_vm7, %v1439_v20, %v1440_v19  ;;  %v5348_v53 = vsel %vm1433_vm7, %v1440_v19, %v1442_v52 }
 0x249   :  { %v5314_v57 = vpop.permute.xlu1 %1831  ;;  %v5316_v6 = vpop.permute.xlu0 %1833  ;;  %v2449_v30 = vrot.slane %v2437_v2, 2  ;;  %v2450_v46 = vrot.slane %v2438_v44, 2  ;;  %v6723_v2 = vld [vmem:[#allocation27_spill] sm:$0xff]  ;;  %v2452_v52 = vrot.slane %v2439_v48, 2 }
 0x24a   :  { %6716 = vst [vmem:[#allocation16_spill] sm:$0xff] %v5314_v57  ;;  %6717 = vst [vmem:[#allocation17_spill] sm:$0xff] %v5316_v6  ;;  %v6718_v57 = vld [vmem:[#allocation24_spill] sm:$0xff]  ;;  %v516_v44 = vadd.f32 %v6723_v2, %v476_v12  ;;  %v2386_v20 = vsel %vm341_vm3, %v2383_v0, %v2385_v8  ;;  %v2442_v12 = vmul.f32 %v2436_v17, %v5043_v62  ;;  %v6728_v8 = vld [vmem:[#allocation31_spill] sm:$0xff] }
 0x24b   :  { %2353 = vrot.lane.b32.xlu1 %v2346_v35, %s4032_s7  ;;  %2387 = vrot.lane.b32.xlu0 %v2379_v47, %s4033_s9  ;;  %v477_v6 = vadd.f32 %v6718_v57, %v437_v49  ;;  %v5336_v47 = vsel %vm1433_vm7, %v1434_v16, %v1435_v10  ;;  %v2381_v57 = vsel %vm341_vm3, %v2378_v24, %v2380_v40  ;;  %v2476_v16 = vstv %s5309_s23  ;;  %v6722_v24 = vld [vmem:[#allocation26_spill] sm:$0xff]  ;;  %s6168_s23 = sld [smem:[#allocation8 + $0x57]] }
 0x24c   :  { %v2384_v49 = vsel %vm341_vm3, %v2382_v55, %v2383_v0  ;;  %v479_v35 = vadd.f32 %v6722_v24, %v439_v33  ;;  %v1694_v10 = vmul.f32 %v4969_v41, %v5327_v43  ;;  %v5361_v40 = vmul.f32 %v4934_v56, %v5327_v43  ;;  %v6726_v24 = vld [vmem:[#allocation29_spill] sm:$0xff] }
 0x24d   :  { %v5329_v34 = vpop.permute.xlu1 %1835  ;;  %v5331_v59 = vpop.permute.xlu0 %1869  ;;  %v2451_v19 = vsel %vm614_vm4, %v2449_v30, %v2450_v46  ;;  %v2455_v33 = vrot.slane %v2441_v13, 2  ;;  %v2478_v41 = vmul.f32 %v2476_v16, %v4871_v51  ;;  %v518_v2 = vadd.f32 %v6726_v24, %v478_v50  ;;  %v6733_v24 = vld [vmem:[#allocation35_spill] sm:$0xff] }
 0x24e   :  { %6720 = vst [vmem:[#allocation18_spill] sm:$0xff] %v5329_v34  ;;  %6721 = vst [vmem:[#allocation19_spill] sm:$0xff] %v5331_v59  ;;  %v556_v0 = vadd.f32 %v6728_v8, %v516_v44  ;;  %v1707_v30 = vrot.slane %v1694_v10, 6  ;;  %v1708_v48 = vrot.slane %v5361_v40, 6  ;;  %v2479_v17 = vmul.f32 %v2476_v16, %v5006_v31 }
 0x24f   :  { %2389 = vrot.lane.b32.xlu1 %v2381_v57, %s4033_s9  ;;  %2391 = vrot.lane.b32.xlu0 %v2384_v49, %s4033_s9  ;;  %v2477_v57 = vmul.f32 %v2476_v16, %v4860_v3  ;;  %v6725_v49 = vld [vmem:[#allocation28_spill] sm:$0xff]  ;;  %v2453_v50 = vsel %vm614_vm4, %v2450_v46, %v2452_v52  ;;  %v2456_v44 = vsel %vm614_vm4, %v2454_v1, %v2455_v33  ;;  %v2457_v10 = vrot.slane %v2442_v12, 2 }
 0x250   :  { %v517_v56 = vadd.f32 %v6725_v49, %v477_v6  ;;  %v5398_v46 = vmul.f32 %v4943_v14, %v5327_v43  ;;  %v2516_v52 = vstv %s5353_s24  ;;  %v596_v8 = vadd.f32 %v6733_v24, %v556_v0  ;;  %v6734_v1 = vld [vmem:[#allocation36_spill] sm:$0xff]  ;;  %s6192_s24 = sld [smem:[#allocation8 + $0x46]] }
 0x251   :  { %v5363_v55 = vpop.permute.xlu1 %1871  ;;  %v5365_v23 = vpop.permute.xlu0 %1873  ;;  %v2489_v40 = vrot.slane %v2477_v57, 2  ;;  %v5406_v57 = vsel %vm1706_vm8, %v1707_v30, %v1708_v48  ;;  %v2518_v30 = vmul.f32 %v2516_v52, %v4871_v51 }
 0x252   :  { %6724 = vst [vmem:[#allocation20_spill] sm:$0xff] %v5363_v55  ;;  %v6727_v55 = vld [vmem:[#allocation30_spill] sm:$0xff]  ;;  %v557_v13 = vadd.f32 %v6729_v11, %v517_v56  ;;  %v1696_v56 = vmul.f32 %v5059_v5, %v5327_v43 }
 0x253   :  { %v519_v59 = vadd.f32 %v6727_v55, %v479_v35  ;;  %2393 = vrot.lane.b32.xlu1 %v2386_v20, %s4033_s9  ;;  %2459 = vrot.lane.b32.xlu0 %v2451_v19, %s4028_s25  ;;  %v2480_v35 = vmul.f32 %v2476_v16, %v4873_v39  ;;  %v5388_v55 = vmul.f32 %v2476_v16, %v4884_v42  ;;  %v2490_v20 = vrot.slane %v2478_v41, 2  ;;  %v6732_v19 = vld [vmem:[#allocation33_spill] sm:$0xff] }
 0x254   :  { %v558_v49 = vadd.f32 %v6732_v19, %v518_v2  ;;  %v597_v12 = vadd.f32 %v6734_v1, %v557_v13  ;;  %v2492_v41 = vrot.slane %v2479_v17, 2  ;;  %v6735_v2 = vld [vmem:[#allocation34_spill] sm:$0xff]  ;;  %v2517_v13 = vmul.f32 %v2516_v52, %v4860_v3  ;;  %v6737_v17 = vld [vmem:[#allocation37_spill] sm:$0xff] }
 0x255   :  { %v5381_v34 = vpop.permute.xlu1 %1875  ;;  %v5383_v6 = vpop.permute.xlu0 %1909  ;;  %v559_v11 = vadd.f32 %v6735_v2, %v519_v59  ;;  %v2494_v14 = vrot.slane %v2480_v35, 2  ;;  %v2491_v0 = vsel %vm614_vm4, %v2489_v40, %v2490_v20  ;;  %v1710_v59 = vrot.slane %v1696_v56, 6  ;;  %v6740_v40 = vld [vmem:[#allocation38_spill] sm:$0xff] }
 0x256   :  { %6730 = vst [vmem:[#allocation21_spill] sm:$0xff] %v5381_v34  ;;  %6731 = vst [vmem:[#allocation22_spill] sm:$0xff] %v5383_v6  ;;  %v2458_v6 = vsel %vm614_vm4, %v2455_v33, %v2457_v10  ;;  %v598_v24 = vadd.f32 %v6737_v17, %v558_v49  ;;  %v5422_v1 = vmul.f32 %v4954_v22, %v5327_v43  ;;  %v1712_v35 = vrot.slane %v5398_v46, 6 }
 0x257   :  { %2461 = vrot.lane.b32.xlu1 %v2453_v50, %s4028_s25  ;;  %2463 = vrot.lane.b32.xlu0 %v2456_v44, %s4028_s25  ;;  %v2495_v50 = vrot.slane %v5388_v55, 2  ;;  %v2482_v44 = vmul.f32 %v2476_v16, %v5043_v62  ;;  %v6738_v16 = vld [vmem:[#allocation126_spill] sm:$0xff]  ;;  %v6739_v55 = vld [vmem:[#allocation127_spill] sm:$0xff]  ;;  %v599_v2 = vadd.f32 %v6740_v40, %v559_v11  ;;  %v2493_v49 = vsel %vm614_vm4, %v2490_v20, %v2492_v41  ;;  %v6745_v40 = vld [vmem:[#allocation40_spill] sm:$0xff] }
 0x258   :  { %v629_v33 = vadd.f32 %v6738_v16, %v596_v8  ;;  %v630_v10 = vadd.f32 %v6739_v55, %v597_v12  ;;  %v2530_v8 = vrot.slane %v2518_v30, 2  ;;  %v2520_v12 = vmul.f32 %v2516_v52, %v4873_v39  ;;  %v6743_v16 = vld [vmem:[#allocation128_spill] sm:$0xff] }
 0x259   :  { %v5409_v5 = vpop.permute.xlu1 %1911  ;;  %v5411_v19 = vpop.permute.xlu0 %1913  ;;  %v2496_v46 = vsel %vm614_vm4, %v2494_v14, %v2495_v50  ;;  %v2497_v17 = vrot.slane %v2482_v44, 2  ;;  %v2521_v11 = vmul.f32 %v2516_v52, %v4884_v42  ;;  %v631_v20 = vadd.f32 %v6743_v16, %v598_v24  ;;  %v6746_v16 = vld [vmem:[#allocation41_spill] sm:$0xff] }
 0x25a   :  { %6736 = vst [vmem:[#allocation23_spill] sm:$0xff] %v5409_v5  ;;  %v2529_v5 = vrot.slane %v2517_v13, 2  ;;  %v5446_v41 = vsel %vm1706_vm8, %v1708_v48, %v1710_v59  ;;  %v1713_v55 = vrot.slane %v5422_v1, 6  ;;  %v1699_v14 = vmul.f32 %v5094_v54, %v5327_v43  ;;  %v6744_v13 = vld [vmem:[#allocation39_spill] sm:$0xff] }
 0x25b   :  { %2465 = vrot.lane.b32.xlu1 %v2458_v6, %s4028_s25  ;;  %2499 = vrot.lane.b32.xlu0 %v2491_v0, %s4029_s27  ;;  %v2519_v6 = vmul.f32 %v2516_v52, %v5006_v31  ;;  %v2556_v0 = vstv %s5390_s26  ;;  %v632_v44 = vadd.f32 %v5087_v9, %v599_v2  ;;  %v669_v30 = vadd.f32 %v6744_v13, %v629_v33  ;;  %s6271_s26 = sld [smem:[#allocation8 + $0x58]] }
 0x25c   :  { %v2522_v24 = vmul.f32 %v2516_v52, %v5043_v62  ;;  %v671_v48 = vadd.f32 %v6746_v16, %v631_v20  ;;  %v2498_v54 = vsel %vm614_vm4, %v2495_v50, %v2497_v17  ;;  %v2531_v9 = vsel %vm614_vm4, %v2529_v5, %v2530_v8  ;;  %v6749_v52 = vld [vmem:[#allocation42_spill] sm:$0xff]  ;;  %v6750_v20 = vld [vmem:[#allocation43_spill] sm:$0xff]  ;;  %v6752_v50 = vld [vmem:[#allocation45_spill] sm:$0xff] }
 0x25d   :  { %v5433_v56 = vpop.permute.xlu1 %1915  ;;  %v5435_v22 = vpop.permute.xlu0 %1949  ;;  %v2532_v43 = vrot.slane %v2519_v6, 2  ;;  %v2534_v2 = vrot.slane %v2520_v12, 2  ;;  %v2535_v33 = vrot.slane %v2521_v11, 2  ;;  %v709_v13 = vadd.f32 %v6750_v20, %v669_v30  ;;  %v6756_v20 = vld [vmem:[#allocation47_spill] sm:$0xff] }
 0x25e   :  { %6741 = vst [vmem:[#allocation24_spill] sm:$0xff] %v5433_v56  ;;  %6742 = vst [vmem:[#allocation25_spill] sm:$0xff] %v5435_v22  ;;  %v670_v22 = vadd.f32 %v6745_v40, %v630_v10  ;;  %v5466_v10 = vmul.f32 %v2556_v0, %v4871_v51  ;;  %v5471_v40 = vsel %vm1706_vm8, %v1712_v35, %v1713_v55  ;;  %v1715_v16 = vrot.slane %v1699_v14, 6 }
 0x25f   :  { %2501 = vrot.lane.b32.xlu1 %v2493_v49, %s4029_s27  ;;  %2503 = vrot.lane.b32.xlu0 %v2496_v46, %s4029_s27  ;;  %v2557_v49 = vmul.f32 %v2556_v0, %v4860_v3  ;;  %v672_v46 = vadd.f32 %v6749_v52, %v632_v44  ;;  %v6751_v3 = vld [vmem:[#allocation44_spill] sm:$0xff]  ;;  %v711_v17 = vadd.f32 %v6752_v50, %v671_v48  ;;  %v1966_v6 = vstv %s5430_s28  ;;  %v5500_v50 = vld [vmem:[#allocation2 + $0x30] sm:$0xff]  ;;  %s6317_s28 = sld [smem:[#allocation8 + $0x59]] }
 0x260   :  { %v710_v5 = vadd.f32 %v6751_v3, %v670_v22  ;;  %v2537_v51 = vrot.slane %v2522_v24, 2  ;;  %v2533_v44 = vsel %vm614_vm4, %v2530_v8, %v2532_v43  ;;  %v2559_v14 = vmul.f32 %v2556_v0, %v5006_v31 }
 0x261   :  { %v5458_v59 = vpop.permute.xlu1 %1951  ;;  %v5460_v1 = vpop.permute.xlu0 %1953  ;;  %v2569_v35 = vrot.slane %v2557_v49, 2  ;;  %v2560_v30 = vmul.f32 %v2556_v0, %v4873_v39  ;;  %v2570_v22 = vrot.slane %v5466_v10, 2  ;;  %v2561_v48 = vmul.f32 %v2556_v0, %v4884_v42  ;;  %v6757_v39 = vld [vmem:[#allocation48_spill] sm:$0xff]  ;;  %v6758_v49 = vld [vmem:[#allocation49_spill] sm:$0xff] }
 0x262   :  { %6747 = vst [vmem:[#allocation26_spill] sm:$0xff] %v5458_v59  ;;  %6748 = vst [vmem:[#allocation27_spill] sm:$0xff] %v5460_v1  ;;  %v2596_v24 = vstv %s5442_s30  ;;  %v749_v3 = vadd.f32 %v6756_v20, %v709_v13  ;;  %v5494_v8 = vsel %vm1706_vm8, %v1713_v55, %v1715_v16  ;;  %v750_v43 = vadd.f32 %v6757_v39, %v710_v5  ;;  %v6763_v39 = vld [vmem:[#allocation50_spill] sm:$0xff]  ;;  %s6361_s30 = sld [smem:[#allocation8 + $0x5a]] }
 0x263   :  { %2505 = vrot.lane.b32.xlu1 %v2498_v54, %s4029_s27  ;;  %2539 = vrot.lane.b32.xlu0 %v2531_v9, %s4030_s29  ;;  %v2536_v54 = vsel %vm614_vm4, %v2534_v2, %v2535_v33  ;;  %v6755_v9 = vld [vmem:[#allocation46_spill] sm:$0xff]  ;;  %v751_v2 = vadd.f32 %v6758_v49, %v711_v17  ;;  %v5503_v42 = vmul.f32 %v5500_v50, %v1966_v6  ;;  %v2575_v20 = vrot.slane %v2561_v48, 2 }
 0x264   :  { %v712_v52 = vadd.f32 %v6755_v9, %v672_v46  ;;  %v2562_v10 = vmul.f32 %v2556_v0, %v5043_v62  ;;  %v5506_v46 = vld [vmem:[#allocation2 + $0x38] sm:$0xff]  ;;  %v2538_v5 = vsel %vm614_vm4, %v2535_v33, %v2537_v51  ;;  %v2597_v17 = vmul.f32 %v5500_v50, %v2596_v24  ;;  %v6765_v51 = vld [vmem:[#allocation51_spill] sm:$0xff] }
 0x265   :  { %v5478_v12 = vpop.permute.xlu1 %1955  ;;  %v5480_v11 = vpop.permute.xlu0 %1985  ;;  %6759 = vst [vmem:[#allocation30_spill] sm:$0xff] %v5503_v42  ;;  %v5509_v55 = vmul.f32 %v5506_v46, %v1966_v6  ;;  %v2572_v0 = vrot.slane %v2559_v14, 2  ;;  %v2574_v9 = vrot.slane %v2560_v30, 2  ;;  %v2599_v33 = vmul.f32 %v2596_v24, %v5006_v31  ;;  %v6769_v42 = vld [vmem:[#allocation52_spill] sm:$0xff] }
 0x266   :  { %6753 = vst [vmem:[#allocation28_spill] sm:$0xff] %v5478_v12  ;;  %6754 = vst [vmem:[#allocation29_spill] sm:$0xff] %v5480_v11  ;;  %v752_v49 = vadd.f32 %v6763_v39, %v712_v52  ;;  %v789_v11 = vadd.f32 %v6765_v51, %v749_v3  ;;  %v2577_v30 = vrot.slane %v2562_v10, 2  ;;  %v2636_v59 = vstv %s5485_s5  ;;  %v6770_v10 = vld [vmem:[#allocation53_spill] sm:$0xff]  ;;  %s6379_s5 = sld [smem:[#allocation8 + $0x5c]] }
 0x267   :  { %2541 = vrot.lane.b32.xlu1 %v2533_v44, %s4030_s29  ;;  %2543 = vrot.lane.b32.xlu0 %v2536_v54, %s4030_s29  ;;  %6760 = vst [vmem:[#allocation31_spill] sm:$0xff] %v5509_v55  ;;  %v2598_v44 = vmul.f32 %v5506_v46, %v2596_v24  ;;  %v2571_v54 = vsel %vm614_vm4, %v2569_v35, %v2570_v22  ;;  %v5522_v55 = vld [vmem:[#allocation2 + $0x48] sm:$0xff]  ;;  %v5531_v35 = vld [vmem:[#allocation2 + $0x50] sm:$0xff] }
 0x268   :  { %v5534_v14 = vmul.f32 %v5531_v35, %v1966_v6  ;;  %v2600_v48 = vmul.f32 %v5522_v55, %v2596_v24  ;;  %v790_v12 = vadd.f32 %v6769_v42, %v750_v43  ;;  %v2573_v3 = vsel %vm614_vm4, %v2570_v22, %v2572_v0 }
 0x269   :  { %v5511_v13 = vpop.permute.xlu1 %1987  ;;  %v5513_v16 = vpop.permute.xlu0 %1989  ;;  %v2576_v51 = vsel %vm614_vm4, %v2574_v9, %v2575_v20  ;;  %v2612_v43 = vrot.slane %v2599_v33, 2  ;;  %v2578_v22 = vsel %vm614_vm4, %v2575_v20, %v2577_v30  ;;  %v2638_v0 = vmul.f32 %v5506_v46, %v2636_v59 }
 0x26a   :  { %6761 = vst [vmem:[#allocation32_spill] sm:$0xff] %v5511_v13  ;;  %6762 = vst [vmem:[#allocation33_spill] sm:$0xff] %v5513_v16  ;;  %v5525_v13 = vmul.f32 %v5522_v55, %v1966_v6  ;;  %v2609_v16 = vrot.slane %v2597_v17, 2  ;;  %v2602_v6 = vmul.f32 %v2596_v24, %v5043_v62  ;;  %v6772_v17 = vld [vmem:[#allocation55_spill] sm:$0xff]  ;;  %v2614_v42 = vrot.slane %v2600_v48, 2  ;;  %v6776_v48 = vld [vmem:[#allocation56_spill] sm:$0xff] }
 0x26b   :  { %2545 = vrot.lane.b32.xlu1 %v2538_v5, %s4030_s29  ;;  %2579 = vrot.lane.b32.xlu0 %v2571_v54, %s4031_s4  ;;  %6766 = vst [vmem:[#allocation36_spill] sm:$0xff] %v5534_v14  ;;  %v2610_v5 = vrot.slane %v2598_v44, 2  ;;  %v2601_v54 = vmul.f32 %v5531_v35, %v2596_v24  ;;  %v791_v14 = vadd.f32 %v6770_v10, %v751_v2  ;;  %v6773_v2 = vld [vmem:[#allocation59_spill] sm:$0xff] }
 0x26c   :  { %6764 = vst [vmem:[#allocation35_spill] sm:$0xff] %v5525_v13  ;;  %v829_v44 = vadd.f32 %v6772_v17, %v789_v11  ;;  %v2637_v24 = vmul.f32 %v5500_v50, %v2636_v59  ;;  %v2617_v33 = vrot.slane %v2602_v6, 2  ;;  %v2640_v20 = vmul.f32 %v5522_v55, %v2636_v59  ;;  %v6777_v13 = vld [vmem:[#allocation57_spill] sm:$0xff] }
 0x26d   :  { %v5537_v52 = vpop.permute.xlu1 %1991  ;;  %v5539_v39 = vpop.permute.xlu0 %2011  ;;  %v2611_v11 = vsel %vm614_vm4, %v2609_v16, %v2610_v5  ;;  %v2641_v30 = vmul.f32 %v5531_v35, %v2636_v59  ;;  %v830_v17 = vadd.f32 %v6776_v48, %v790_v12  ;;  %v831_v56 = vadd.f32 %v6777_v13, %v791_v14 }
 0x26e   :  { %6767 = vst [vmem:[#allocation34_spill] sm:$0xff] %v5537_v52  ;;  %6768 = vst [vmem:[#allocation37_spill] sm:$0xff] %v5539_v39  ;;  %v6771_v52 = vld [vmem:[#allocation54_spill] sm:$0xff]  ;;  %v869_v9 = vadd.f32 %v6773_v2, %v829_v44  ;;  %v2613_v44 = vsel %vm614_vm4, %v2610_v5, %v2612_v43  ;;  %v2649_v16 = vrot.slane %v2637_v24, 2  ;;  %v2642_v6 = vmul.f32 %v2636_v59, %v5043_v62 }
 0x26f   :  { %v792_v39 = vadd.f32 %v6771_v52, %v752_v49  ;;  %2581 = vrot.lane.b32.xlu1 %v2573_v3, %s4031_s4  ;;  %2583 = vrot.lane.b32.xlu0 %v2576_v51, %s4031_s4  ;;  %v2615_v52 = vrot.slane %v2601_v54, 2  ;;  %v2708_v3 = vstv %s5518_s6  ;;  %v2639_v51 = vmul.f32 %v2636_v59, %v5006_v31  ;;  %s3902_s6 = sld [smem:[#allocation8 + $0x5d]] }
 0x270   :  { %v2650_v54 = vrot.slane %v2638_v0, 2  ;;  %v2709_v2 = vmul.f32 %v5500_v50, %v2708_v3  ;;  %v902_v12 = vadd.f32 %v5090_v27, %v869_v9  ;;  %v2710_v5 = vmul.f32 %v5506_v46, %v2708_v3  ;;  %v6781_v0 = vld [vmem:[#allocation60_spill] sm:$0xff] }
 0x271   :  { %v5560_v10 = vpop.permute.xlu1 %2013  ;;  %v5562_v49 = vpop.permute.xlu0 %2015  ;;  %v2616_v14 = vsel %vm614_vm4, %v2614_v42, %v2615_v52  ;;  %v2618_v43 = vsel %vm614_vm4, %v2615_v52, %v2617_v33  ;;  %v2654_v59 = vrot.slane %v2640_v20, 2  ;;  %v2655_v24 = vrot.slane %v2641_v30, 2  ;;  %v6782_v42 = vld [vmem:[#allocation61_spill] sm:$0xff] }
 0x272   :  { %6774 = vst [vmem:[#allocation126_spill] sm:$0xff] %v5560_v10  ;;  %6775 = vst [vmem:[#allocation127_spill] sm:$0xff] %v5562_v49  ;;  %v6778_v10 = vld [vmem:[#allocation58_spill] sm:$0xff]  ;;  %v2711_v27 = vmul.f32 %v2708_v3, %v5006_v31  ;;  %v5593_v9 = vstv %s5554_s10  ;;  %v2657_v52 = vrot.slane %v2642_v6, 2  ;;  %v2721_v33 = vrot.slane %v2709_v2, 3  ;;  %s6416_s10 = sld [smem:[#allocation8 + $0x4d]] }
 0x273   :  { %2585 = vrot.lane.b32.xlu1 %v2578_v22, %s4031_s4  ;;  %2619 = vrot.lane.b32.xlu0 %v2611_v11, %s4032_s7  ;;  %v832_v49 = vadd.f32 %v6778_v10, %v792_v39  ;;  %v2652_v22 = vrot.slane %v2639_v51, 2  ;;  %v870_v11 = vadd.f32 %v6781_v0, %v830_v17  ;;  %v5590_v39 = vstv %s5547_s8  ;;  %s6412_s8 = sld [smem:[#allocation8 + $0x5e]] }
 0x274   :  { %v871_v10 = vadd.f32 %v6782_v42, %v831_v56  ;;  %v2722_v30 = vrot.slane %v2710_v5, 3  ;;  %v2712_v17 = vmul.f32 %v5522_v55, %v2708_v3  ;;  %v2714_v31 = vmul.f32 %v2708_v3, %v5043_v62  ;;  %v6785_v42 = vld [vmem:[#allocation62_spill] sm:$0xff] }
 0x275   :  { %v5578_v48 = vpop.permute.xlu1 %2017  ;;  %v5580_v13 = vpop.permute.xlu0 %2037  ;;  %v5608_v56 = vmul.f32 %v5506_v46, %v5590_v39  ;;  %v5614_v6 = vmul.f32 %v5506_v46, %v5593_v9  ;;  %v903_v2 = vadd.f32 %v5119_v61, %v870_v11  ;;  %v2653_v62 = vsel %vm614_vm4, %v2650_v54, %v2652_v22 }
 0x276   :  { %6779 = vst [vmem:[#allocation38_spill] sm:$0xff] %v5578_v48  ;;  %6780 = vst [vmem:[#allocation128_spill] sm:$0xff] %v5580_v13  ;;  %v2651_v13 = vsel %vm614_vm4, %v2649_v16, %v2650_v54  ;;  %v2133_v16 = vmul.f32 %v5500_v50, %v5593_v9  ;;  %v2724_v5 = vrot.slane %v2711_v27, 3  ;;  %v904_v0 = vadd.f32 %v5122_v4, %v871_v10  ;;  %v6786_v48 = vld [vmem:[#allocation63_spill] sm:$0xff] }
 0x277   :  { %2621 = vrot.lane.b32.xlu1 %v2613_v44, %s4032_s7  ;;  %2623 = vrot.lane.b32.xlu0 %v2616_v14, %s4032_s7  ;;  %v2713_v44 = vmul.f32 %v5531_v35, %v2708_v3  ;;  %v2749_v14 = vmul.f32 %v5500_v50, %v5590_v39  ;;  %v2656_v3 = vsel %vm614_vm4, %v2654_v59, %v2655_v24  ;;  %v2729_v54 = vrot.slane %v2714_v31, 3 }
 0x278   :  { %v2658_v1 = vsel %vm614_vm4, %v2655_v24, %v2657_v52  ;;  %v2762_v4 = vrot.slane %v5608_v56, 3  ;;  %v2145_v59 = vrot.slane %v2133_v16, 1  ;;  %v2752_v27 = vmul.f32 %v5522_v55, %v5590_v39 }
 0x279   :  { %v5597_v51 = vpop.permute.xlu1 %2039  ;;  %v5599_v20 = vpop.permute.xlu0 %2041  ;;  %v2727_v11 = vrot.slane %v2713_v44, 3  ;;  %v2761_v22 = vrot.slane %v2749_v14, 3  ;;  %v2753_v52 = vmul.f32 %v5531_v35, %v5590_v39 }
 0x27a   :  { %6783 = vst [vmem:[#allocation39_spill] sm:$0xff] %v5597_v51  ;;  %6784 = vst [vmem:[#allocation40_spill] sm:$0xff] %v5599_v20  ;;  %v872_v51 = vadd.f32 %v6785_v42, %v832_v49  ;;  %v942_v20 = vadd.f32 %v6786_v48, %v902_v12  ;;  %v2146_v49 = vrot.slane %v5614_v6, 1  ;;  %v2725_v12 = vsel %vm887_vm5, %v2722_v30, %v2724_v5  ;;  %v5639_v48 = vld [vmem:[#allocation2 + $0x40] sm:$0x3f] }
 0x27b   :  { %2625 = vrot.lane.b32.xlu1 %v2618_v43, %s4032_s7  ;;  %2659 = vrot.lane.b32.xlu0 %v2651_v13, %s4033_s9  ;;  %v2723_v43 = vsel %vm887_vm5, %v2721_v33, %v2722_v30  ;;  %v2726_v13 = vrot.slane %v2712_v17, 3  ;;  %v2751_v24 = vmul.f32 %v5639_v48, %v5590_v39  ;;  %v2135_v33 = vmul.f32 %v5639_v48, %v5593_v9  ;;  %v6789_v17 = vld [vmem:[#allocation64_spill] sm:$0xff] }
 0x27c   :  { %v905_v10 = vadd.f32 %v5146_v37, %v872_v51  ;;  %v2136_v30 = vmul.f32 %v5522_v55, %v5593_v9  ;;  %v943_v44 = vadd.f32 %v6789_v17, %v903_v2  ;;  %v2730_v16 = vsel %vm887_vm5, %v2727_v11, %v2729_v54  ;;  %v6792_v51 = vld [vmem:[#allocation65_spill] sm:$0xff]  ;;  %v6794_v54 = vld [vmem:[#allocation66_spill] sm:$0xff] }
 0x27d   :  { %v5627_v34 = vpop.permute.xlu1 %2043  ;;  %v5629_v61 = vpop.permute.xlu0 %2063  ;;  %v2728_v56 = vsel %vm887_vm5, %v2726_v13, %v2727_v11  ;;  %v2137_v37 = vmul.f32 %v5531_v35, %v5593_v9  ;;  %v944_v6 = vadd.f32 %v6792_v51, %v904_v0  ;;  %v2788_v5 = vstv %s5616_s11  ;;  %v5669_v13 = vld [vmem:[#allocation2 + $0x58] sm:$0x3f]  ;;  %s6425_s11 = sld [smem:[#allocation8 + $0x5f]] }
 0x27e   :  { %6787 = vst [vmem:[#allocation41_spill] sm:$0xff] %v5627_v34  ;;  %6788 = vst [vmem:[#allocation42_spill] sm:$0xff] %v5629_v61  ;;  %v2764_v2 = vrot.slane %v2751_v24, 3  ;;  %v2766_v42 = vrot.slane %v2752_v27, 3  ;;  %v2754_v11 = vmul.f32 %v5669_v13, %v5590_v39  ;;  %v2138_v0 = vmul.f32 %v5669_v13, %v5593_v9  ;;  %v6797_v39 = vld [vmem:[#allocation67_spill] sm:$0xff] }
 0x27f   :  { %2661 = vrot.lane.b32.xlu1 %v2653_v62, %s4033_s9  ;;  %2663 = vrot.lane.b32.xlu0 %v2656_v3, %s4033_s9  ;;  %v2763_v62 = vsel %vm887_vm5, %v2761_v22, %v2762_v4  ;;  %v5664_v3 = vsel %vm341_vm3, %v2145_v59, %v2146_v49  ;;  %v945_v22 = vadd.f32 %v6794_v54, %v905_v10  ;;  %v2767_v59 = vrot.slane %v2753_v52, 3 }
 0x280   :  { %6793 = vst [vmem:[#allocation45_spill] sm:$0xff] %v5664_v3  ;;  %v2148_v17 = vrot.slane %v2135_v33, 1  ;;  %v2150_v51 = vrot.slane %v2136_v30, 1  ;;  %v2789_v24 = vmul.f32 %v5500_v50, %v2788_v5  ;;  %v2790_v27 = vmul.f32 %v5506_v46, %v2788_v5 }
 0x281   :  { %v5653_v31 = vpop.permute.xlu1 %2065  ;;  %v5655_v14 = vpop.permute.xlu0 %2067  ;;  %v982_v61 = vadd.f32 %v6797_v39, %v942_v20  ;;  %v2791_v9 = vmul.f32 %v5639_v48, %v2788_v5  ;;  %v2792_v10 = vmul.f32 %v5522_v55, %v2788_v5  ;;  %v2793_v52 = vmul.f32 %v5531_v35, %v2788_v5 }
 0x282   :  { %6790 = vst [vmem:[#allocation43_spill] sm:$0xff] %v5653_v31  ;;  %6791 = vst [vmem:[#allocation44_spill] sm:$0xff] %v5655_v14  ;;  %v2828_v31 = vstv %s5632_s12  ;;  %v2765_v33 = vsel %vm887_vm5, %v2762_v4, %v2764_v2  ;;  %v2769_v30 = vrot.slane %v2754_v11, 3  ;;  %v2794_v54 = vmul.f32 %v5669_v13, %v2788_v5  ;;  %v6801_v11 = vld [vmem:[#allocation68_spill] sm:$0xff] }
 0x283   :  { %2665 = vrot.lane.b32.xlu1 %v2658_v1, %s4033_s9  ;;  %2731 = vrot.lane.b32.xlu0 %v2723_v43, %s4028_s25  ;;  %v2151_v43 = vrot.slane %v2137_v37, 1  ;;  %v2153_v37 = vrot.slane %v2138_v0, 1  ;;  %v5695_v20 = vsel %vm341_vm3, %v2146_v49, %v2148_v17  ;;  %v2829_v39 = vmul.f32 %v5500_v50, %v2828_v31 }
 0x284   :  { %6798 = vst [vmem:[#allocation48_spill] sm:$0xff] %v5695_v20  ;;  %v2801_v4 = vrot.slane %v2789_v24, 3  ;;  %v2802_v2 = vrot.slane %v2790_v27, 3  ;;  %v2831_v5 = vmul.f32 %v5639_v48, %v2828_v31  ;;  %v2804_v0 = vrot.slane %v2791_v9, 3  ;;  %v6802_v20 = vld [vmem:[#allocation69_spill] sm:$0xff] }
 0x285   :  { %v5676_v3 = vpop.permute.xlu1 %2069  ;;  %v5678_v1 = vpop.permute.xlu0 %2089  ;;  %v2806_v49 = vrot.slane %v2792_v10, 3  ;;  %v2807_v17 = vrot.slane %v2793_v52, 3  ;;  %v984_v14 = vadd.f32 %v6802_v20, %v944_v6  ;;  %v5715_v24 = vsel %vm341_vm3, %v2151_v43, %v2153_v37  ;;  %v6804_v52 = vld [vmem:[#allocation70_spill] sm:$0xff] }
 0x286   :  { %6795 = vst [vmem:[#allocation46_spill] sm:$0xff] %v5676_v3  ;;  %6796 = vst [vmem:[#allocation47_spill] sm:$0xff] %v5678_v1  ;;  %v2768_v1 = vsel %vm887_vm5, %v2766_v42, %v2767_v59  ;;  %v2830_v3 = vmul.f32 %v5506_v46, %v2828_v31  ;;  %v983_v42 = vadd.f32 %v6801_v11, %v943_v44  ;;  %v2809_v27 = vrot.slane %v2794_v54, 3  ;;  %v6808_v54 = vld [vmem:[#allocation73_spill] sm:$0xff] }
 0x287   :  { %2733 = vrot.lane.b32.xlu1 %v2725_v12, %s4028_s25  ;;  %2735 = vrot.lane.b32.xlu0 %v2728_v56, %s4028_s25  ;;  %v5704_v56 = vsel %vm341_vm3, %v2150_v51, %v2151_v43  ;;  %v2770_v51 = vsel %vm887_vm5, %v2767_v59, %v2769_v30  ;;  %6803 = vst [vmem:[#allocation51_spill] sm:$0xff] %v5715_v24  ;;  %v2844_v59 = vrot.slane %v2831_v5, 3  ;;  %v2868_v30 = vstv %s5683_s13  ;;  %v6807_v43 = vld [vmem:[#allocation71_spill] sm:$0xff]  ;;  %v6809_v24 = vld [vmem:[#allocation72_spill] sm:$0xff]  ;;  %v6810_v5 = vld [vmem:[#allocation77_spill] sm:$0xff] }
 0x288   :  { %6800 = vst [vmem:[#allocation50_spill] sm:$0xff] %v5704_v56  ;;  %v2841_v56 = vrot.slane %v2829_v39, 3  ;;  %v2842_v44 = vrot.slane %v2830_v3, 3  ;;  %v2832_v9 = vmul.f32 %v5522_v55, %v2828_v31  ;;  %v5719_v10 = vmul.f32 %v5531_v35, %v2828_v31 }
 0x289   :  { %v5699_v34 = vpop.permute.xlu1 %2091  ;;  %v5701_v12 = vpop.permute.xlu0 %2093  ;;  %v985_v11 = vadd.f32 %v6804_v52, %v945_v22  ;;  %v1022_v37 = vadd.f32 %v6807_v43, %v982_v61  ;;  %v1024_v20 = vadd.f32 %v6808_v54, %v984_v14  ;;  %v2805_v3 = vsel %vm887_vm5, %v2802_v2, %v2804_v0 }
 0x28a   :  { %6799 = vst [vmem:[#allocation49_spill] sm:$0xff] %v5699_v34  ;;  %v2808_v39 = vsel %vm887_vm5, %v2806_v49, %v2807_v17  ;;  %v1023_v34 = vadd.f32 %v6809_v24, %v983_v42  ;;  %v2810_v22 = vsel %vm887_vm5, %v2807_v17, %v2809_v27  ;;  %v2843_v61 = vsel %vm887_vm5, %v2841_v56, %v2842_v44  ;;  %v6813_v17 = vld [vmem:[#allocation74_spill] sm:$0xff]  ;;  %v6814_v27 = vld [vmem:[#allocation75_spill] sm:$0xff] }
 0x28b   :  { %2737 = vrot.lane.b32.xlu1 %v2730_v16, %s4028_s25  ;;  %2771 = vrot.lane.b32.xlu0 %v2763_v62, %s4029_s27  ;;  %v2803_v62 = vsel %vm887_vm5, %v2801_v4, %v2802_v2  ;;  %v2834_v4 = vmul.f32 %v5669_v13, %v2828_v31  ;;  %v1064_v52 = vadd.f32 %v6810_v5, %v1024_v20  ;;  %v2846_v14 = vrot.slane %v2832_v9, 3  ;;  %v6815_v9 = vld [vmem:[#allocation81_spill] sm:$0xff]  ;;  %v6816_v5 = vld [vmem:[#allocation78_spill] sm:$0xff] }
 0x28c   :  { %v2847_v2 = vrot.slane %v5719_v10, 3  ;;  %v2870_v42 = vmul.f32 %v5506_v46, %v2868_v30  ;;  %v2871_v31 = vmul.f32 %v5639_v48, %v2868_v30  ;;  %v1025_v24 = vadd.f32 %v6813_v17, %v985_v11  ;;  %v6818_v17 = vld [vmem:[#allocation85_spill] sm:$0xff] }
 0x28d   :  { %v5722_v6 = vpop.permute.xlu1 %2095  ;;  %v5724_v16 = vpop.permute.xlu0 %2115  ;;  %v1062_v56 = vadd.f32 %v6814_v27, %v1022_v37  ;;  %v1104_v43 = vadd.f32 %v6815_v9, %v1064_v52  ;;  %v2908_v10 = vstv %s5708_s2  ;;  %v2849_v54 = vrot.slane %v2834_v4, 3 }
 0x28e   :  { %6805 = vst [vmem:[#allocation52_spill] sm:$0xff] %v5722_v6  ;;  %6806 = vst [vmem:[#allocation53_spill] sm:$0xff] %v5724_v16  ;;  %v2874_v20 = vmul.f32 %v5669_v13, %v2868_v30  ;;  %v6817_v16 = vld [vmem:[#allocation79_spill] sm:$0xff]  ;;  %v2848_v52 = vsel %vm887_vm5, %v2846_v14, %v2847_v2  ;;  %v2882_v27 = vrot.slane %v2870_v42, 3  ;;  %v2909_v9 = vmul.f32 %v5500_v50, %v2908_v10  ;;  %v6824_v6 = vld [vmem:[#allocation80_spill] sm:$0xff] }
 0x28f   :  { %2773 = vrot.lane.b32.xlu1 %v2765_v33, %s4029_s27  ;;  %2775 = vrot.lane.b32.xlu0 %v2768_v1, %s4029_s27  ;;  %v5745_v33 = vsel %vm887_vm5, %v2842_v44, %v2844_v59  ;;  %v2869_v1 = vmul.f32 %v5500_v50, %v2868_v30  ;;  %v2872_v44 = vmul.f32 %v5522_v55, %v2868_v30 }
 0x290   :  { %v2873_v59 = vmul.f32 %v5531_v35, %v2868_v30  ;;  %v1102_v11 = vadd.f32 %v6817_v16, %v1062_v56  ;;  %v1144_v37 = vadd.f32 %v6818_v17, %v1104_v43  ;;  %v2910_v30 = vmul.f32 %v5506_v46, %v2908_v10  ;;  %v6822_v56 = vld [vmem:[#allocation82_spill] sm:$0xff] }
 0x291   :  { %v5740_v0 = vpop.permute.xlu1 %2117  ;;  %v5742_v49 = vpop.permute.xlu0 %2119  ;;  %v2881_v4 = vrot.slane %v2869_v1, 3  ;;  %v2884_v17 = vrot.slane %v2871_v31, 3  ;;  %v2889_v42 = vrot.slane %v2874_v20, 3  ;;  %v2912_v20 = vmul.f32 %v5522_v55, %v2908_v10 }
 0x292   :  { %6811 = vst [vmem:[#allocation54_spill] sm:$0xff] %v5740_v0  ;;  %6812 = vst [vmem:[#allocation55_spill] sm:$0xff] %v5742_v49  ;;  %v1065_v0 = vadd.f32 %v6816_v5, %v1025_v24  ;;  %v6821_v24 = vld [vmem:[#allocation76_spill] sm:$0xff]  ;;  %v6823_v5 = vld [vmem:[#allocation83_spill] sm:$0xff]  ;;  %v2887_v1 = vrot.slane %v2873_v59, 3  ;;  %v2922_v59 = vrot.slane %v2910_v30, 3 }
 0x293   :  { %2777 = vrot.lane.b32.xlu1 %v2770_v51, %s4029_s27  ;;  %2811 = vrot.lane.b32.xlu0 %v2803_v62, %s4030_s29  ;;  %v1063_v16 = vadd.f32 %v6821_v24, %v1023_v34  ;;  %v1142_v14 = vadd.f32 %v6823_v5, %v1102_v11  ;;  %v1177_v34 = vadd.f32 %v5242_v21, %v1144_v37  ;;  %v6825_v24 = vld [vmem:[#allocation86_spill] sm:$0xff]  ;;  %v6828_v21 = vld [vmem:[#allocation89_spill] sm:$0xff] }
 0x294   :  { %v1105_v43 = vadd.f32 %v6822_v56, %v1065_v0  ;;  %v2850_v11 = vsel %vm887_vm5, %v2847_v2, %v2849_v54  ;;  %v5799_v54 = vsel %vm887_vm5, %v2887_v1, %v2889_v42  ;;  %v6830_v5 = vld [vmem:[#allocation93_spill] sm:$0xff]  ;;  %v6833_v42 = vld [vmem:[#allocation90_spill] sm:$0xff] }
 0x295   :  { %v5765_v51 = vpop.permute.xlu1 %2121  ;;  %v5767_v62 = vpop.permute.xlu0 %2187  ;;  %v1103_v49 = vadd.f32 %v6824_v6, %v1063_v16  ;;  %v1175_v56 = vadd.f32 %v5200_v26, %v1142_v14  ;;  %v6827_v6 = vld [vmem:[#allocation84_spill] sm:$0xff]  ;;  %v1217_v37 = vadd.f32 %v6828_v21, %v1177_v34  ;;  %v5830_v21 = vstv %s5779_s16 }
 0x296   :  { %6819 = vst [vmem:[#allocation59_spill] sm:$0xff] %v5765_v51  ;;  %6820 = vst [vmem:[#allocation56_spill] sm:$0xff] %v5767_v62  ;;  %v2886_v62 = vrot.slane %v2872_v44, 3  ;;  %v2911_v51 = vmul.f32 %v5639_v48, %v2908_v10  ;;  %v1145_v0 = vadd.f32 %v6825_v24, %v1105_v43  ;;  %v2921_v44 = vrot.slane %v2909_v9, 3  ;;  %v6834_v24 = vld [vmem:[#allocation91_spill] sm:$0xff] }
 0x297   :  { %2813 = vrot.lane.b32.xlu1 %v2805_v3, %s4030_s29  ;;  %2815 = vrot.lane.b32.xlu0 %v2808_v39, %s4030_s29  ;;  %v2883_v39 = vsel %vm887_vm5, %v2881_v4, %v2882_v27  ;;  %v1143_v16 = vadd.f32 %v6827_v6, %v1103_v49  ;;  %v2885_v43 = vsel %vm887_vm5, %v2882_v27, %v2884_v17  ;;  %v6829_v49 = vld [vmem:[#allocation87_spill] sm:$0xff]  ;;  %v2980_v27 = vstv %s5763_s14 }
 0x298   :  { %v2888_v2 = vsel %vm887_vm5, %v2886_v62, %v2887_v1  ;;  %v2924_v4 = vrot.slane %v2911_v51, 3  ;;  %v2913_v9 = vmul.f32 %v5531_v35, %v2908_v10  ;;  %v1178_v26 = vadd.f32 %v5279_v28, %v1145_v0 }
 0x299   :  { %v5785_v31 = vpop.permute.xlu1 %2189  ;;  %v5787_v3 = vpop.permute.xlu0 %2191  ;;  %v1215_v30 = vadd.f32 %v6829_v49, %v1175_v56  ;;  %v1257_v14 = vadd.f32 %v6830_v5, %v1217_v37  ;;  %v2926_v62 = vrot.slane %v2912_v20, 3  ;;  %v2914_v51 = vmul.f32 %v5669_v13, %v2908_v10  ;;  %v6835_v56 = vld [vmem:[#allocation97_spill] sm:$0xff]  ;;  %v6837_v37 = vld [vmem:[#allocation94_spill] sm:$0xff]  ;;  %v6838_v49 = vld [vmem:[#allocation95_spill] sm:$0xff] }
 0x29a   :  { %6826 = vst [vmem:[#allocation57_spill] sm:$0xff] %v5785_v31  ;;  %v5815_v1 = vstv %s5771_s15  ;;  %v1176_v28 = vadd.f32 %v5239_v32, %v1143_v16  ;;  %v1218_v34 = vadd.f32 %v6833_v42, %v1178_v26  ;;  %v2981_v10 = vmul.f32 %v5500_v50, %v2980_v27  ;;  %v6836_v32 = vld [vmem:[#allocation88_spill] sm:$0xff]  ;;  %v6839_v5 = vld [vmem:[#allocation101_spill] sm:$0xff] }
 0x29b   :  { %2817 = vrot.lane.b32.xlu1 %v2810_v22, %s4030_s29  ;;  %2851 = vrot.lane.b32.xlu0 %v2843_v61, %s4031_s4  ;;  %v5811_v61 = vsel %vm887_vm5, %v2921_v44, %v2922_v59  ;;  %v1255_v0 = vadd.f32 %v6834_v24, %v1215_v30  ;;  %v1297_v6 = vadd.f32 %v6835_v56, %v1257_v14  ;;  %v6841_v56 = vld [vmem:[#allocation92_spill] sm:$0xff] }
 0x29c   :  { %v5825_v44 = vsel %vm887_vm5, %v2922_v59, %v2924_v4  ;;  %v2982_v20 = vmul.f32 %v5506_v46, %v2980_v27  ;;  %v1216_v16 = vadd.f32 %v6836_v32, %v1176_v28  ;;  %v1258_v26 = vadd.f32 %v6837_v37, %v1218_v34  ;;  %v6843_v32 = vld [vmem:[#allocation99_spill] sm:$0xff]  ;;  %v6844_v37 = vld [vmem:[#allocation105_spill] sm:$0xff] }
 0x29d   :  { %v5806_v17 = vpop.permute.xlu1 %2193  ;;  %v5808_v22 = vpop.permute.xlu0 %2227  ;;  %v1295_v30 = vadd.f32 %v6838_v49, %v1255_v0  ;;  %v1337_v14 = vadd.f32 %v6839_v5, %v1297_v6  ;;  %v2927_v59 = vrot.slane %v2913_v9, 3  ;;  %v2929_v4 = vrot.slane %v2914_v51, 3  ;;  %v6845_v5 = vld [vmem:[#allocation96_spill] sm:$0xff] }
 0x29e   :  { %6831 = vst [vmem:[#allocation58_spill] sm:$0xff] %v5806_v17  ;;  %6832 = vst [vmem:[#allocation60_spill] sm:$0xff] %v5808_v22  ;;  %v2983_v42 = vmul.f32 %v5639_v48, %v2980_v27  ;;  %v2984_v24 = vmul.f32 %v5522_v55, %v2980_v27  ;;  %v1256_v31 = vadd.f32 %v6841_v56, %v1216_v16  ;;  %v6842_v22 = vld [vmem:[#allocation98_spill] sm:$0xff]  ;;  %v2993_v6 = vrot.slane %v2981_v10, 4  ;;  %v6847_v56 = vld [vmem:[#allocation103_spill] sm:$0xff] }
 0x29f   :  { %2853 = vrot.lane.b32.xlu1 %v5745_v33, %s4031_s4  ;;  %2855 = vrot.lane.b32.xlu0 %v2848_v52, %s4031_s4  ;;  %v1298_v28 = vadd.f32 %v6842_v22, %v1258_v26  ;;  %v1335_v34 = vadd.f32 %v6843_v32, %v1295_v30  ;;  %v1377_v0 = vadd.f32 %v6844_v37, %v1337_v14  ;;  %v2994_v49 = vrot.slane %v2982_v20, 4  ;;  %v6846_v17 = vld [vmem:[#allocation102_spill] sm:$0xff]  ;;  %v6848_v26 = vld [vmem:[#allocation109_spill] sm:$0xff] }
 0x2a0   :  { %v2985_v9 = vmul.f32 %v5531_v35, %v2980_v27  ;;  %v2986_v51 = vmul.f32 %v5669_v13, %v2980_v27  ;;  %v2996_v10 = vrot.slane %v2983_v42, 4  ;;  %v2998_v20 = vrot.slane %v2984_v24, 4  ;;  %v6850_v27 = vld [vmem:[#allocation100_spill] sm:$0xff] }
 0x2a1   :  { %v5836_v33 = vpop.permute.xlu1 %2229  ;;  %v5838_v52 = vpop.permute.xlu0 %2231  ;;  %v1338_v16 = vadd.f32 %v6846_v17, %v1298_v28  ;;  %v1375_v22 = vadd.f32 %v6847_v56, %v1335_v34  ;;  %v1417_v30 = vadd.f32 %v6848_v26, %v1377_v0  ;;  %v6852_v17 = vld [vmem:[#allocation107_spill] sm:$0xff]  ;;  %v3021_v34 = vmul.f32 %v5500_v50, %v5815_v1 }
 0x2a2   :  { %6840 = vst [vmem:[#allocation61_spill] sm:$0xff] %v5836_v33  ;;  %v1296_v33 = vadd.f32 %v6845_v5, %v1256_v31  ;;  %v6851_v31 = vld [vmem:[#allocation106_spill] sm:$0xff]  ;;  %v2999_v0 = vrot.slane %v2985_v9, 4  ;;  %v3023_v9 = vmul.f32 %v5639_v48, %v5815_v1  ;;  %v3024_v26 = vmul.f32 %v5522_v55, %v5815_v1 }
 0x2a3   :  { %2857 = vrot.lane.b32.xlu1 %v2850_v11, %s4031_s4  ;;  %2891 = vrot.lane.b32.xlu0 %v2883_v39, %s4032_s7  ;;  %v2928_v11 = vsel %vm887_vm5, %v2926_v62, %v2927_v59  ;;  %v5860_v39 = vsel %vm887_vm5, %v2927_v59, %v2929_v4  ;;  %v1378_v5 = vadd.f32 %v6851_v31, %v1338_v16  ;;  %v6853_v4 = vld [vmem:[#allocation104_spill] sm:$0xff]  ;;  %v6854_v16 = vld [vmem:[#allocation110_spill] sm:$0xff] }
 0x2a4   :  { %v1336_v37 = vadd.f32 %v6850_v27, %v1296_v33  ;;  %v1415_v28 = vadd.f32 %v6852_v17, %v1375_v22  ;;  %v2995_v62 = vsel %vm1160_vm6, %v2993_v6, %v2994_v49  ;;  %v3022_v59 = vmul.f32 %v5506_v46, %v5815_v1 }
 0x2a5   :  { %v5854_v32 = vpop.permute.xlu1 %2233  ;;  %v5856_v14 = vpop.permute.xlu0 %2267  ;;  %v2405_v33 = vmul.f32 %v5500_v50, %v5830_v21  ;;  %v1450_v24 = vadd.f32 %v5345_v60, %v1417_v30  ;;  %v1418_v56 = vadd.f32 %v6854_v16, %v1378_v5  ;;  %v5885_v6 = vmul.f32 %v5506_v46, %v5830_v21  ;;  %v6856_v30 = vld [vmem:[#allocation108_spill] sm:$0xff] }
 0x2a6   :  { %6849 = vst [vmem:[#allocation62_spill] sm:$0xff] %v5856_v14  ;;  %v1376_v42 = vadd.f32 %v6853_v4, %v1336_v37  ;;  %v5893_v60 = vmul.f32 %v5531_v35, %v5815_v1  ;;  %v6857_v37 = vld [vmem:[#allocation113_spill] sm:$0xff]  ;;  %v2997_v5 = vsel %vm1160_vm6, %v2994_v49, %v2996_v10  ;;  %v3000_v17 = vsel %vm1160_vm6, %v2998_v20, %v2999_v0 }
 0x2a7   :  { %2893 = vrot.lane.b32.xlu1 %v2885_v43, %s4032_s7  ;;  %2895 = vrot.lane.b32.xlu0 %v2888_v2, %s4032_s7  ;;  %v3001_v43 = vrot.slane %v2986_v51, 4  ;;  %v1448_v51 = vadd.f32 %v5336_v47, %v1415_v28  ;;  %v1490_v31 = vadd.f32 %v6857_v37, %v1450_v24  ;;  %v3033_v4 = vrot.slane %v3021_v34, 4  ;;  %v6858_v47 = vld [vmem:[#allocation111_spill] sm:$0xff] }
 0x2a8   :  { %v1416_v27 = vadd.f32 %v6856_v30, %v1376_v42  ;;  %v3034_v16 = vrot.slane %v3022_v59, 4  ;;  %v1451_v14 = vadd.f32 %v5348_v53, %v1418_v56  ;;  %v6859_v42 = vld [vmem:[#allocation117_spill] sm:$0xff]  ;;  %v3036_v10 = vrot.slane %v3023_v9, 4  ;;  %v6860_v59 = vld [vmem:[#allocation114_spill] sm:$0xff]  ;;  %v6861_v56 = vld [vmem:[#allocation115_spill] sm:$0xff] }
 0x2a9   :  { %v5879_v22 = vpop.permute.xlu1 %2269  ;;  %v5881_v2 = vpop.permute.xlu0 %2271  ;;  %v1488_v28 = vadd.f32 %v6858_v47, %v1448_v51  ;;  %v1530_v30 = vadd.f32 %v6859_v42, %v1490_v31  ;;  %v5908_v24 = vsel %vm1160_vm6, %v2999_v0, %v3001_v43  ;;  %v3038_v20 = vrot.slane %v3024_v26, 4  ;;  %v6862_v37 = vld [vmem:[#allocation123_spill] sm:$0xff]  ;;  %v6863_v26 = vld [vmem:[#allocation112_spill] sm:$0xff] }
 0x2aa   :  { %6855 = vst [vmem:[#allocation63_spill] sm:$0xff] %v5879_v22  ;;  %v2417_v22 = vrot.slane %v2405_v33, 2  ;;  %v3039_v34 = vrot.slane %v5893_v60, 4  ;;  %v1449_v53 = vadd.f32 %v5342_v29, %v1416_v27  ;;  %v1491_v33 = vadd.f32 %v6860_v59, %v1451_v14  ;;  %v6864_v27 = vld [vmem:[#allocation118_spill] sm:$0xff]  ;;  %v6865_v47 = vld [vmem:[#allocation119_spill] sm:$0xff]  ;;  %v6866_v42 = vld [vmem:[#allocation132_spill] sm:$0xff] }
 0x2ab   :  { %2897 = vrot.lane.b32.xlu1 %v5799_v54, %s4032_s7  ;;  %2931 = vrot.lane.b32.xlu0 %v5811_v61, %s4033_s9  ;;  %v2418_v61 = vrot.slane %v5885_v6, 2  ;;  %v1528_v51 = vadd.f32 %v6861_v56, %v1488_v28  ;;  %v1570_v0 = vadd.f32 %v6862_v37, %v1530_v30  ;;  %v3035_v43 = vsel %vm1160_vm6, %v3033_v4, %v3034_v16  ;;  %v6867_v56 = vld [vmem:[#allocation116_spill] sm:$0xff]  ;;  %v6868_v37 = vld [vmem:[#allocation129_spill] sm:$0xff] }
 0x2ac   :  { %v2407_v6 = vmul.f32 %v5639_v48, %v5830_v21  ;;  %v2408_v9 = vmul.f32 %v5522_v55, %v5830_v21  ;;  %v3060_v29 = vstv %s5874_s17  ;;  %v1489_v14 = vadd.f32 %v6863_v26, %v1449_v53  ;;  %v6869_v26 = vld [vmem:[#allocation130_spill] sm:$0xff] }
 0x2ad   :  { %v5910_v49 = vpop.permute.xlu1 %2273  ;;  %v5912_v54 = vpop.permute.xlu0 %2307  ;;  %v1531_v31 = vadd.f32 %v6864_v27, %v1491_v33  ;;  %v1568_v28 = vadd.f32 %v6865_v47, %v1528_v51  ;;  %v1610_v30 = vadd.f32 %v6866_v42, %v1570_v0  ;;  %v5938_v4 = vsel %vm614_vm4, %v2417_v22, %v2418_v61 }
 0x2ae   :  { %v5941_v59 = vsel %vm1160_vm6, %v3034_v16, %v3036_v10  ;;  %v5946_v53 = vsel %vm1160_vm6, %v3038_v20, %v3039_v34  ;;  %v2409_v33 = vmul.f32 %v5531_v35, %v5830_v21  ;;  %v1529_v51 = vadd.f32 %v6867_v56, %v1489_v14  ;;  %v6870_v14 = vld [vmem:[#allocation122_spill] sm:$0xff] }
 0x2af   :  { %2933 = vrot.lane.b32.xlu1 %v5825_v44, %s4033_s9  ;;  %2935 = vrot.lane.b32.xlu0 %v2928_v11, %s4033_s9  ;;  %v1571_v0 = vadd.f32 %v6868_v37, %v1531_v31  ;;  %v1608_v27 = vadd.f32 %v6869_v26, %v1568_v28  ;;  %v1650_v22 = vadd.f32 %v5136_v15, %v1610_v30  ;;  %v2422_v30 = vrot.slane %v2408_v9, 2  ;;  %v6871_v37 = vld [vmem:[#allocation131_spill] sm:$0xff] }
 0x2b0   :  { %v3026_v16 = vmul.f32 %v5669_v13, %v5815_v1  ;;  %v3061_v10 = vmul.f32 %v5500_v50, %v3060_v29  ;;  %v3062_v20 = vmul.f32 %v5506_v46, %v3060_v29  ;;  %v1569_v31 = vadd.f32 %v6870_v14, %v1529_v51 }
 0x2b1   :  { %v5933_v44 = vpop.permute.xlu1 %2309  ;;  %v5935_v11 = vpop.permute.xlu0 %2311  ;;  %v1611_v47 = vadd.f32 %v5106_v25, %v1571_v0  ;;  %v1648_v15 = vadd.f32 %v5108_v63, %v1608_v27  ;;  %v1690_v28 = vadd.f32 %v5181_v18, %v1650_v22  ;;  %v2410_v1 = vmul.f32 %v5669_v13, %v5830_v21 }
 0x2b2   :  { %v3063_v56 = vmul.f32 %v5639_v48, %v3060_v29  ;;  %v1609_v26 = vadd.f32 %v6871_v37, %v1569_v31  ;;  %v2423_v63 = vrot.slane %v2409_v33, 2  ;;  %v3041_v18 = vrot.slane %v3026_v16, 4  ;;  %v6872_v31 = vld [vmem:[#allocation134_spill] sm:$0xff] }
 0x2b3   :  { %2937 = vrot.lane.b32.xlu1 %v5860_v39, %s4033_s9  ;;  %3003 = vrot.lane.b32.xlu0 %v2995_v62, %s4028_s25  ;;  %v2420_v62 = vrot.slane %v2407_v6, 2  ;;  %v1651_v51 = vadd.f32 %v5158_v45, %v1611_v47  ;;  %v1688_v25 = vadd.f32 %v5160_v58, %v1648_v15  ;;  %v3073_v0 = vrot.slane %v3061_v10, 4  ;;  %v6875_v37 = vld [vmem:[#allocation14_spill] sm:$0xff] }
 0x2b4   :  { %v3064_v6 = vmul.f32 %v5522_v55, %v3060_v29  ;;  %v3065_v21 = vmul.f32 %v5531_v35, %v3060_v29  ;;  %v1649_v9 = vadd.f32 %v5134_v38, %v1609_v26  ;;  %v1723_v45 = vadd.f32 %v5471_v40, %v1690_v28  ;;  %v6874_v28 = vld [vmem:[#allocation124_spill] sm:$0xff] }
 0x2b5   :  { %v5967_v42 = vpop.permute.xlu1 %2313  ;;  %v5969_v39 = vpop.permute.xlu0 %2347  ;;  %v1691_v58 = vadd.f32 %v5202_v36, %v1651_v51  ;;  %v3074_v33 = vrot.slane %v3062_v20, 4  ;;  %v2425_v22 = vrot.slane %v2410_v1, 2  ;;  %v3076_v16 = vrot.slane %v3063_v56, 4  ;;  %v6876_v51 = vld [vmem:[#allocation120_spill] sm:$0xff] }
 0x2b6   :  { %v3066_v10 = vmul.f32 %v5669_v13, %v3060_v29  ;;  %v1721_v14 = vadd.f32 %v5406_v57, %v1688_v25  ;;  %v1689_v38 = vadd.f32 %v5179_v7, %v1649_v9  ;;  %v1763_v40 = vadd.f32 %v6872_v31, %v1723_v45  ;;  %v6873_v7 = vld [vmem:[#allocation133_spill] sm:$0xff] }
 0x2b7   :  { %3005 = vrot.lane.b32.xlu1 %v2997_v5, %s4028_s25  ;;  %3007 = vrot.lane.b32.xlu0 %v3000_v17, %s4028_s25  ;;  %v5991_v17 = vsel %vm614_vm4, %v2418_v61, %v2420_v62  ;;  %v3100_v47 = vstv %s5954_s20  ;;  %v6002_v36 = vsel %vm614_vm4, %v2422_v30, %v2423_v63  ;;  %v3042_v61 = vsel %vm1160_vm6, %v3039_v34, %v3041_v18  ;;  %v6877_v18 = vld [vmem:[#allocation17_spill] sm:$0xff] }
 0x2b8   :  { %v3078_v29 = vrot.slane %v3064_v6, 4  ;;  %v3079_v20 = vrot.slane %v3065_v21, 4  ;;  %v1724_v57 = vadd.f32 %v5494_v8, %v1691_v58  ;;  %v1761_v15 = vadd.f32 %v6873_v7, %v1721_v14  ;;  %v6879_v58 = vld [vmem:[#allocation125_spill] sm:$0xff]  ;;  %v6882_v7 = vld [vmem:[#allocation18_spill] sm:$0xff] }
 0x2b9   :  { %v5986_v27 = vpop.permute.xlu1 %2349  ;;  %v5988_v5 = vpop.permute.xlu0 %2351  ;;  %v1803_v62 = vadd.f32 %v6874_v28, %v1763_v40  ;;  %v3075_v1 = vsel %vm1160_vm6, %v3073_v0, %v3074_v33  ;;  %v6016_v30 = vsel %vm614_vm4, %v2423_v63, %v2425_v22  ;;  %v3077_v60 = vsel %vm1160_vm6, %v3074_v33, %v3076_v16  ;;  %v6880_v22 = vld [vmem:[#allocation15_spill] sm:$0xff] }
 0x2ba   :  { %v3081_v34 = vrot.slane %v3066_v10, 4  ;;  %v3101_v56 = vmul.f32 %v5500_v50, %v3100_v47  ;;  %v1722_v8 = vadd.f32 %v5446_v41, %v1689_v38  ;;  %v1764_v26 = vadd.f32 %v6875_v37, %v1724_v57  ;;  %v6878_v41 = vld [vmem:[#allocation13_spill] sm:$0xff]  ;;  %v6883_v28 = vld [vmem:[#allocation19_spill] sm:$0xff]  ;;  %v6884_v37 = vld [vmem:[#allocation16_spill] sm:$0xff] }
 0x2bb   :  { %3009 = vrot.lane.b32.xlu1 %v5908_v24, %s4028_s25  ;;  %3043 = vrot.lane.b32.xlu0 %v3035_v43, %s4029_s27  ;;  %v1801_v25 = vadd.f32 %v6876_v51, %v1761_v15  ;;  %v1843_v0 = vadd.f32 %v6877_v18, %v1803_v62  ;;  %v3080_v63 = vsel %vm1160_vm6, %v3078_v29, %v3079_v20  ;;  %v3140_v9 = vstv %s5981_s21  ;;  %v6881_v29 = vld [vmem:[#allocation121_spill] sm:$0xff]  ;;  %v6886_v18 = vld [vmem:[#allocation22_spill] sm:$0xff] }
 0x2bc   :  { %v3102_v6 = vmul.f32 %v5506_v46, %v3100_v47  ;;  %v3103_v21 = vmul.f32 %v5639_v48, %v3100_v47  ;;  %v1762_v45 = vadd.f32 %v6878_v41, %v1722_v8  ;;  %v1804_v33 = vadd.f32 %v6879_v58, %v1764_v26  ;;  %v6885_v51 = vld [vmem:[#allocation21_spill] sm:$0xff]  ;;  %v6887_v41 = vld [vmem:[#allocation27_spill] sm:$0xff] }
 0x2bd   :  { %v6011_v24 = vpop.permute.xlu1 %2353  ;;  %v6013_v43 = vpop.permute.xlu0 %2387  ;;  %v1841_v16 = vadd.f32 %v6880_v22, %v1801_v25  ;;  %v1883_v10 = vadd.f32 %v5365_v23, %v1843_v0  ;;  %v3113_v38 = vrot.slane %v3101_v56, 4  ;;  %v3104_v31 = vmul.f32 %v5522_v55, %v3100_v47 }
 0x2be   :  { %v3105_v40 = vmul.f32 %v5531_v35, %v3100_v47  ;;  %v1802_v57 = vadd.f32 %v6881_v29, %v1762_v45  ;;  %v1844_v15 = vadd.f32 %v6882_v7, %v1804_v33  ;;  %v3141_v56 = vmul.f32 %v5500_v50, %v3140_v9  ;;  %v6888_v50 = vld [vmem:[#allocation20_spill] sm:$0xff] }
 0x2bf   :  { %3045 = vrot.lane.b32.xlu1 %v5941_v59, %s4029_s27  ;;  %3047 = vrot.lane.b32.xlu0 %v5946_v53, %s4029_s27  ;;  %v3082_v53 = vsel %vm1160_vm6, %v3079_v20, %v3081_v34  ;;  %v1881_v62 = vadd.f32 %v6883_v28, %v1841_v16  ;;  %v1923_v23 = vadd.f32 %v5411_v19, %v1883_v10  ;;  %v3114_v20 = vrot.slane %v3102_v6, 4  ;;  %v6889_v33 = vld [vmem:[#allocation24_spill] sm:$0xff]  ;;  %v6890_v16 = vld [vmem:[#allocation25_spill] sm:$0xff] }
 0x2c0   :  { %v3106_v34 = vmul.f32 %v5669_v13, %v3100_v47  ;;  %v3142_v8 = vmul.f32 %v5506_v46, %v3140_v9  ;;  %v1842_v26 = vadd.f32 %v6884_v37, %v1802_v57  ;;  %v1884_v25 = vadd.f32 %v6885_v51, %v1844_v15  ;;  %v6891_v15 = vld [vmem:[#allocation23_spill] sm:$0xff]  ;;  %v6893_v37 = vld [vmem:[#allocation28_spill] sm:$0xff] }
 0x2c1   :  { %v6038_v14 = vpop.permute.xlu1 %2389  ;;  %v6040_v59 = vpop.permute.xlu0 %2391  ;;  %v1921_v0 = vadd.f32 %v6886_v18, %v1881_v62  ;;  %v1963_v19 = vadd.f32 %v6887_v41, %v1923_v23  ;;  %v3118_v6 = vrot.slane %v3104_v31, 4  ;;  %v3143_v47 = vmul.f32 %v5639_v48, %v3140_v9  ;;  %v6892_v62 = vld [vmem:[#allocation35_spill] sm:$0xff]  ;;  %v6895_v18 = vld [vmem:[#allocation26_spill] sm:$0xff]  ;;  %v6896_v41 = vld [vmem:[#allocation33_spill] sm:$0xff] }
 0x2c2   :  { %v6066_v58 = vstv %s6020_s22  ;;  %v1882_v46 = vadd.f32 %v6888_v50, %v1842_v26  ;;  %v1924_v22 = vadd.f32 %v6889_v33, %v1884_v25  ;;  %v3119_v29 = vrot.slane %v3105_v40, 4 }
 0x2c3   :  { %3049 = vrot.lane.b32.xlu1 %v3042_v61, %s4029_s27  ;;  %3083 = vrot.lane.b32.xlu0 %v3075_v1, %s4030_s29  ;;  %v3116_v1 = vrot.slane %v3103_v21, 4  ;;  %v1961_v10 = vadd.f32 %v6890_v16, %v1921_v0  ;;  %v3121_v57 = vrot.slane %v3106_v34, 4  ;;  %v3153_v7 = vrot.slane %v3141_v56, 4 }
 0x2c4   :  { %v3144_v21 = vmul.f32 %v5522_v55, %v3140_v9  ;;  %v3145_v31 = vmul.f32 %v5531_v35, %v3140_v9  ;;  %v1922_v28 = vadd.f32 %v6891_v15, %v1882_v46  ;;  %v1973_v23 = vadd.f32 %v6892_v62, %v1963_v19  ;;  %v6894_v55 = vld [vmem:[#allocation30_spill] sm:$0xff]  ;;  %v6897_v46 = vld [vmem:[#allocation36_spill] sm:$0xff] }
 0x2c5   :  { %v6060_v45 = vpop.permute.xlu1 %2393  ;;  %v6062_v61 = vpop.permute.xlu0 %2459  ;;  %v1964_v26 = vadd.f32 %v6893_v37, %v1924_v22  ;;  %v3154_v51 = vrot.slane %v3142_v8, 4  ;;  %v3146_v34 = vmul.f32 %v5669_v13, %v3140_v9  ;;  %v6085_v56 = vstv %s6045_s1  ;;  %v6898_v22 = vld [vmem:[#allocation29_spill] sm:$0xff] }
 0x2c6   :  { %v1971_v35 = vadd.f32 %v6894_v55, %v1961_v10  ;;  %v1962_v0 = vadd.f32 %v6895_v18, %v1922_v28  ;;  %v1999_v19 = vadd.f32 %v6896_v41, %v1973_v23  ;;  %v3117_v50 = vsel %vm1160_vm6, %v3114_v20, %v3116_v1  ;;  %v6899_v10 = vld [vmem:[#allocation127_spill] sm:$0xff]  ;;  %v6901_v23 = vld [vmem:[#allocation34_spill] sm:$0xff] }
 0x2c7   :  { %3085 = vrot.lane.b32.xlu1 %v3077_v60, %s4030_s29  ;;  %3087 = vrot.lane.b32.xlu0 %v3080_v63, %s4030_s29  ;;  %v3115_v60 = vsel %vm1160_vm6, %v3113_v38, %v3114_v20  ;;  %v3156_v63 = vrot.slane %v3143_v47, 4  ;;  %v3120_v8 = vsel %vm1160_vm6, %v3118_v6, %v3119_v29  ;;  %v3122_v38 = vsel %vm1160_vm6, %v3119_v29, %v3121_v57  ;;  %v6104_v6 = vld [vmem:[#allocation2 + $0x30] sm:$0xff]  ;;  %v6110_v57 = vld [vmem:[#allocation2 + $0x38] sm:$0xff] }
 0x2c8   :  { %v3158_v47 = vrot.slane %v3144_v21, 4  ;;  %v3159_v9 = vrot.slane %v3145_v31, 4  ;;  %v1974_v33 = vadd.f32 %v6897_v46, %v1964_v26  ;;  %v1997_v16 = vadd.f32 %v6898_v22, %v1971_v35  ;;  %v6902_v26 = vld [vmem:[#allocation37_spill] sm:$0xff]  ;;  %v6125_v35 = vld [vmem:[#allocation2 + $0x48] sm:$0xff] }
 0x2c9   :  { %v6078_v25 = vpop.permute.xlu1 %2461  ;;  %v6080_v40 = vpop.permute.xlu0 %2463  ;;  %v2025_v15 = vadd.f32 %v6899_v10, %v1999_v19  ;;  %v3155_v28 = vsel %vm1160_vm6, %v3153_v7, %v3154_v51  ;;  %v3161_v1 = vrot.slane %v3146_v34, 4  ;;  %v6108_v29 = vmul.f32 %v6104_v6, %v6066_v58  ;;  %v6900_v7 = vld [vmem:[#allocation31_spill] sm:$0xff]  ;;  %v6905_v19 = vld [vmem:[#allocation38_spill] sm:$0xff] }
 0x2ca   :  { %v6114_v21 = vmul.f32 %v6110_v57, %v6066_v58  ;;  %v1972_v31 = vadd.f32 %v6900_v7, %v1962_v0  ;;  %v2000_v37 = vadd.f32 %v6901_v23, %v1974_v33  ;;  %v3160_v34 = vsel %vm1160_vm6, %v3158_v47, %v3159_v9  ;;  %v6904_v0 = vld [vmem:[#allocation32_spill] sm:$0xff] }
 0x2cb   :  { %3089 = vrot.lane.b32.xlu1 %v3082_v53, %s4030_s29  ;;  %3123 = vrot.lane.b32.xlu0 %v3115_v60, %s4031_s4  ;;  %v3157_v53 = vsel %vm1160_vm6, %v3154_v51, %v3156_v63  ;;  %v2023_v60 = vadd.f32 %v6902_v26, %v1997_v16  ;;  %v6903_v51 = vld [vmem:[#allocation40_spill] sm:$0xff]  ;;  %v3183_v55 = vmul.f32 %v5639_v48, %v6066_v58 }
 0x2cc   :  { %v2051_v63 = vadd.f32 %v6903_v51, %v2025_v15  ;;  %v3184_v18 = vmul.f32 %v6125_v35, %v6066_v58  ;;  %v1998_v41 = vadd.f32 %v6904_v0, %v1972_v31  ;;  %v2026_v46 = vadd.f32 %v6905_v19, %v2000_v37  ;;  %v6906_v33 = vld [vmem:[#allocation128_spill] sm:$0xff]  ;;  %v6140_v15 = vld [vmem:[#allocation2 + $0x50] sm:$0xff]  ;;  %v6909_v37 = vld [vmem:[#allocation126_spill] sm:$0xff] }
 0x2cd   :  { %v6099_v62 = vpop.permute.xlu1 %2465  ;;  %v6101_v20 = vpop.permute.xlu0 %2499  ;;  %v2049_v22 = vadd.f32 %v6906_v33, %v2023_v60  ;;  %v6907_v16 = vld [vmem:[#allocation44_spill] sm:$0xff]  ;;  %v3162_v10 = vsel %vm1160_vm6, %v3159_v9, %v3161_v1  ;;  %v3185_v7 = vmul.f32 %v6140_v15, %v6066_v58  ;;  %v3186_v31 = vmul.f32 %v5669_v13, %v6066_v58  ;;  %v6910_v60 = vld [vmem:[#allocation41_spill] sm:$0xff] }
 0x2ce   :  { %v3253_v23 = vmul.f32 %v6104_v6, %v6085_v56  ;;  %v2024_v26 = vadd.f32 %v6909_v37, %v1998_v41  ;;  %v2052_v51 = vadd.f32 %v6910_v60, %v2026_v46  ;;  %v3193_v9 = vrot.slane %v6108_v29, 4  ;;  %v6913_v37 = vld [vmem:[#allocation46_spill] sm:$0xff]  ;;  %v6914_v60 = vld [vmem:[#allocation47_spill] sm:$0xff] }
 0x2cf   :  { %3125 = vrot.lane.b32.xlu1 %v3117_v50, %s4031_s4  ;;  %3127 = vrot.lane.b32.xlu0 %v3120_v8, %s4031_s4  ;;  %v2077_v50 = vadd.f32 %v6907_v16, %v2051_v63  ;;  %v6911_v63 = vld [vmem:[#allocation42_spill] sm:$0xff]  ;;  %v3194_v1 = vrot.slane %v6114_v21, 4  ;;  %v3196_v58 = vrot.slane %v3183_v55, 4  ;;  %v3254_v33 = vmul.f32 %v6110_v57, %v6085_v56  ;;  %v6912_v16 = vld [vmem:[#allocation39_spill] sm:$0xff] }
 0x2d0   :  { %v2075_v0 = vadd.f32 %v6911_v63, %v2049_v22  ;;  %v2050_v41 = vadd.f32 %v6912_v16, %v2024_v26  ;;  %v2078_v46 = vadd.f32 %v6913_v37, %v2052_v51  ;;  %v6915_v63 = vld [vmem:[#allocation55_spill] sm:$0xff]  ;;  %v3199_v29 = vrot.slane %v3185_v7, 4  ;;  %v6919_v51 = vld [vmem:[#allocation52_spill] sm:$0xff] }
 0x2d1   :  { %v6135_v8 = vpop.permute.xlu1 %2501  ;;  %v6137_v47 = vpop.permute.xlu0 %2503  ;;  %v2103_v19 = vadd.f32 %v5701_v12, %v2077_v50  ;;  %v3255_v21 = vmul.f32 %v5639_v48, %v6085_v56  ;;  %v6918_v55 = vld [vmem:[#allocation43_spill] sm:$0xff]  ;;  %v3256_v7 = vmul.f32 %v6125_v35, %v6085_v56 }
 0x2d2   :  { %6908 = vst [vmem:[#allocation64_spill] sm:$0xff] %v6135_v8  ;;  %v2101_v22 = vadd.f32 %v6914_v60, %v2075_v0  ;;  %v3201_v8 = vrot.slane %v3186_v31, 4  ;;  %v2076_v26 = vadd.f32 %v6918_v55, %v2050_v41  ;;  %v2104_v16 = vadd.f32 %v6919_v51, %v2078_v46  ;;  %v6920_v0 = vld [vmem:[#allocation53_spill] sm:$0xff]  ;;  %v6922_v46 = vld [vmem:[#allocation50_spill] sm:$0xff] }
 0x2d3   :  { %3129 = vrot.lane.b32.xlu1 %v3122_v38, %s4031_s4  ;;  %3163 = vrot.lane.b32.xlu0 %v3155_v28, %s4032_s7  ;;  %v2129_v12 = vadd.f32 %v6915_v63, %v2103_v19  ;;  %v3198_v28 = vrot.slane %v3184_v18, 4  ;;  %v3265_v19 = vrot.slane %v3253_v23, 5  ;;  %v3266_v18 = vrot.slane %v3254_v33, 5  ;;  %v6921_v41 = vld [vmem:[#allocation49_spill] sm:$0xff] }
 0x2d4   :  { %v2127_v37 = vadd.f32 %v6920_v0, %v2101_v22  ;;  %v3257_v31 = vmul.f32 %v6140_v15, %v6085_v56  ;;  %v3258_v60 = vmul.f32 %v5669_v13, %v6085_v56  ;;  %v2102_v63 = vadd.f32 %v6921_v41, %v2076_v26  ;;  %v6923_v22 = vld [vmem:[#allocation59_spill] sm:$0xff]  ;;  %v6924_v56 = vld [vmem:[#allocation45_spill] sm:$0xff]  ;;  %v6925_v41 = vld [vmem:[#allocation54_spill] sm:$0xff] }
 0x2d5   :  { %v6162_v50 = vpop.permute.xlu1 %2505  ;;  %v6164_v38 = vpop.permute.xlu0 %2539  ;;  %v2161_v55 = vadd.f32 %v6922_v46, %v2129_v12  ;;  %v2130_v23 = vadd.f32 %v6923_v22, %v2104_v16  ;;  %v3292_v51 = vstv %s6133_s0  ;;  %v3195_v33 = vsel %vm1160_vm6, %v3193_v9, %v3194_v1 }
 0x2d6   :  { %6916 = vst [vmem:[#allocation65_spill] sm:$0xff] %v6162_v50  ;;  %6917 = vst [vmem:[#allocation66_spill] sm:$0xff] %v6164_v38  ;;  %v3197_v0 = vsel %vm1160_vm6, %v3194_v1, %v3196_v58  ;;  %v3200_v38 = vsel %vm1160_vm6, %v3198_v28, %v3199_v29  ;;  %v3268_v50 = vrot.slane %v3255_v21, 5  ;;  %v2159_v26 = vadd.f32 %v6924_v56, %v2127_v37  ;;  %v6926_v21 = vld [vmem:[#allocation51_spill] sm:$0xff]  ;;  %v6927_v37 = vld [vmem:[#allocation56_spill] sm:$0xff] }
 0x2d7   :  { %3165 = vrot.lane.b32.xlu1 %v3157_v53, %s4032_s7  ;;  %3167 = vrot.lane.b32.xlu0 %v3160_v34, %s4032_s7  ;;  %v2128_v12 = vadd.f32 %v6925_v41, %v2102_v63  ;;  %v2201_v16 = vadd.f32 %v5787_v3, %v2161_v55  ;;  %v3202_v46 = vsel %vm1160_vm6, %v3199_v29, %v3201_v8  ;;  %v3270_v9 = vrot.slane %v3256_v7, 5  ;;  %v6928_v55 = vld [vmem:[#allocation48_spill] sm:$0xff] }
 0x2d8   :  { %v3271_v1 = vrot.slane %v3257_v31, 5  ;;  %v3273_v58 = vrot.slane %v3258_v60, 5  ;;  %v6201_v28 = vmul.f32 %v6104_v6, %v3292_v51  ;;  %v2162_v22 = vadd.f32 %v6926_v21, %v2130_v23 }
 0x2d9   :  { %v6185_v53 = vpop.permute.xlu1 %2541  ;;  %v6187_v34 = vpop.permute.xlu0 %2543  ;;  %v2199_v56 = vadd.f32 %v6927_v37, %v2159_v26  ;;  %v2241_v63 = vadd.f32 %v5838_v52, %v2201_v16  ;;  %v3267_v3 = vsel %vm1433_vm7, %v3265_v19, %v3266_v18  ;;  %v6213_v7 = vmul.f32 %v6110_v57, %v3292_v51  ;;  %v6930_v52 = vld [vmem:[#allocation60_spill] sm:$0xff]  ;;  %v6932_v37 = vld [vmem:[#allocation62_spill] sm:$0xff] }
 0x2da   :  { %v3295_v31 = vmul.f32 %v5639_v48, %v3292_v51  ;;  %v6217_v60 = vstv %s6168_s23  ;;  %v2160_v23 = vadd.f32 %v6928_v55, %v2128_v12  ;;  %v3305_v48 = vrot.slane %v6201_v28, 5  ;;  %v6931_v12 = vld [vmem:[#allocation57_spill] sm:$0xff] }
 0x2db   :  { %3169 = vrot.lane.b32.xlu1 %v3162_v10, %s4032_s7  ;;  %3203 = vrot.lane.b32.xlu0 %v3195_v33, %s4033_s9  ;;  %v3269_v10 = vsel %vm1433_vm7, %v3266_v18, %v3268_v50  ;;  %v6929_v33 = vld [vmem:[#allocation58_spill] sm:$0xff]  ;;  %v2239_v41 = vadd.f32 %v6930_v52, %v2199_v56  ;;  %v2281_v19 = vadd.f32 %v5881_v2, %v2241_v63  ;;  %v6933_v28 = vld [vmem:[#allocation61_spill] sm:$0xff] }
 0x2dc   :  { %v2202_v26 = vadd.f32 %v6929_v33, %v2162_v22  ;;  %v3272_v50 = vsel %vm1433_vm7, %v3270_v9, %v3271_v1  ;;  %v3274_v18 = vsel %vm1433_vm7, %v3271_v1, %v3273_v58  ;;  %v3296_v16 = vmul.f32 %v6125_v35, %v3292_v51 }
 0x2dd   :  { %v6207_v8 = vpop.permute.xlu1 %2545  ;;  %v6209_v29 = vpop.permute.xlu0 %2579  ;;  %v2200_v21 = vadd.f32 %v6931_v12, %v2160_v23  ;;  %v2279_v56 = vadd.f32 %v6932_v37, %v2239_v41  ;;  %v2321_v2 = vadd.f32 %v5935_v11, %v2281_v19  ;;  %v3297_v9 = vmul.f32 %v6140_v15, %v3292_v51 }
 0x2de   :  { %v2242_v22 = vadd.f32 %v5854_v32, %v2202_v26  ;;  %v3298_v1 = vmul.f32 %v5669_v13, %v3292_v51  ;;  %v6241_v58 = vstv %s6192_s24  ;;  %v3308_v33 = vrot.slane %v3295_v31, 5  ;;  %v6934_v51 = vld [vmem:[#allocation63_spill] sm:$0xff] }
 0x2df   :  { %3205 = vrot.lane.b32.xlu1 %v3197_v0, %s4033_s9  ;;  %3207 = vrot.lane.b32.xlu0 %v3200_v38, %s4033_s9  ;;  %v3306_v38 = vrot.slane %v6213_v7, 5  ;;  %v2240_v55 = vadd.f32 %v6933_v28, %v2200_v21  ;;  %v2319_v23 = vadd.f32 %v5912_v54, %v2279_v56  ;;  %v2361_v11 = vadd.f32 %v5988_v5, %v2321_v2 }
 0x2e0   :  { %v2282_v32 = vadd.f32 %v5910_v49, %v2242_v22  ;;  %v3310_v7 = vrot.slane %v3296_v16, 5  ;;  %v3333_v26 = vmul.f32 %v6104_v6, %v6217_v60  ;;  %v3334_v13 = vmul.f32 %v6110_v57, %v6217_v60  ;;  %v6267_v16 = vld [vmem:[#allocation2 + $0x40] sm:$0x3f] }
 0x2e1   :  { %v6233_v63 = vpop.permute.xlu1 %2581  ;;  %v6235_v0 = vpop.permute.xlu0 %2583  ;;  %v2280_v52 = vadd.f32 %v6934_v51, %v2240_v55  ;;  %v2359_v54 = vadd.f32 %v5969_v39, %v2319_v23  ;;  %v2401_v5 = vadd.f32 %v6040_v59, %v2361_v11  ;;  %v2677_v31 = vmul.f32 %v6104_v6, %v6241_v58 }
 0x2e2   :  { %v2322_v49 = vadd.f32 %v5967_v42, %v2282_v32  ;;  %v6265_v19 = vmul.f32 %v6110_v57, %v6241_v58  ;;  %v3335_v42 = vmul.f32 %v6267_v16, %v6217_v60  ;;  %v3313_v21 = vrot.slane %v3298_v1, 5 }
 0x2e3   :  { %3209 = vrot.lane.b32.xlu1 %v3202_v46, %s4033_s9  ;;  %3275 = vrot.lane.b32.xlu0 %v3267_v3, %s4028_s25  ;;  %v3311_v3 = vrot.slane %v3297_v9, 5  ;;  %v2320_v39 = vadd.f32 %v5933_v44, %v2280_v52  ;;  %v2399_v12 = vadd.f32 %v6013_v43, %v2359_v54  ;;  %v3345_v22 = vrot.slane %v3333_v26, 5 }
 0x2e4   :  { %v2362_v59 = vadd.f32 %v6011_v24, %v2322_v49  ;;  %v3346_v37 = vrot.slane %v3334_v13, 5  ;;  %v3336_v56 = vmul.f32 %v6125_v35, %v6217_v60  ;;  %v6282_v2 = vmul.f32 %v6140_v15, %v6217_v60 }
 0x2e5   :  { %v6257_v41 = vpop.permute.xlu1 %2585  ;;  %v6259_v46 = vpop.permute.xlu0 %2619  ;;  %v2360_v44 = vadd.f32 %v5986_v27, %v2320_v39  ;;  %v2433_v24 = vadd.f32 %v6002_v36, %v2401_v5  ;;  %v3307_v9 = vsel %vm1433_vm7, %v3305_v48, %v3306_v38  ;;  %v3309_v1 = vsel %vm1433_vm7, %v3306_v38, %v3308_v33 }
 0x2e6   :  { %v2402_v43 = vadd.f32 %v6060_v45, %v2362_v59  ;;  %v2689_v28 = vrot.slane %v2677_v31, 3  ;;  %v2690_v55 = vrot.slane %v6265_v19, 3  ;;  %v3348_v32 = vrot.slane %v3335_v42, 5  ;;  %v6330_v31 = vld [vmem:[#allocation2 + $0x58] sm:$0x3f] }
 0x2e7   :  { %3277 = vrot.lane.b32.xlu1 %v3269_v10, %s4028_s25  ;;  %3279 = vrot.lane.b32.xlu0 %v3272_v50, %s4028_s25  ;;  %v2431_v23 = vadd.f32 %v5938_v4, %v2399_v12  ;;  %v2400_v11 = vadd.f32 %v6038_v14, %v2360_v44  ;;  %v2473_v27 = vadd.f32 %v6080_v40, %v2433_v24  ;;  %v3350_v38 = vrot.slane %v3336_v56, 5  ;;  %v6937_v44 = vld [vmem:[#allocation64_spill] sm:$0xff] }
 0x2e8   :  { %v3312_v36 = vsel %vm1433_vm7, %v3310_v7, %v3311_v3  ;;  %v3314_v45 = vsel %vm1433_vm7, %v3311_v3, %v3313_v21  ;;  %v3347_v48 = vsel %vm1433_vm7, %v3345_v22, %v3346_v37  ;;  %v3351_v33 = vrot.slane %v6282_v2, 5 }
 0x2e9   :  { %v6288_v10 = vpop.permute.xlu1 %2621  ;;  %v2624_v50 = vpop.permute.xlu0 %2623  ;;  %v2434_v4 = vadd.f32 %v6016_v30, %v2402_v43  ;;  %v2471_v14 = vadd.f32 %v6062_v61, %v2431_v23  ;;  %v2513_v40 = vadd.f32 %v6137_v47, %v2473_v27  ;;  %v6306_v7 = vmul.f32 %v6267_v16, %v6241_v58 }
 0x2ea   :  { %v6311_v13 = vsel %vm887_vm5, %v2689_v28, %v2690_v55  ;;  %v3349_v51 = vsel %vm1433_vm7, %v3346_v37, %v3348_v32  ;;  %v2680_v30 = vmul.f32 %v6125_v35, %v6241_v58  ;;  %v3372_v52 = vstv %s6271_s26 }
 0x2eb   :  { %3281 = vrot.lane.b32.xlu1 %v3274_v18, %s4028_s25  ;;  %3315 = vrot.lane.b32.xlu0 %v3307_v9, %s4029_s27  ;;  %v2432_v61 = vadd.f32 %v5991_v17, %v2400_v11  ;;  %v2474_v47 = vadd.f32 %v6099_v62, %v2434_v4  ;;  %v2511_v49 = vadd.f32 %v6101_v20, %v2471_v14  ;;  %v6935_v20 = vld [vmem:[#allocation65_spill] sm:$0xff]  ;;  %v2692_v22 = vrot.slane %v6306_v7, 3 }
 0x2ec   :  { %v2553_v54 = vadd.f32 %v6187_v34, %v2513_v40  ;;  %v3352_v5 = vsel %vm1433_vm7, %v3350_v38, %v3351_v33  ;;  %v6328_v3 = vmul.f32 %v6140_v15, %v6241_v58  ;;  %v3338_v17 = vmul.f32 %v6330_v31, %v6217_v60  ;;  %v6936_v34 = vld [vmem:[#allocation66_spill] sm:$0xff] }
 0x2ed   :  { %v2626_v18 = vpop.permute.xlu1 %2625  ;;  %v2660_v26 = vpop.permute.xlu0 %2659  ;;  %v2472_v62 = vadd.f32 %v6078_v25, %v2432_v61  ;;  %v2514_v42 = vadd.f32 %v6935_v20, %v2474_v47  ;;  %v2551_v39 = vadd.f32 %v6936_v34, %v2511_v49  ;;  %v2694_v37 = vrot.slane %v2680_v30, 3 }
 0x2ee   :  { %v2593_v59 = vadd.f32 %v6235_v0, %v2553_v54  ;;  %v3373_v56 = vmul.f32 %v6104_v6, %v3372_v52  ;;  %v3374_v2 = vmul.f32 %v6110_v57, %v3372_v52  ;;  %v2695_v0 = vrot.slane %v6328_v3, 3 }
 0x2ef   :  { %3317 = vrot.lane.b32.xlu1 %v3309_v1, %s4029_s27  ;;  %3319 = vrot.lane.b32.xlu0 %v3312_v36, %s4029_s27  ;;  %v2512_v24 = vadd.f32 %v6937_v44, %v2472_v62  ;;  %v2554_v60 = vadd.f32 %v6207_v8, %v2514_v42  ;;  %v2591_v25 = vadd.f32 %v6209_v29, %v2551_v39  ;;  %v3353_v9 = vrot.slane %v3338_v17, 5 }
 0x2f0   :  { %v2633_v43 = vadd.f32 %v2624_v50, %v2593_v59  ;;  %v2682_v1 = vmul.f32 %v6330_v31, %v6241_v58  ;;  %v3375_v28 = vmul.f32 %v6267_v16, %v3372_v52  ;;  %v3385_v27 = vrot.slane %v3373_v56, 5 }
 0x2f1   :  { %v2662_v12 = vpop.permute.xlu1 %2661  ;;  %v2664_v21 = vpop.permute.xlu0 %2663  ;;  %v2552_v32 = vadd.f32 %v6185_v53, %v2512_v24  ;;  %v2594_v8 = vadd.f32 %v6257_v41, %v2554_v60  ;;  %v2631_v29 = vadd.f32 %v6259_v46, %v2591_v25  ;;  %v3386_v36 = vrot.slane %v3374_v2, 5 }
 0x2f2   :  { %v2673_v50 = vadd.f32 %v2664_v21, %v2633_v43  ;;  %v3377_v14 = vmul.f32 %v6140_v15, %v3372_v52  ;;  %v2696_v53 = vsel %vm887_vm5, %v2694_v37, %v2695_v0  ;;  %v3354_v41 = vsel %vm1433_vm7, %v3351_v33, %v3353_v9 }
 0x2f3   :  { %3321 = vrot.lane.b32.xlu1 %v3314_v45, %s4029_s27  ;;  %3355 = vrot.lane.b32.xlu0 %v3347_v48, %s4030_s29  ;;  %v3376_v45 = vmul.f32 %v6125_v35, %v3372_v52  ;;  %v3412_v48 = vstv %s6317_s28  ;;  %v2592_v38 = vadd.f32 %v6233_v63, %v2552_v32  ;;  %v2634_v4 = vadd.f32 %v2626_v18, %v2594_v8 }
 0x2f4   :  { %v2671_v58 = vadd.f32 %v2660_v26, %v2631_v29  ;;  %v2697_v46 = vrot.slane %v2682_v1, 3  ;;  %v3388_v40 = vrot.slane %v3375_v28, 5  ;;  %v2705_v63 = vadd.f32 %v2696_v53, %v2673_v50 }
 0x2f5   :  { %v2666_v23 = vpop.permute.xlu1 %2665  ;;  %v2732_v11 = vpop.permute.xlu0 %2731  ;;  %v2632_v7 = vadd.f32 %v6288_v10, %v2592_v38  ;;  %v3378_v18 = vmul.f32 %v6330_v31, %v3372_v52  ;;  %v3390_v47 = vrot.slane %v3376_v45, 5  ;;  %v3413_v49 = vmul.f32 %v6104_v6, %v3412_v48 }
 0x2f6   :  { %v2674_v30 = vadd.f32 %v2666_v23, %v2634_v4  ;;  %v3414_v54 = vmul.f32 %v6110_v57, %v3412_v48  ;;  %v3391_v17 = vrot.slane %v3377_v14, 5  ;;  %v2693_v10 = vsel %vm887_vm5, %v2690_v55, %v2692_v22 }
 0x2f7   :  { %3357 = vrot.lane.b32.xlu1 %v3349_v51, %s4030_s29  ;;  %3359 = vrot.lane.b32.xlu0 %v3352_v5, %s4030_s29  ;;  %v3387_v51 = vsel %vm1433_vm7, %v3385_v27, %v3386_v36  ;;  %v2672_v33 = vadd.f32 %v2662_v12, %v2632_v7  ;;  %v2703_v5 = vadd.f32 %v6311_v13, %v2671_v58  ;;  %v3393_v34 = vrot.slane %v3378_v18, 5 }
 0x2f8   :  { %v2698_v52 = vsel %vm887_vm5, %v2695_v0, %v2697_v46  ;;  %v3389_v62 = vsel %vm1433_vm7, %v3386_v36, %v3388_v40  ;;  %v3415_v13 = vmul.f32 %v6267_v16, %v3412_v48  ;;  %v3425_v12 = vrot.slane %v3413_v49, 5 }
 0x2f9   :  { %v2734_v26 = vpop.permute.xlu1 %2733  ;;  %v2736_v61 = vpop.permute.xlu0 %2735  ;;  %v2743_v20 = vadd.f32 %v2732_v11, %v2703_v5  ;;  %v2706_v42 = vadd.f32 %v2698_v52, %v2674_v30  ;;  %v3426_v19 = vrot.slane %v3414_v54, 5  ;;  %v3416_v55 = vmul.f32 %v6125_v35, %v3412_v48 }
 0x2fa   :  { %v2745_v3 = vadd.f32 %v2736_v61, %v2705_v63  ;;  %v3417_v21 = vmul.f32 %v6140_v15, %v3412_v48  ;;  %v2704_v22 = vadd.f32 %v2693_v10, %v2672_v33  ;;  %v3392_v2 = vsel %vm1433_vm7, %v3390_v47, %v3391_v17 }
 0x2fb   :  { %3361 = vrot.lane.b32.xlu1 %v3354_v41, %s4030_s29  ;;  %3395 = vrot.lane.b32.xlu0 %v3387_v51, %s4031_s4  ;;  %v3452_v44 = vstv %s6361_s30  ;;  %v3428_v60 = vrot.slane %v3415_v13, 5  ;;  %v3418_v25 = vmul.f32 %v6330_v31, %v3412_v48  ;;  %v3394_v9 = vsel %vm1433_vm7, %v3391_v17, %v3393_v34 }
 0x2fc   :  { %v2744_v24 = vadd.f32 %v2734_v26, %v2704_v22  ;;  %v3427_v1 = vsel %vm1433_vm7, %v3425_v12, %v3426_v19  ;;  %v3430_v28 = vrot.slane %v3416_v55, 5  ;;  %v3431_v32 = vrot.slane %v3417_v21, 5 }
 0x2fd   :  { %v2738_v39 = vpop.permute.xlu1 %2737  ;;  %v2772_v59 = vpop.permute.xlu0 %2771  ;;  %v3453_v50 = vmul.f32 %v6104_v6, %v3452_v44  ;;  %v3454_v23 = vmul.f32 %v6110_v57, %v3452_v44  ;;  %v3429_v11 = vsel %vm1433_vm7, %v3426_v19, %v3428_v60  ;;  %v3433_v27 = vrot.slane %v3418_v25, 5 }
 0x2fe   :  { %v2746_v37 = vadd.f32 %v2738_v39, %v2706_v42  ;;  %v2783_v56 = vadd.f32 %v2772_v59, %v2743_v20  ;;  %v3455_v36 = vmul.f32 %v6267_v16, %v3452_v44  ;;  %v3432_v38 = vsel %vm1433_vm7, %v3430_v28, %v3431_v32 }
 0x2ff   :  { %3397 = vrot.lane.b32.xlu1 %v3389_v62, %s4031_s4  ;;  %3399 = vrot.lane.b32.xlu0 %v3392_v2, %s4031_s4  ;;  %v3456_v4 = vmul.f32 %v6125_v35, %v3452_v44  ;;  %v3457_v58 = vmul.f32 %v6140_v15, %v3452_v44  ;;  %v3524_v14 = vstv %s6379_s5  ;;  %v3465_v46 = vrot.slane %v3453_v50, 5 }
 0x300   :  { %v3466_v40 = vrot.slane %v3454_v23, 5  ;;  %v3468_v7 = vrot.slane %v3455_v36, 5  ;;  %v3458_v30 = vmul.f32 %v6330_v31, %v3452_v44  ;;  %v3525_v63 = vmul.f32 %v6104_v6, %v3524_v14 }
 0x301   :  { %v2774_v43 = vpop.permute.xlu1 %2773  ;;  %v2776_v0 = vpop.permute.xlu0 %2775  ;;  %v3434_v61 = vsel %vm1433_vm7, %v3431_v32, %v3433_v27  ;;  %v3470_v51 = vrot.slane %v3456_v4, 5  ;;  %v3471_v47 = vrot.slane %v3457_v58, 5  ;;  %v3526_v5 = vmul.f32 %v6110_v57, %v3524_v14 }
 0x302   :  { %v2784_v8 = vadd.f32 %v2774_v43, %v2744_v24  ;;  %v2785_v29 = vadd.f32 %v2776_v0, %v2745_v3  ;;  %v3467_v33 = vsel %vm1433_vm7, %v3465_v46, %v3466_v40  ;;  %v3469_v3 = vsel %vm1433_vm7, %v3466_v40, %v3468_v7 }
 0x303   :  { %3401 = vrot.lane.b32.xlu1 %v3394_v9, %s4031_s4  ;;  %3435 = vrot.lane.b32.xlu0 %v3427_v1, %s4032_s7  ;;  %v3473_v17 = vrot.slane %v3458_v30, 5  ;;  %v3537_v10 = vrot.slane %v3525_v63, 6  ;;  %v3472_v20 = vsel %vm1433_vm7, %v3470_v51, %v3471_v47  ;;  %v3527_v42 = vmul.f32 %v6267_v16, %v3524_v14 }
 0x304   :  { %v3528_v34 = vmul.f32 %v6125_v35, %v3524_v14  ;;  %v3529_v13 = vmul.f32 %v6140_v15, %v3524_v14  ;;  %v3538_v12 = vrot.slane %v3526_v5, 6  ;;  %v3564_v19 = vstv %s3902_s6 }
 0x305   :  { %v2778_v45 = vpop.permute.xlu1 %2777  ;;  %v2812_v48 = vpop.permute.xlu0 %2811  ;;  %v3474_v55 = vsel %vm1433_vm7, %v3471_v47, %v3473_v17  ;;  %v3530_v21 = vmul.f32 %v6330_v31, %v3524_v14  ;;  %v3565_v44 = vmul.f32 %v6104_v6, %v3564_v19  ;;  %v3566_v24 = vmul.f32 %v6110_v57, %v3564_v19 }
 0x306   :  { %v2786_v53 = vadd.f32 %v2778_v45, %v2746_v37  ;;  %v2823_v41 = vadd.f32 %v2812_v48, %v2783_v56  ;;  %v3540_v56 = vrot.slane %v3527_v42, 6  ;;  %v3542_v2 = vrot.slane %v3528_v34, 6 }
 0x307   :  { %3437 = vrot.lane.b32.xlu1 %v3429_v11, %s4032_s7  ;;  %3439 = vrot.lane.b32.xlu0 %v3432_v38, %s4032_s7  ;;  %v3539_v43 = vsel %vm1706_vm8, %v3537_v10, %v3538_v12  ;;  %v3543_v0 = vrot.slane %v3529_v13, 6  ;;  %v3545_v9 = vrot.slane %v3530_v21, 6  ;;  %v3567_v1 = vmul.f32 %v6267_v16, %v3564_v19 }
 0x308   :  { %v3568_v28 = vmul.f32 %v6125_v35, %v3564_v19  ;;  %v3577_v50 = vrot.slane %v3565_v44, 6  ;;  %v3578_v23 = vrot.slane %v3566_v24, 6  ;;  %v3569_v11 = vmul.f32 %v6140_v15, %v3564_v19 }
 0x309   :  { %v2814_v18 = vpop.permute.xlu1 %2813  ;;  %v2816_v26 = vpop.permute.xlu0 %2815  ;;  %v3544_v45 = vsel %vm1706_vm8, %v3542_v2, %v3543_v0  ;;  %v3604_v48 = vstv %s6412_s8  ;;  %v2948_v38 = vstv %s6416_s10  ;;  %v3546_v4 = vsel %vm1706_vm8, %v3543_v0, %v3545_v9 }
 0x30a   :  { %v2824_v49 = vadd.f32 %v2814_v18, %v2784_v8  ;;  %v2825_v54 = vadd.f32 %v2816_v26, %v2785_v29  ;;  %v3541_v29 = vsel %vm1706_vm8, %v3538_v12, %v3540_v56  ;;  %v3580_v58 = vrot.slane %v3567_v1, 6 }
 0x30b   :  { %3441 = vrot.lane.b32.xlu1 %v3434_v61, %s4032_s7  ;;  %3475 = vrot.lane.b32.xlu0 %v3467_v33, %s4033_s9  ;;  %v3582_v14 = vrot.slane %v3568_v28, 6  ;;  %v3579_v40 = vsel %vm1706_vm8, %v3577_v50, %v3578_v23  ;;  %v3583_v7 = vrot.slane %v3569_v11, 6  ;;  %v3605_v30 = vmul.f32 %v6104_v6, %v3604_v48 }
 0x30c   :  { %v3606_v63 = vmul.f32 %v6110_v57, %v3604_v48  ;;  %v2949_v61 = vmul.f32 %v6104_v6, %v2948_v38  ;;  %v2950_v51 = vmul.f32 %v6110_v57, %v2948_v38  ;;  %v6446_v47 = vstv %s6425_s11 }
 0x30d   :  { %v2818_v52 = vpop.permute.xlu1 %2817  ;;  %v2852_v62 = vpop.permute.xlu0 %2851  ;;  %v3608_v33 = vmul.f32 %v6125_v35, %v3604_v48  ;;  %v6452_v5 = vmul.f32 %v6140_v15, %v3604_v48  ;;  %v3584_v10 = vsel %vm1706_vm8, %v3582_v14, %v3583_v7  ;;  %v2952_v12 = vmul.f32 %v6125_v35, %v2948_v38 }
 0x30e   :  { %v2826_v39 = vadd.f32 %v2818_v52, %v2786_v53  ;;  %v2863_v59 = vadd.f32 %v2852_v62, %v2823_v41  ;;  %v3570_v53 = vmul.f32 %v6330_v31, %v3564_v19  ;;  %v3617_v62 = vrot.slane %v3605_v30, 6 }
 0x30f   :  { %3477 = vrot.lane.b32.xlu1 %v3469_v3, %s4033_s9  ;;  %3479 = vrot.lane.b32.xlu0 %v3472_v20, %s4033_s9  ;;  %v3618_v20 = vrot.slane %v3606_v63, 6  ;;  %v2961_v13 = vrot.slane %v2949_v61, 4  ;;  %v2953_v19 = vmul.f32 %v6140_v15, %v2948_v38  ;;  %v3622_v21 = vrot.slane %v3608_v33, 6 }
 0x310   :  { %v3585_v52 = vrot.slane %v3570_v53, 6  ;;  %v3610_v24 = vmul.f32 %v6330_v31, %v3604_v48  ;;  %v3646_v9 = vmul.f32 %v6110_v57, %v6446_v47  ;;  %v2966_v28 = vrot.slane %v2952_v12, 4 }
 0x311   :  { %v2854_v22 = vpop.permute.xlu1 %2853  ;;  %v2856_v37 = vpop.permute.xlu0 %2855  ;;  %v3619_v44 = vsel %vm1706_vm8, %v3617_v62, %v3618_v20  ;;  %v3647_v11 = vmul.f32 %v6267_v16, %v6446_v47 }
 0x312   :  { %v2864_v60 = vadd.f32 %v2854_v22, %v2824_v49  ;;  %v2865_v25 = vadd.f32 %v2856_v37, %v2825_v54  ;;  %v3581_v49 = vsel %vm1706_vm8, %v3578_v23, %v3580_v58  ;;  %v3607_v54 = vmul.f32 %v6267_v16, %v3604_v48 }
 0x313   :  { %3481 = vrot.lane.b32.xlu1 %v3474_v55, %s4033_s9  ;;  %3547 = vrot.lane.b32.xlu0 %v3539_v43, %s4028_s25  ;;  %v3623_v22 = vrot.slane %v6452_v5, 6  ;;  %v3586_v2 = vsel %vm1706_vm8, %v3583_v7, %v3585_v52  ;;  %v3649_v58 = vmul.f32 %v6140_v15, %v6446_v47  ;;  %v3658_v53 = vrot.slane %v3646_v9, 6 }
 0x314   :  { %v3620_v55 = vrot.slane %v3607_v54, 6 }
 0x315   :  { %v2858_v32 = vpop.permute.xlu1 %2857  ;;  %v2892_v8 = vpop.permute.xlu0 %2891  ;;  %v3624_v23 = vsel %vm1706_vm8, %v3622_v21, %v3623_v22  ;;  %v3663_v33 = vrot.slane %v3649_v58, 6 }
 0x316   :  { %v2866_v27 = vadd.f32 %v2858_v32, %v2826_v39  ;;  %v2903_v36 = vadd.f32 %v2892_v8, %v2863_v59  ;;  %v2962_v39 = vrot.slane %v2950_v51, 4  ;;  %v2951_v59 = vmul.f32 %v6267_v16, %v2948_v38 }
 0x317   :  { %3549 = vrot.lane.b32.xlu1 %v3541_v29, %s4028_s25  ;;  %3551 = vrot.lane.b32.xlu0 %v3544_v45, %s4028_s25  ;;  %v2967_v32 = vrot.slane %v2953_v19, 4  ;;  %v2954_v8 = vmul.f32 %v6330_v31, %v2948_v38  ;;  %v3621_v50 = vsel %vm1706_vm8, %v3618_v20, %v3620_v55  ;;  %v3625_v45 = vrot.slane %v3610_v24, 6 }
 0x318   :  { %v2963_v0 = vsel %vm1160_vm6, %v2961_v13, %v2962_v39  ;;  %v2964_v1 = vrot.slane %v2951_v59, 4 }
 0x319   :  { %v2894_v41 = vpop.permute.xlu1 %2893  ;;  %v2896_v46 = vpop.permute.xlu0 %2895  ;;  %v2969_v7 = vrot.slane %v2954_v8, 4 }
 0x31a   :  { %v2904_v18 = vadd.f32 %v2894_v41, %v2864_v60  ;;  %v2905_v26 = vadd.f32 %v2896_v46, %v2865_v25  ;;  %v3645_v60 = vmul.f32 %v6104_v6, %v6446_v47  ;;  %v2965_v46 = vsel %vm1160_vm6, %v2962_v39, %v2964_v1 }
 0x31b   :  { %3553 = vrot.lane.b32.xlu1 %v3546_v4, %s4028_s25  ;;  %3587 = vrot.lane.b32.xlu0 %v3579_v40, %s4029_s27  ;;  %s6455_s25 = sld [smem:[#allocation8 + $0x60]]  ;;  %v3648_v4 = vmul.f32 %v6125_v35, %v6446_v47  ;;  %v2968_v40 = vsel %vm1160_vm6, %v2966_v28, %v2967_v32 }
 0x31c   :  { %v3657_v48 = vrot.slane %v3645_v60, 6 }
 0x31d   :  { %v2898_v3 = vpop.permute.xlu1 %2897  ;;  %v2932_v17 = vpop.permute.xlu0 %2931  ;;  %v3662_v54 = vrot.slane %v3648_v4, 6 }
 0x31e   :  { %v2906_v42 = vadd.f32 %v2898_v3, %v2866_v27  ;;  %v2943_v34 = vadd.f32 %v2932_v17, %v2903_v36 }
 0x31f   :  { %3589 = vrot.lane.b32.xlu1 %v3581_v49, %s4029_s27  ;;  %3591 = vrot.lane.b32.xlu0 %v3584_v10, %s4029_s27  ;;  %v3626_v49 = vsel %vm1706_vm8, %v3623_v22, %v3625_v45  ;;  %v3659_v10 = vsel %vm1706_vm8, %v3657_v48, %v3658_v53  ;;  %v3664_v59 = vsel %vm1706_vm8, %v3662_v54, %v3663_v33 }
 0x320   :  { %v2975_v29 = vadd.f32 %v2963_v0, %v2943_v34 }
 0x321   :  { %v2934_v37 = vpop.permute.xlu1 %2933  ;;  %v2936_v56 = vpop.permute.xlu0 %2935  ;;  %v3684_v41 = vstv %s6455_s25 }
 0x322   :  { %v2944_v25 = vadd.f32 %v2934_v37, %v2904_v18  ;;  %v2945_v43 = vadd.f32 %v2936_v56, %v2905_v26  ;;  %v3660_v18 = vrot.slane %v3647_v11, 6  ;;  %v3650_v26 = vmul.f32 %v6330_v31, %v6446_v47 }
 0x323   :  { %3593 = vrot.lane.b32.xlu1 %v3586_v2, %s4029_s27  ;;  %3627 = vrot.lane.b32.xlu0 %v3619_v44, %s4030_s29  ;;  %s6483_s27 = sld [smem:[#allocation8 + $0x61]]  ;;  %v3685_v5 = vmul.f32 %v6104_v6, %v3684_v41  ;;  %v3686_v52 = vmul.f32 %v6110_v57, %v3684_v41  ;;  %v2970_v47 = vsel %vm1160_vm6, %v2967_v32, %v2969_v7 }
 0x324   :  { %v2976_v30 = vadd.f32 %v2965_v46, %v2944_v25  ;;  %v2977_v63 = vadd.f32 %v2968_v40, %v2945_v43  ;;  %v3661_v20 = vsel %vm1706_vm8, %v3658_v53, %v3660_v18  ;;  %v3687_v34 = vmul.f32 %v6267_v16, %v3684_v41 }
 0x325   :  { %v2938_v27 = vpop.permute.xlu1 %2937  ;;  %v3004_v36 = vpop.permute.xlu0 %3003  ;;  %v3697_v12 = vrot.slane %v3685_v5, 6  ;;  %v3688_v19 = vmul.f32 %v6125_v35, %v3684_v41  ;;  %v3689_v55 = vmul.f32 %v6140_v15, %v3684_v41  ;;  %v3698_v37 = vrot.slane %v3686_v52, 6 }
 0x326   :  { %v2946_v14 = vadd.f32 %v2938_v27, %v2906_v42  ;;  %v3015_v38 = vadd.f32 %v3004_v36, %v2975_v29  ;;  %v3665_v42 = vrot.slane %v3650_v26, 6  ;;  %v3700_v2 = vrot.slane %v3687_v34, 6 }
 0x327   :  { %3629 = vrot.lane.b32.xlu1 %v3621_v50, %s4030_s29  ;;  %3631 = vrot.lane.b32.xlu0 %v3624_v23, %s4030_s29  ;;  %v3690_v44 = vmul.f32 %v6330_v31, %v3684_v41  ;;  %v3702_v43 = vrot.slane %v3688_v19, 6  ;;  %v3703_v0 = vrot.slane %v3689_v55, 6  ;;  %v3699_v32 = vsel %vm1706_vm8, %v3697_v12, %v3698_v37  ;;  %v6531_v19 = vld [vmem:[#allocation2 + $0x30] sm:$0xff] }
 0x328   :  { %v2978_v62 = vadd.f32 %v2970_v47, %v2946_v14  ;;  %v3666_v25 = vsel %vm1706_vm8, %v3663_v33, %v3665_v42  ;;  %v3701_v29 = vsel %vm1706_vm8, %v3698_v37, %v3700_v2 }
 0x329   :  { %v3006_v61 = vpop.permute.xlu1 %3005  ;;  %v3008_v51 = vpop.permute.xlu0 %3007  ;;  %v3724_v56 = vstv %s6483_s27  ;;  %v3705_v50 = vrot.slane %v3690_v44, 6  ;;  %v3704_v27 = vsel %vm1706_vm8, %v3702_v43, %v3703_v0  ;;  %v6538_v43 = vld [vmem:[#allocation2 + $0x48] sm:$0xff] }
 0x32a   :  { %v3016_v3 = vadd.f32 %v3006_v61, %v2976_v30  ;;  %v3017_v17 = vadd.f32 %v3008_v51, %v2977_v63  ;;  %v3725_v9 = vmul.f32 %v6104_v6, %v3724_v56  ;;  %v3726_v8 = vmul.f32 %v6110_v57, %v3724_v56 }
 0x32b   :  { %3633 = vrot.lane.b32.xlu1 %v3626_v49, %s4030_s29  ;;  %3667 = vrot.lane.b32.xlu0 %v3659_v10, %s4031_s4  ;;  %v3727_v6 = vmul.f32 %v6267_v16, %v3724_v56  ;;  %v3728_v45 = vmul.f32 %v6125_v35, %v3724_v56  ;;  %v3729_v57 = vmul.f32 %v6140_v15, %v3724_v56  ;;  %s3893_s29 = sld [smem:[#allocation8 + $0x54]] }
 0x32c   :  { %v3737_v36 = vrot.slane %v3725_v9, 6  ;;  %v3738_v58 = vrot.slane %v3726_v8, 6  ;;  %v3706_v53 = vsel %vm1706_vm8, %v3703_v0, %v3705_v50  ;;  %v3730_v40 = vmul.f32 %v6330_v31, %v3724_v56 }
 0x32d   :  { %v3010_v13 = vpop.permute.xlu1 %3009  ;;  %v3044_v39 = vpop.permute.xlu0 %3043  ;;  %v3740_v41 = vrot.slane %v3727_v6, 6  ;;  %v3742_v46 = vrot.slane %v3728_v45, 6  ;;  %v3743_v63 = vrot.slane %v3729_v57, 6 }
 0x32e   :  { %v3018_v21 = vadd.f32 %v3010_v13, %v2978_v62  ;;  %v3055_v22 = vadd.f32 %v3044_v39, %v3015_v38  ;;  %v3739_v35 = vsel %vm1706_vm8, %v3737_v36, %v3738_v58  ;;  %v3745_v61 = vrot.slane %v3730_v40, 6 }
 0x32f   :  { %3669 = vrot.lane.b32.xlu1 %v3661_v20, %s4031_s4  ;;  %3671 = vrot.lane.b32.xlu0 %v3664_v59, %s4031_s4  ;;  %v3741_v54 = vsel %vm1706_vm8, %v3738_v58, %v3740_v41  ;;  %v3744_v33 = vsel %vm1706_vm8, %v3742_v46, %v3743_v63 }
 0x330   :  { %v3746_v52 = vsel %vm1706_vm8, %v3743_v63, %v3745_v61 }
 0x331   :  { %v3046_v24 = vpop.permute.xlu1 %3045  ;;  %v3048_v60 = vpop.permute.xlu0 %3047  ;;  %v3220_v34 = vstv %s3893_s29 }
 0x332   :  { %v3056_v1 = vadd.f32 %v3046_v24, %v3016_v3  ;;  %v3057_v28 = vadd.f32 %v3048_v60, %v3017_v17  ;;  %v3221_v55 = vmul.f32 %v6531_v19, %v3220_v34  ;;  %v3223_v24 = vmul.f32 %v6267_v16, %v3220_v34 }
 0x333   :  { %3673 = vrot.lane.b32.xlu1 %v3666_v25, %s4031_s4  ;;  %3707 = vrot.lane.b32.xlu0 %v3699_v32, %s4032_s7  ;;  %v3224_v0 = vmul.f32 %v6538_v43, %v3220_v34  ;;  %v3225_v9 = vmul.f32 %v6140_v15, %v3220_v34  ;;  %s3900_s4 = sld [smem:[#allocation8 + $0x5b]] }
 0x334   :  { %v3233_v60 = vrot.slane %v3221_v55, 5 }
 0x335   :  { %v3050_v23 = vpop.permute.xlu1 %3049  ;;  %v3084_v11 = vpop.permute.xlu0 %3083 }
 0x336   :  { %v3058_v48 = vadd.f32 %v3050_v23, %v3018_v21  ;;  %v3095_v4 = vadd.f32 %v3084_v11, %v3055_v22  ;;  %v6534_v21 = vld [vmem:[#allocation2 + $0x38] sm:$0xff]  ;;  %v3238_v23 = vrot.slane %v3224_v0, 5  ;;  %v3239_v11 = vrot.slane %v3225_v9, 5 }
 0x337   :  { %3709 = vrot.lane.b32.xlu1 %v3701_v29, %s4032_s7  ;;  %3711 = vrot.lane.b32.xlu0 %v3704_v27, %s4032_s7  ;;  %v3222_v22 = vmul.f32 %v6534_v21, %v3220_v34  ;;  %v3236_v29 = vrot.slane %v3223_v24, 5  ;;  %v3226_v27 = vmul.f32 %v6330_v31, %v3220_v34 }
 0x338   :  { %v3240_v15 = vsel %vm1433_vm7, %v3238_v23, %v3239_v11 }
 0x339   :  { %v3086_v14 = vpop.permute.xlu1 %3085  ;;  %v3088_v38 = vpop.permute.xlu0 %3087  ;;  %v3234_v25 = vrot.slane %v3222_v22, 5  ;;  %v3241_v57 = vrot.slane %v3226_v27, 5  ;;  %v3492_v24 = vstv %s3900_s4 }
 0x33a   :  { %v3096_v7 = vadd.f32 %v3086_v14, %v3056_v1  ;;  %v3097_v30 = vadd.f32 %v3088_v38, %v3057_v28  ;;  %v3493_v9 = vmul.f32 %v6531_v19, %v3492_v24 }
 0x33b   :  { %3713 = vrot.lane.b32.xlu1 %v3706_v53, %s4032_s7  ;;  %3747 = vrot.lane.b32.xlu0 %v3739_v35, %s4033_s9  ;;  %v3235_v50 = vsel %vm1433_vm7, %v3233_v60, %v3234_v25  ;;  %v3237_v58 = vsel %vm1433_vm7, %v3234_v25, %v3236_v29  ;;  %s4034_s7 = smov [#allocation9]  }
 0x33d   :  { %v3090_v18 = vpop.permute.xlu1 %3089  ;;  %v3124_v26 = vpop.permute.xlu0 %3123 }
 0x33e   :  { %v3098_v51 = vadd.f32 %v3090_v18, %v3058_v48  ;;  %v3135_v49 = vadd.f32 %v3124_v26, %v3095_v4 }
 0x33f   :  { %3749 = vrot.lane.b32.xlu1 %v3741_v54, %s4033_s9  ;;  %3751 = vrot.lane.b32.xlu0 %v3744_v33, %s4033_s9 }
 0x341   :  { %v3126_v5 = vpop.permute.xlu1 %3125  ;;  %v3128_v3 = vpop.permute.xlu0 %3127 }
 0x342   :  { %v3136_v17 = vadd.f32 %v3126_v5, %v3096_v7  ;;  %v3137_v10 = vadd.f32 %v3128_v3, %v3097_v30  ;;  %v3242_v7 = vsel %vm1433_vm7, %v3239_v11, %v3241_v57  ;;  %v3505_v11 = vrot.slane %v3493_v9, 6 }
 0x343   :  { %3753 = vrot.lane.b32.xlu1 %v3746_v52, %s4033_s9  ;;  %s3797_s9 = sshll.u32 %s4034_s7, 4  ;;  %s3798_s9 = int_to_ptr.vmem [resolvable:$true] %s3797_s9 }
 0x344   :  { %s3996_s12 = scalar_lea.vmem %s3798_s9, 512  ;;  %p4001_p11 = scmp.lt.s32.totalorder %s3798_s9, %s3798_s9 }
 0x345   :  { %v3130_v47 = vpop.permute.xlu1 %3129  ;;  %v3164_v62 = vpop.permute.xlu0 %3163  ;;  %p3997_p10 = scmp.ne.s32.totalorder %s3798_s9, %s3996_s12  ;;  %p4002_p12 = scmp.lt.s32.totalorder %s3996_s12, %s3996_s12 }
 0x346   :  { %v3138_v20 = vadd.f32 %v3130_v47, %v3098_v51  ;;  %v3175_v42 = vadd.f32 %v3164_v62, %v3135_v49 }
 0x347   :  { %p4003_p13 = por %p4002_p12, %p4001_p11 }
 0x349   :  { %v3166_v13 = vpop.permute.xlu1 %3165  ;;  %v3168_v39 = vpop.permute.xlu0 %3167  ;;  %p4004_p0 = pnand %p4003_p13, %p3997_p10 }
 0x34a   :  { %v3176_v59 = vadd.f32 %v3166_v13, %v3136_v17  ;;  %v3177_v12 = vadd.f32 %v3168_v39, %v3137_v10 }
 0x34d   :  { %v3170_v37 = vpop.permute.xlu1 %3169  ;;  %v3204_v56 = vpop.permute.xlu0 %3203 }
 0x34e   :  { %v3178_v2 = vadd.f32 %v3170_v37, %v3138_v20  ;;  %v3215_v44 = vadd.f32 %v3204_v56, %v3175_v42 }
 0x350   :  { %v3247_v36 = vadd.f32 %v3235_v50, %v3215_v44 }
 0x351   :  { %v3206_v1 = vpop.permute.xlu1 %3205  ;;  %v3208_v28 = vpop.permute.xlu0 %3207 }
 0x352   :  { %v3216_v32 = vadd.f32 %v3206_v1, %v3176_v59  ;;  %v3217_v8 = vadd.f32 %v3208_v28, %v3177_v12  ;;  %v3494_v28 = vmul.f32 %v6534_v21, %v3492_v24 }
 0x354   :  { %v3248_v14 = vadd.f32 %v3237_v58, %v3216_v32  ;;  %v3249_v38 = vadd.f32 %v3240_v15, %v3217_v8  ;;  %v3496_v58 = vmul.f32 %v6538_v43, %v3492_v24 }
 0x355   :  { %v3210_v6 = vpop.permute.xlu1 %3209  ;;  %v3276_v45 = vpop.permute.xlu0 %3275 }
 0x356   :  { %v3218_v48 = vadd.f32 %v3210_v6, %v3178_v2  ;;  %v3287_v4 = vadd.f32 %v3276_v45, %v3247_v36  ;;  %v3506_v45 = vrot.slane %v3494_v28, 6 }
 0x358   :  { %v3250_v30 = vadd.f32 %v3242_v7, %v3218_v48  ;;  %v3495_v48 = vmul.f32 %v6267_v16, %v3492_v24  ;;  %v3507_v7 = vsel %vm1706_vm8, %v3505_v11, %v3506_v45  ;;  %v3498_v16 = vmul.f32 %v6330_v31, %v3492_v24 }
 0x359   :  { %v3278_v53 = vpop.permute.xlu1 %3277  ;;  %v3280_v41 = vpop.permute.xlu0 %3279 }
 0x35a   :  { %v3288_v46 = vadd.f32 %v3278_v53, %v3248_v14  ;;  %v3289_v40 = vadd.f32 %v3280_v41, %v3249_v38 }
 0x35d   :  { %v3282_v35 = vpop.permute.xlu1 %3281  ;;  %v3316_v63 = vpop.permute.xlu0 %3315 }
 0x35e   :  { %v3290_v18 = vadd.f32 %v3282_v35, %v3250_v30  ;;  %v3327_v0 = vadd.f32 %v3316_v63, %v3287_v4  ;;  %v3963_v4 = vld [vmem:[#allocation2 + $0x50] sm:$0xff]  ;;  %v3508_v30 = vrot.slane %v3495_v48, 6  ;;  %v3510_v35 = vrot.slane %v3496_v58, 6 }
 0x35f   :  { %v3497_v15 = vmul.f32 %v3963_v4, %v3492_v24 }
 0x361   :  { %v3318_v26 = vpop.permute.xlu1 %3317  ;;  %v3320_v61 = vpop.permute.xlu0 %3319  ;;  %v3511_v63 = vrot.slane %v3497_v15, 6 }
 0x362   :  { %v3328_v29 = vadd.f32 %v3318_v26, %v3288_v46  ;;  %v3329_v50 = vadd.f32 %v3320_v61, %v3289_v40 }
 0x365   :  { %v3322_v51 = vpop.permute.xlu1 %3321  ;;  %v3356_v49 = vpop.permute.xlu0 %3355 }
 0x366   :  { %v3367_v1 = vadd.f32 %v3356_v49, %v3327_v0  ;;  %v3330_v14 = vadd.f32 %v3322_v51, %v3290_v18 }
 0x369   :  { %v3358_v54 = vpop.permute.xlu1 %3357  ;;  %v3360_v33 = vpop.permute.xlu0 %3359 }
 0x36a   :  { %v3368_v27 = vadd.f32 %v3358_v54, %v3328_v29  ;;  %v3369_v36 = vadd.f32 %v3360_v33, %v3329_v50 }
 0x36d   :  { %v3362_v5 = vpop.permute.xlu1 %3361  ;;  %v3396_v3 = vpop.permute.xlu0 %3395 }
 0x36e   :  { %v3407_v23 = vadd.f32 %v3396_v3, %v3367_v1  ;;  %v3370_v41 = vadd.f32 %v3362_v5, %v3330_v14  ;;  %v3509_v3 = vsel %vm1706_vm8, %v3506_v45, %v3508_v30  ;;  %v3512_v5 = vsel %vm1706_vm8, %v3510_v35, %v3511_v63 }
 0x371   :  { %v3398_v17 = vpop.permute.xlu1 %3397  ;;  %v3400_v10 = vpop.permute.xlu0 %3399 }
 0x372   :  { %v3408_v21 = vadd.f32 %v3398_v17, %v3368_v27  ;;  %v3409_v38 = vadd.f32 %v3400_v10, %v3369_v36  ;;  %v3513_v17 = vrot.slane %v3498_v16, 6 }
 0x375   :  { %v3402_v52 = vpop.permute.xlu1 %3401  ;;  %v3436_v47 = vpop.permute.xlu0 %3435 }
 0x376   :  { %v3447_v6 = vadd.f32 %v3436_v47, %v3407_v23  ;;  %v3410_v61 = vadd.f32 %v3402_v52, %v3370_v41  ;;  %v3514_v52 = vsel %vm1706_vm8, %v3511_v63, %v3513_v17 }
 0x379   :  { %v3438_v62 = vpop.permute.xlu1 %3437  ;;  %v3440_v20 = vpop.permute.xlu0 %3439 }
 0x37a   :  { %v3448_v46 = vadd.f32 %v3438_v62, %v3408_v21  ;;  %v3449_v40 = vadd.f32 %v3440_v20, %v3409_v38 }
 0x37d   :  { %v3442_v42 = vpop.permute.xlu1 %3441  ;;  %v3476_v34 = vpop.permute.xlu0 %3475 }
 0x37e   :  { %v3487_v53 = vadd.f32 %v3476_v34, %v3447_v6  ;;  %v3450_v18 = vadd.f32 %v3442_v42, %v3410_v61 }
 0x380   :  { %v3519_v33 = vadd.f32 %v3507_v7, %v3487_v53 }
 0x381   :  { %v3478_v13 = vpop.permute.xlu1 %3477  ;;  %v3480_v39 = vpop.permute.xlu0 %3479 }
 0x382   :  { %v3488_v49 = vadd.f32 %v3478_v13, %v3448_v46  ;;  %v3489_v54 = vadd.f32 %v3480_v39, %v3449_v40 }
 0x384   :  { %v3520_v20 = vadd.f32 %v3509_v3, %v3488_v49  ;;  %v3521_v34 = vadd.f32 %v3512_v5, %v3489_v54 }
 0x385   :  { %v3482_v59 = vpop.permute.xlu1 %3481  ;;  %v3548_v12 = vpop.permute.xlu0 %3547 }
 0x386   :  { %v3559_v51 = vadd.f32 %v3548_v12, %v3519_v33  ;;  %v3490_v62 = vadd.f32 %v3482_v59, %v3450_v18 }
 0x388   :  { %v3522_v42 = vadd.f32 %v3514_v52, %v3490_v62 }
 0x389   :  { %v3550_v55 = vpop.permute.xlu1 %3549  ;;  %v3552_v22 = vpop.permute.xlu0 %3551 }
 0x38a   :  { %v3560_v31 = vadd.f32 %v3550_v55, %v3520_v20  ;;  %v3561_v24 = vadd.f32 %v3552_v22, %v3521_v34 }
 0x38d   :  { %v6547_v37 = vpop.permute.xlu1 %3553  ;;  %v3588_v56 = vpop.permute.xlu0 %3587 }
 0x38e   :  { %v3599_v0 = vadd.f32 %v3588_v56, %v3559_v51  ;;  %v3562_v29 = vadd.f32 %v6547_v37, %v3522_v42 }
 0x391   :  { %v3590_v2 = vpop.permute.xlu1 %3589  ;;  %v3592_v44 = vpop.permute.xlu0 %3591 }
 0x392   :  { %v3600_v12 = vadd.f32 %v3590_v2, %v3560_v31  ;;  %v3601_v1 = vadd.f32 %v3592_v44, %v3561_v24 }
 0x395   :  { %v6549_v60 = vpop.permute.xlu1 %3593  ;;  %v3628_v25 = vpop.permute.xlu0 %3627 }
 0x396   :  { %v3639_v9 = vadd.f32 %v3628_v25, %v3599_v0  ;;  %v3602_v56 = vadd.f32 %v6549_v60, %v3562_v29 }
 0x399   :  { %v3630_v32 = vpop.permute.xlu1 %3629  ;;  %v3632_v8 = vpop.permute.xlu0 %3631 }
 0x39a   :  { %v3640_v50 = vadd.f32 %v3630_v32, %v3600_v12  ;;  %v3641_v23 = vadd.f32 %v3632_v8, %v3601_v1 }
 0x39d   :  { %v3634_v19 = vpop.permute.xlu1 %3633  ;;  %v3668_v57 = vpop.permute.xlu0 %3667 }
 0x39e   :  { %v3679_v28 = vadd.f32 %v3668_v57, %v3639_v9  ;;  %v3642_v36 = vadd.f32 %v3634_v19, %v3602_v56 }
 0x3a1   :  { %v3670_v26 = vpop.permute.xlu1 %3669  ;;  %v3672_v43 = vpop.permute.xlu0 %3671 }
 0x3a2   :  { %v3680_v55 = vadd.f32 %v3670_v26, %v3640_v50  ;;  %v3681_v22 = vadd.f32 %v3672_v43, %v3641_v23 }
 0x3a5   :  { %v3674_v10 = vpop.permute.xlu1 %3673  ;;  %v3708_v47 = vpop.permute.xlu0 %3707 }
 0x3a6   :  { %v3719_v11 = vadd.f32 %v3708_v47, %v3679_v28  ;;  %v3682_v44 = vadd.f32 %v3674_v10, %v3642_v36 }
 0x3a9   :  { %v3710_v13 = vpop.permute.xlu1 %3709  ;;  %v3712_v39 = vpop.permute.xlu0 %3711 }
 0x3aa   :  { %v3720_v6 = vadd.f32 %v3710_v13, %v3680_v55  ;;  %v3721_v45 = vadd.f32 %v3712_v39, %v3681_v22 }
 0x3ad   :  { %v3714_v59 = vpop.permute.xlu1 %3713  ;;  %v3748_v27 = vpop.permute.xlu0 %3747 }
 0x3ae   :  { %v3759_v25 = vadd.f32 %v3748_v27, %v3719_v11  ;;  %v3722_v32 = vadd.f32 %v3714_v59, %v3682_v44 }
 0x3b0   :  { %v3763_v48 = vsub.f32 0.0, %v3759_v25 }
 0x3b1   :  { %v3750_v58 = vpop.permute.xlu1 %3749  ;;  %v3752_v2 = vpop.permute.xlu0 %3751 }
 0x3b2   :  { %v3767_v4 = vmul.f32 1.442695, %v3763_v48  ;;  %v3760_v15 = vadd.f32 %v3750_v58, %v3720_v6  ;;  %v3761_v37 = vadd.f32 %v3752_v2, %v3721_v45 }
 0x3b4   :  { %3920 = vpow2.f32 %v3767_v4  ;;  %v3764_v8 = vsub.f32 0.0, %v3760_v15  ;;  %v3765_v57 = vsub.f32 0.0, %v3761_v37 }
 0x3b5   :  { %v3754_v14 = vpop.permute.xlu1 %3753 }
 0x3b6   :  { %v3769_v21 = vmul.f32 1.442695, %v3764_v8  ;;  %v3771_v60 = vmul.f32 1.442695, %v3765_v57  ;;  %v3762_v38 = vadd.f32 %v3754_v14, %v3722_v32 }
 0x3b8   :  { %3922 = vpow2.f32 %v3769_v21  ;;  %v3766_v53 = vsub.f32 0.0, %v3762_v38 }
 0x3b9   :  { %3924 = vpow2.f32 %v3771_v60 }
 0x3ba   :  { %v3773_v19 = vmul.f32 1.442695, %v3766_v53 }
 0x3bc   :  { %3926 = vpow2.f32 %v3773_v19 }
 0x3c1   :  { %v3921_v41 = vpop.eup %3920 }
 0x3c2   :  { %v3775_v46 = vadd.f32 1.0, %v3921_v41 }
 0x3c4   :  { %3928 = vrcp.f32 %v3775_v46 }
 0x3c5   :  { %v3923_v40 = vpop.eup %3922 }
 0x3c6   :  { %v3925_v7 = vpop.eup %3924  ;;  %v3776_v30 = vadd.f32 1.0, %v3923_v40 }
 0x3c7   :  { %v3777_v35 = vadd.f32 1.0, %v3925_v7 }
 0x3c8   :  { %3930 = vrcp.f32 %v3776_v30 }
 0x3c9   :  { %v3927_v63 = vpop.eup %3926  ;;  %3932 = vrcp.f32 %v3777_v35 }
 0x3ca   :  { %v3778_v16 = vadd.f32 1.0, %v3927_v63 }
 0x3cc   :  { %3934 = vrcp.f32 %v3778_v16 }
 0x3d1   :  { %v3929_v26 = vpop.eup %3928 }
 0x3d2   :  { %3788 = vst.msk [vmem:[#allocation9] sm:$0xff] %vm3787_vm9, %v3929_v26 }
 0x3d5   :  { %v3931_v43 = vpop.eup %3930 }
 0x3d6   :  { %v3933_v61 = vpop.eup %3932  ;;  %3789 = vst.msk [vmem:[#allocation9 + $0x8] sm:$0xff] %vm3787_vm9, %v3931_v43 }
 0x3d7   :  { %3790 = vst.msk [vmem:[#allocation9 + $0x10] sm:$0xff] %vm3787_vm9, %v3933_v61 }
 0x3d9   :  { %v3935_v49 = vpop.eup %3934 }
 0x3da   :  { %3791 = vst.msk [vmem:[#allocation9 + $0x18] sm:$0xff] %vm3787_vm9, %v3935_v49 }
 0x3db   :  { %4007 = shalt.err (!%p4004_p0)
}
 0x3dc   :  { %3803 = dma.vmem_to_hbm [thread:$0]  %s3798_s9, 512, %s6571_s3, [#allocation6], %s4023_s18, %s4023_s18, %s4024_s19  }
 0x3dd   :  { %4020 = dma.done.wait [#allocation6], 512  }
 0x3de   :  { %4021 = vsyncadd [#allocation6], 4294966784 }
 0x3df   :  { %3807 = vsyncpa [#allocation5], 1 }
 0x3e0   :  { %3808 = vsyncpa [#allocation6], 1 }
 0x3e1   :  { %3809 = vsyncpa [#allocation7], 1 }

</bundles_post_ra>
